<compile_context>
chip_gen: v7x
topology: tpu7x:2x2x1
jax: 0.10.0
libtpu: 0.0.40
codegen_flags: <defaults>
</compile_context>

<pallas_src>
import functools

import jax
import jax.numpy as jnp
from jax.experimental import pallas as pl
from jax.experimental.pallas import tpu as pltpu

_PREC = jax.lax.Precision.HIGHEST


# ---------------------------------------------------------------------------
# In-kernel math helpers (VPU/EUP friendly)
# ---------------------------------------------------------------------------
def _erf(x):
    # Abramowitz & Stegun 7.1.26 rational approximation, |err| <= 1.5e-7.
    # TODO(synk): torch.nn.GELU uses exact erf; this matches to ~f32 precision.
    a1, a2, a3, a4, a5 = (0.254829592, -0.284496736, 1.421413741,
                          -1.453152027, 1.061405429)
    p = 0.3275911
    ax = jnp.abs(x)
    t = 1.0 / (1.0 + p * ax)
    poly = ((((a5 * t + a4) * t + a3) * t + a2) * t + a1) * t
    y = 1.0 - poly * jnp.exp(-(ax * ax))
    return jnp.where(x >= 0.0, y, -y)


def _gelu(x):
    return 0.5 * x * (1.0 + _erf(x * 0.7071067811865476))


def _sigmoid(x):
    z = 1.0 / (1.0 + jnp.exp(-jnp.abs(x)))
    return jnp.where(x >= 0.0, z, 1.0 - z)


# ---------------------------------------------------------------------------
# Fused whole-network kernel: one grid step = one batch image
# ---------------------------------------------------------------------------
def _vdp_kernel(x_ref, wc_ref, bc_ref, wc1_ref, bc1_ref, w3x_ref, w3g_ref,
                b3_ref, o_ref, *, num_layers, hw):
    x = x_ref[0]                                           # (C, HW) channels-first

    # Spatial mean as an MXU matvec with transposed RHS -> (1, C) row layout.
    mean_w = jnp.full((1, hw), 1.0 / hw, dtype=jnp.float32)
    g = jnp.dot(mean_w, x.T, precision=_PREC,
                preferred_element_type=jnp.float32)        # (1, C)

    for l in range(num_layers):                            # static unroll (small L)
        # ---- SE-style per-image gate; everything stays in vregs -------------
        h = jnp.dot(g, wc_ref[l], precision=_PREC,
                    preferred_element_type=jnp.float32) + bc_ref[l]   # (1, C/4)
        h = _gelu(h)
        s = jnp.sum(h * wc1_ref[l], axis=-1, keepdims=True) + bc1_ref[l]  # (1, 1)
        gate = _sigmoid(s)                                 # (1, 1)

        # ---- conv3 on cat(x, gate*x), gate folded into the weight ----------
        # (one 128x128 VPU scale-add instead of a second full matmul)
        w_eff = w3x_ref[l] + gate * w3g_ref[l]             # (C, C)

        # Mean push-through: mean(x @ W_eff + b3) == mean(x) @ W_eff + b3,
        # so only the (1, C) mean is propagated layer to layer.
        g = jnp.dot(g, w_eff, precision=_PREC,
                    preferred_element_type=jnp.float32) + b3_ref[l]   # (1, C)

    o_ref[...] = g[None]                                   # (1, 1, C) lane-dense


def viewport_distortion_perception(x_nchw, params):
    """x_nchw: (B, C, H, W) like the PyTorch module. Returns (B, C, 1, 1)."""
    B, C, H, W = x_nchw.shape
    hw = H * W
    L = params["wc"].shape[0]
    c4 = params["wc"].shape[-1]

    # Channels-first view: free reshape, no HBM round-trip transpose.
    x = x_nchw.reshape(B, C, hw).astype(jnp.float32)

    out = pl.pallas_call(
        functools.partial(_vdp_kernel, num_layers=L, hw=hw),
        out_shape=jax.ShapeDtypeStruct((B, 1, C), jnp.float32),
        grid=(B,),
        in_specs=[
            pl.BlockSpec((1, C, hw), lambda b: (b, 0, 0)),   # x: one image / step
            pl.BlockSpec((L, C, c4), lambda b: (0, 0, 0)),   # conv  weight (Cin,Cout)
            pl.BlockSpec((L, 1, c4), lambda b: (0, 0, 0)),   # conv  bias
            pl.BlockSpec((L, 1, c4), lambda b: (0, 0, 0)),   # conv1 weight (row)
            pl.BlockSpec((L, 1, 1), lambda b: (0, 0, 0)),    # conv1 bias
            pl.BlockSpec((L, C, C), lambda b: (0, 0, 0)),    # conv3 weight, x half
            pl.BlockSpec((L, C, C), lambda b: (0, 0, 0)),    # conv3 weight, gated half
            pl.BlockSpec((L, 1, C), lambda b: (0, 0, 0)),    # conv3 bias
        ],
        out_specs=pl.BlockSpec((1, 1, C), lambda b: (b, 0, 0)),
        compiler_params=pltpu.CompilerParams(
            dimension_semantics=("parallel",),               # v7x: 2 TCs split batch
            vmem_limit_bytes=32 * 1024 * 1024),
    )(x, params["wc"], params["bc"], params["wc1"], params["bc1"],
      params["w3x"], params["w3g"], params["b3"])

    # Match torch AdaptiveAvgPool2d(1): (B, C, 1, 1)
    return out.reshape(B, C, 1, 1)


# ---------------------------------------------------------------------------
# Deterministic synthetic parameters.  Conv weights are stored pre-transposed
# into matmul form (Cin, Cout); conv3's (2C -> C) weight is split into the x
# half (rows [:C] of W^T) and the gated half (rows [C:]), matching
# torch.cat((x, x1), dim=1) channel order.
# ---------------------------------------------------------------------------
def init_params(key, embed_dim=128, vac_layers=3):
    c, c4 = embed_dim, embed_dim // 4
    n_per = 6
    ks = jax.random.split(key, vac_layers * n_per)
    scale = 0.05

    def w(k, shape):
        return jax.random.normal(k, shape, jnp.float32) * scale

    wc, bc, wc1, bc1, w3x, w3g, b3 = [], [], [], [], [], [], []
    for l in range(vac_layers):
        k = ks[l * n_per:(l + 1) * n_per]
        wc.append(w(k[0], (c, c4)))              # conv:  Cin=C   -> Cout=C/4
        bc.append(w(k[1], (1, c4)))
        wc1.append(w(k[2], (1, c4)))             # conv1: Cin=C/4 -> Cout=1
        bc1.append(w(k[3], (1, 1)))
        w3 = w(k[4], (2 * c, c))                 # conv3^T: rows [:C]->x, [C:]->x1
        w3x.append(w3[:c])
        w3g.append(w3[c:])
        b3.append(w(k[5], (1, c)))

    stack = lambda xs: jnp.stack(xs, axis=0)
    return dict(wc=stack(wc), bc=stack(bc), wc1=stack(wc1), bc1=stack(bc1),
                w3x=stack(w3x), w3g=stack(w3g), b3=stack(b3))


# ---------------------------------------------------------------------------
# Unfused pure-JAX reference (full (HW, C) propagation, exact erf GELU) used to
# validate the gate-folding + mean-push-through algebra.
# ---------------------------------------------------------------------------
def reference_forward(x_nchw, params):
    B, C, H, W = x_nchw.shape
    x = jnp.transpose(x_nchw, (0, 2, 3, 1)).reshape(B, H * W, C).astype(jnp.float32)
    L = params["wc"].shape[0]
    for l in range(L):
        g = jnp.mean(x, axis=1, keepdims=True)                              # (B,1,C)
        h = jnp.einsum("bnc,cd->bnd", g, params["wc"][l], precision=_PREC) \
            + params["bc"][l]
        h = jax.nn.gelu(h, approximate=False)
        s = jnp.sum(h * params["wc1"][l], axis=-1, keepdims=True) + params["bc1"][l]
        gate = jax.nn.sigmoid(s)                                            # (B,1,1)
        y = jnp.einsum("bnc,cd->bnd", x, params["w3x"][l], precision=_PREC)
        y = y + gate * jnp.einsum("bnc,cd->bnd", x, params["w3g"][l], precision=_PREC)
        x = y + params["b3"][l]
    return jnp.mean(x, axis=1).reshape(B, C, 1, 1)


if __name__ == "__main__":
    embed_dim, vac_layers = 128, 3               # module defaults
    B, H, W = 2, 16, 16

    key = jax.random.PRNGKey(0)
    kp, kx = jax.random.split(key)
    params = init_params(kp, embed_dim, vac_layers)
    x = jax.random.normal(kx, (B, embed_dim, H, W), jnp.float32)   # NCHW like torch

    fwd = jax.jit(viewport_distortion_perception)
    out = fwd(x, params)
    jax.block_until_ready(out)

    assert out.shape == (B, embed_dim, 1, 1)
    assert bool(jnp.all(jnp.isfinite(out)))

    ref = reference_forward(x, params)
    assert bool(jnp.allclose(out, ref, rtol=2e-3, atol=2e-4)), \
        "Pallas kernel diverges from unfused reference"

    print("KERNEL_OK")
</pallas_src>

<mosaic_0001>
module attributes {stable_mosaic.version = 11 : i64} {
  func.func @_vdp_kernel(%arg0: i32, %arg1: memref<1x128x256xf32, #tpu.memory_space<vmem>>, %arg2: memref<3x128x32xf32, #tpu.memory_space<vmem>>, %arg3: memref<3x1x32xf32, #tpu.memory_space<vmem>>, %arg4: memref<3x1x32xf32, #tpu.memory_space<vmem>>, %arg5: memref<3x1x1xf32, #tpu.memory_space<vmem>>, %arg6: memref<3x128x128xf32, #tpu.memory_space<vmem>>, %arg7: memref<3x128x128xf32, #tpu.memory_space<vmem>>, %arg8: memref<3x1x128xf32, #tpu.memory_space<vmem>>, %arg9: memref<1x1x128xf32, #tpu.memory_space<vmem>>) attributes {dimension_semantics = [#tpu.dimension_semantics<parallel>], iteration_bounds = array<i64: 2>, scalar_prefetch = 0 : i64, scratch_operands = 0 : i64, tpu.core_type = #tpu.core_type<tc>, window_params = [{transform_indices = @transform_0, window_bounds = array<i64: 1, 128, 256>}, {pipeline_mode = #tpu.pipeline_mode<synchronous>, transform_indices = @transform_1, window_bounds = array<i64: 3, 128, 32>}, {pipeline_mode = #tpu.pipeline_mode<synchronous>, transform_indices = @transform_2, window_bounds = array<i64: 3, 1, 32>}, {pipeline_mode = #tpu.pipeline_mode<synchronous>, transform_indices = @transform_3, window_bounds = array<i64: 3, 1, 32>}, {pipeline_mode = #tpu.pipeline_mode<synchronous>, transform_indices = @transform_4, window_bounds = array<i64: 3, 1, 1>}, {pipeline_mode = #tpu.pipeline_mode<synchronous>, transform_indices = @transform_5, window_bounds = array<i64: 3, 128, 128>}, {pipeline_mode = #tpu.pipeline_mode<synchronous>, transform_indices = @transform_6, window_bounds = array<i64: 3, 128, 128>}, {pipeline_mode = #tpu.pipeline_mode<synchronous>, transform_indices = @transform_7, window_bounds = array<i64: 3, 1, 128>}, {transform_indices = @transform_8, window_bounds = array<i64: 1, 1, 128>}]} {
    %c0 = arith.constant 0 : index
    %c0_0 = arith.constant 0 : index
    %c0_1 = arith.constant 0 : index
    %0 = vector.load %arg1[%c0, %c0_0, %c0_1] : memref<1x128x256xf32, #tpu.memory_space<vmem>>, vector<1x128x256xf32>
    %1 = vector.shape_cast %0 : vector<1x128x256xf32> to vector<128x256xf32>
    %cst = arith.constant 3.906250e-03 : f32
    %2 = vector.broadcast %cst : f32 to vector<1x256xf32>
    %3 = tpu.transpose %1, [1, 0] : vector<128x256xf32> -> vector<256x128xf32>
    %cst_2 = arith.constant dense<0.000000e+00> : vector<1x128xf32>
    %4 = tpu.matmul %2, %3, %cst_2 {dimension_numbers = #tpu.dot_dimension_numbers<[1], [0], [0], [1], [0, 0, 1, 1], [], []>, precision = #tpu.contract_precision<fp32>} : vector<1x256xf32>, vector<256x128xf32>, vector<1x128xf32> -> vector<1x128xf32>
    %c0_3 = arith.constant 0 : index
    %c0_4 = arith.constant 0 : index
    %c0_5 = arith.constant 0 : index
    %5 = vector.load %arg2[%c0_3, %c0_4, %c0_5] : memref<3x128x32xf32, #tpu.memory_space<vmem>>, vector<1x128x32xf32>
    %6 = vector.shape_cast %5 : vector<1x128x32xf32> to vector<128x32xf32>
    %cst_6 = arith.constant dense<0.000000e+00> : vector<1x32xf32>
    %7 = tpu.matmul %4, %6, %cst_6 {dimension_numbers = #tpu.dot_dimension_numbers<[1], [0], [0], [1], [0, 0, 1, 1], [], []>, precision = #tpu.contract_precision<fp32>} : vector<1x128xf32>, vector<128x32xf32>, vector<1x32xf32> -> vector<1x32xf32>
    %c0_7 = arith.constant 0 : index
    %c0_8 = arith.constant 0 : index
    %c0_9 = arith.constant 0 : index
    %8 = vector.load %arg3[%c0_7, %c0_8, %c0_9] : memref<3x1x32xf32, #tpu.memory_space<vmem>>, vector<1x1x32xf32>
    %9 = vector.shape_cast %8 : vector<1x1x32xf32> to vector<1x32xf32>
    %10 = arith.addf %7, %9 : vector<1x32xf32>
    %cst_10 = arith.constant 5.000000e-01 : f32
    %11 = vector.broadcast %cst_10 : f32 to vector<1x32xf32>
    %12 = arith.mulf %11, %10 : vector<1x32xf32>
    %cst_11 = arith.constant 0.707106769 : f32
    %13 = vector.broadcast %cst_11 : f32 to vector<1x32xf32>
    %14 = arith.mulf %10, %13 : vector<1x32xf32>
    %15 = math.absf %14 : vector<1x32xf32>
    %cst_12 = arith.constant 0.327591091 : f32
    %16 = vector.broadcast %cst_12 : f32 to vector<1x32xf32>
    %17 = arith.mulf %16, %15 : vector<1x32xf32>
    %cst_13 = arith.constant 1.000000e+00 : f32
    %18 = vector.broadcast %cst_13 : f32 to vector<1x32xf32>
    %19 = arith.addf %18, %17 : vector<1x32xf32>
    %cst_14 = arith.constant 1.000000e+00 : f32
    %20 = vector.broadcast %cst_14 : f32 to vector<1x32xf32>
    %21 = arith.divf %20, %19 : vector<1x32xf32>
    %cst_15 = arith.constant 1.06140542 : f32
    %22 = vector.broadcast %cst_15 : f32 to vector<1x32xf32>
    %23 = arith.mulf %22, %21 : vector<1x32xf32>
    %cst_16 = arith.constant -1.45315206 : f32
    %24 = vector.broadcast %cst_16 : f32 to vector<1x32xf32>
    %25 = arith.addf %23, %24 : vector<1x32xf32>
    %26 = arith.mulf %25, %21 : vector<1x32xf32>
    %cst_17 = arith.constant 1.42141378 : f32
    %27 = vector.broadcast %cst_17 : f32 to vector<1x32xf32>
    %28 = arith.addf %26, %27 : vector<1x32xf32>
    %29 = arith.mulf %28, %21 : vector<1x32xf32>
    %cst_18 = arith.constant -0.284496725 : f32
    %30 = vector.broadcast %cst_18 : f32 to vector<1x32xf32>
    %31 = arith.addf %29, %30 : vector<1x32xf32>
    %32 = arith.mulf %31, %21 : vector<1x32xf32>
    %cst_19 = arith.constant 0.254829586 : f32
    %33 = vector.broadcast %cst_19 : f32 to vector<1x32xf32>
    %34 = arith.addf %32, %33 : vector<1x32xf32>
    %35 = arith.mulf %34, %21 : vector<1x32xf32>
    %36 = arith.mulf %15, %15 : vector<1x32xf32>
    %cst_20 = arith.constant 0.000000e+00 : f32
    %37 = vector.broadcast %cst_20 : f32 to vector<1x32xf32>
    %38 = arith.subf %37, %36 : vector<1x32xf32>
    %39 = math.exp %38 : vector<1x32xf32>
    %40 = arith.mulf %35, %39 : vector<1x32xf32>
    %cst_21 = arith.constant 1.000000e+00 : f32
    %41 = vector.broadcast %cst_21 : f32 to vector<1x32xf32>
    %42 = arith.subf %41, %40 : vector<1x32xf32>
    %cst_22 = arith.constant 0.000000e+00 : f32
    %43 = vector.broadcast %cst_22 : f32 to vector<1x32xf32>
    %44 = arith.cmpf oge, %14, %43 : vector<1x32xf32>
    %cst_23 = arith.constant 0.000000e+00 : f32
    %45 = vector.broadcast %cst_23 : f32 to vector<1x32xf32>
    %46 = arith.subf %45, %42 : vector<1x32xf32>
    %47 = arith.select %44, %42, %46 : vector<1x32xi1>, vector<1x32xf32>
    %cst_24 = arith.constant 1.000000e+00 : f32
    %48 = vector.broadcast %cst_24 : f32 to vector<1x32xf32>
    %49 = arith.addf %48, %47 : vector<1x32xf32>
    %50 = arith.mulf %12, %49 : vector<1x32xf32>
    %c0_25 = arith.constant 0 : index
    %c0_26 = arith.constant 0 : index
    %c0_27 = arith.constant 0 : index
    %51 = vector.load %arg4[%c0_25, %c0_26, %c0_27] : memref<3x1x32xf32, #tpu.memory_space<vmem>>, vector<1x1x32xf32>
    %52 = vector.shape_cast %51 : vector<1x1x32xf32> to vector<1x32xf32>
    %53 = arith.mulf %50, %52 : vector<1x32xf32>
    %cst_28 = arith.constant dense<0.000000e+00> : vector<1xf32>
    %54 = vector.multi_reduction <add>, %53, %cst_28 [1] : vector<1x32xf32> to vector<1xf32>
    %55 = vector.shape_cast %54 : vector<1xf32> to vector<1x1xf32>
    %c0_29 = arith.constant 0 : index
    %c0_30 = arith.constant 0 : index
    %c0_31 = arith.constant 0 : index
    %56 = vector.load %arg5[%c0_29, %c0_30, %c0_31] : memref<3x1x1xf32, #tpu.memory_space<vmem>>, vector<1x1x1xf32>
    %57 = vector.shape_cast %56 : vector<1x1x1xf32> to vector<1x1xf32>
    %58 = arith.addf %55, %57 : vector<1x1xf32>
    %59 = math.absf %58 : vector<1x1xf32>
    %cst_32 = arith.constant 0.000000e+00 : f32
    %60 = vector.broadcast %cst_32 : f32 to vector<1x1xf32>
    %61 = arith.subf %60, %59 : vector<1x1xf32>
    %62 = math.exp %61 : vector<1x1xf32>
    %cst_33 = arith.constant 1.000000e+00 : f32
    %63 = vector.broadcast %cst_33 : f32 to vector<1x1xf32>
    %64 = arith.addf %63, %62 : vector<1x1xf32>
    %cst_34 = arith.constant 1.000000e+00 : f32
    %65 = vector.broadcast %cst_34 : f32 to vector<1x1xf32>
    %66 = arith.divf %65, %64 : vector<1x1xf32>
    %cst_35 = arith.constant 0.000000e+00 : f32
    %67 = vector.broadcast %cst_35 : f32 to vector<1x1xf32>
    %68 = arith.cmpf oge, %58, %67 : vector<1x1xf32>
    %cst_36 = arith.constant 1.000000e+00 : f32
    %69 = vector.broadcast %cst_36 : f32 to vector<1x1xf32>
    %70 = arith.subf %69, %66 : vector<1x1xf32>
    %71 = arith.select %68, %66, %70 : vector<1x1xi1>, vector<1x1xf32>
    %c0_37 = arith.constant 0 : index
    %c0_38 = arith.constant 0 : index
    %c0_39 = arith.constant 0 : index
    %72 = vector.load %arg6[%c0_37, %c0_38, %c0_39] : memref<3x128x128xf32, #tpu.memory_space<vmem>>, vector<1x128x128xf32>
    %73 = vector.shape_cast %72 : vector<1x128x128xf32> to vector<128x128xf32>
    %c0_40 = arith.constant 0 : index
    %c0_41 = arith.constant 0 : index
    %c0_42 = arith.constant 0 : index
    %74 = vector.load %arg7[%c0_40, %c0_41, %c0_42] : memref<3x128x128xf32, #tpu.memory_space<vmem>>, vector<1x128x128xf32>
    %75 = vector.shape_cast %74 : vector<1x128x128xf32> to vector<128x128xf32>
    %76 = vector.broadcast %71 : vector<1x1xf32> to vector<128x128xf32>
    %77 = arith.mulf %76, %75 : vector<128x128xf32>
    %78 = arith.addf %73, %77 : vector<128x128xf32>
    %cst_43 = arith.constant dense<0.000000e+00> : vector<1x128xf32>
    %79 = tpu.matmul %4, %78, %cst_43 {dimension_numbers = #tpu.dot_dimension_numbers<[1], [0], [0], [1], [0, 0, 1, 1], [], []>, precision = #tpu.contract_precision<fp32>} : vector<1x128xf32>, vector<128x128xf32>, vector<1x128xf32> -> vector<1x128xf32>
    %c0_44 = arith.constant 0 : index
    %c0_45 = arith.constant 0 : index
    %c0_46 = arith.constant 0 : index
    %80 = vector.load %arg8[%c0_44, %c0_45, %c0_46] : memref<3x1x128xf32, #tpu.memory_space<vmem>>, vector<1x1x128xf32>
    %81 = vector.shape_cast %80 : vector<1x1x128xf32> to vector<1x128xf32>
    %82 = arith.addf %79, %81 : vector<1x128xf32>
    %c1 = arith.constant 1 : index
    %c0_47 = arith.constant 0 : index
    %c0_48 = arith.constant 0 : index
    %83 = vector.load %arg2[%c1, %c0_47, %c0_48] : memref<3x128x32xf32, #tpu.memory_space<vmem>>, vector<1x128x32xf32>
    %84 = vector.shape_cast %83 : vector<1x128x32xf32> to vector<128x32xf32>
    %cst_49 = arith.constant dense<0.000000e+00> : vector<1x32xf32>
    %85 = tpu.matmul %82, %84, %cst_49 {dimension_numbers = #tpu.dot_dimension_numbers<[1], [0], [0], [1], [0, 0, 1, 1], [], []>, precision = #tpu.contract_precision<fp32>} : vector<1x128xf32>, vector<128x32xf32>, vector<1x32xf32> -> vector<1x32xf32>
    %c1_50 = arith.constant 1 : index
    %c0_51 = arith.constant 0 : index
    %c0_52 = arith.constant 0 : index
    %86 = vector.load %arg3[%c1_50, %c0_51, %c0_52] : memref<3x1x32xf32, #tpu.memory_space<vmem>>, vector<1x1x32xf32>
    %87 = vector.shape_cast %86 : vector<1x1x32xf32> to vector<1x32xf32>
    %88 = arith.addf %85, %87 : vector<1x32xf32>
    %cst_53 = arith.constant 5.000000e-01 : f32
    %89 = vector.broadcast %cst_53 : f32 to vector<1x32xf32>
    %90 = arith.mulf %89, %88 : vector<1x32xf32>
    %cst_54 = arith.constant 0.707106769 : f32
    %91 = vector.broadcast %cst_54 : f32 to vector<1x32xf32>
    %92 = arith.mulf %88, %91 : vector<1x32xf32>
    %93 = math.absf %92 : vector<1x32xf32>
    %cst_55 = arith.constant 0.327591091 : f32
    %94 = vector.broadcast %cst_55 : f32 to vector<1x32xf32>
    %95 = arith.mulf %94, %93 : vector<1x32xf32>
    %cst_56 = arith.constant 1.000000e+00 : f32
    %96 = vector.broadcast %cst_56 : f32 to vector<1x32xf32>
    %97 = arith.addf %96, %95 : vector<1x32xf32>
    %cst_57 = arith.constant 1.000000e+00 : f32
    %98 = vector.broadcast %cst_57 : f32 to vector<1x32xf32>
    %99 = arith.divf %98, %97 : vector<1x32xf32>
    %cst_58 = arith.constant 1.06140542 : f32
    %100 = vector.broadcast %cst_58 : f32 to vector<1x32xf32>
    %101 = arith.mulf %100, %99 : vector<1x32xf32>
    %cst_59 = arith.constant -1.45315206 : f32
    %102 = vector.broadcast %cst_59 : f32 to vector<1x32xf32>
    %103 = arith.addf %101, %102 : vector<1x32xf32>
    %104 = arith.mulf %103, %99 : vector<1x32xf32>
    %cst_60 = arith.constant 1.42141378 : f32
    %105 = vector.broadcast %cst_60 : f32 to vector<1x32xf32>
    %106 = arith.addf %104, %105 : vector<1x32xf32>
    %107 = arith.mulf %106, %99 : vector<1x32xf32>
    %cst_61 = arith.constant -0.284496725 : f32
    %108 = vector.broadcast %cst_61 : f32 to vector<1x32xf32>
    %109 = arith.addf %107, %108 : vector<1x32xf32>
    %110 = arith.mulf %109, %99 : vector<1x32xf32>
    %cst_62 = arith.constant 0.254829586 : f32
    %111 = vector.broadcast %cst_62 : f32 to vector<1x32xf32>
    %112 = arith.addf %110, %111 : vector<1x32xf32>
    %113 = arith.mulf %112, %99 : vector<1x32xf32>
    %114 = arith.mulf %93, %93 : vector<1x32xf32>
    %cst_63 = arith.constant 0.000000e+00 : f32
    %115 = vector.broadcast %cst_63 : f32 to vector<1x32xf32>
    %116 = arith.subf %115, %114 : vector<1x32xf32>
    %117 = math.exp %116 : vector<1x32xf32>
    %118 = arith.mulf %113, %117 : vector<1x32xf32>
    %cst_64 = arith.constant 1.000000e+00 : f32
    %119 = vector.broadcast %cst_64 : f32 to vector<1x32xf32>
    %120 = arith.subf %119, %118 : vector<1x32xf32>
    %cst_65 = arith.constant 0.000000e+00 : f32
    %121 = vector.broadcast %cst_65 : f32 to vector<1x32xf32>
    %122 = arith.cmpf oge, %92, %121 : vector<1x32xf32>
    %cst_66 = arith.constant 0.000000e+00 : f32
    %123 = vector.broadcast %cst_66 : f32 to vector<1x32xf32>
    %124 = arith.subf %123, %120 : vector<1x32xf32>
    %125 = arith.select %122, %120, %124 : vector<1x32xi1>, vector<1x32xf32>
    %cst_67 = arith.constant 1.000000e+00 : f32
    %126 = vector.broadcast %cst_67 : f32 to vector<1x32xf32>
    %127 = arith.addf %126, %125 : vector<1x32xf32>
    %128 = arith.mulf %90, %127 : vector<1x32xf32>
    %c1_68 = arith.constant 1 : index
    %c0_69 = arith.constant 0 : index
    %c0_70 = arith.constant 0 : index
    %129 = vector.load %arg4[%c1_68, %c0_69, %c0_70] : memref<3x1x32xf32, #tpu.memory_space<vmem>>, vector<1x1x32xf32>
    %130 = vector.shape_cast %129 : vector<1x1x32xf32> to vector<1x32xf32>
    %131 = arith.mulf %128, %130 : vector<1x32xf32>
    %cst_71 = arith.constant dense<0.000000e+00> : vector<1xf32>
    %132 = vector.multi_reduction <add>, %131, %cst_71 [1] : vector<1x32xf32> to vector<1xf32>
    %133 = vector.shape_cast %132 : vector<1xf32> to vector<1x1xf32>
    %c1_72 = arith.constant 1 : index
    %c0_73 = arith.constant 0 : index
    %c0_74 = arith.constant 0 : index
    %134 = vector.load %arg5[%c1_72, %c0_73, %c0_74] : memref<3x1x1xf32, #tpu.memory_space<vmem>>, vector<1x1x1xf32>
    %135 = vector.shape_cast %134 : vector<1x1x1xf32> to vector<1x1xf32>
    %136 = arith.addf %133, %135 : vector<1x1xf32>
    %137 = math.absf %136 : vector<1x1xf32>
    %cst_75 = arith.constant 0.000000e+00 : f32
    %138 = vector.broadcast %cst_75 : f32 to vector<1x1xf32>
    %139 = arith.subf %138, %137 : vector<1x1xf32>
    %140 = math.exp %139 : vector<1x1xf32>
    %cst_76 = arith.constant 1.000000e+00 : f32
    %141 = vector.broadcast %cst_76 : f32 to vector<1x1xf32>
    %142 = arith.addf %141, %140 : vector<1x1xf32>
    %cst_77 = arith.constant 1.000000e+00 : f32
    %143 = vector.broadcast %cst_77 : f32 to vector<1x1xf32>
    %144 = arith.divf %143, %142 : vector<1x1xf32>
    %cst_78 = arith.constant 0.000000e+00 : f32
    %145 = vector.broadcast %cst_78 : f32 to vector<1x1xf32>
    %146 = arith.cmpf oge, %136, %145 : vector<1x1xf32>
    %cst_79 = arith.constant 1.000000e+00 : f32
    %147 = vector.broadcast %cst_79 : f32 to vector<1x1xf32>
    %148 = arith.subf %147, %144 : vector<1x1xf32>
    %149 = arith.select %146, %144, %148 : vector<1x1xi1>, vector<1x1xf32>
    %c1_80 = arith.constant 1 : index
    %c0_81 = arith.constant 0 : index
    %c0_82 = arith.constant 0 : index
    %150 = vector.load %arg6[%c1_80, %c0_81, %c0_82] : memref<3x128x128xf32, #tpu.memory_space<vmem>>, vector<1x128x128xf32>
    %151 = vector.shape_cast %150 : vector<1x128x128xf32> to vector<128x128xf32>
    %c1_83 = arith.constant 1 : index
    %c0_84 = arith.constant 0 : index
    %c0_85 = arith.constant 0 : index
    %152 = vector.load %arg7[%c1_83, %c0_84, %c0_85] : memref<3x128x128xf32, #tpu.memory_space<vmem>>, vector<1x128x128xf32>
    %153 = vector.shape_cast %152 : vector<1x128x128xf32> to vector<128x128xf32>
    %154 = vector.broadcast %149 : vector<1x1xf32> to vector<128x128xf32>
    %155 = arith.mulf %154, %153 : vector<128x128xf32>
    %156 = arith.addf %151, %155 : vector<128x128xf32>
    %cst_86 = arith.constant dense<0.000000e+00> : vector<1x128xf32>
    %157 = tpu.matmul %82, %156, %cst_86 {dimension_numbers = #tpu.dot_dimension_numbers<[1], [0], [0], [1], [0, 0, 1, 1], [], []>, precision = #tpu.contract_precision<fp32>} : vector<1x128xf32>, vector<128x128xf32>, vector<1x128xf32> -> vector<1x128xf32>
    %c1_87 = arith.constant 1 : index
    %c0_88 = arith.constant 0 : index
    %c0_89 = arith.constant 0 : index
    %158 = vector.load %arg8[%c1_87, %c0_88, %c0_89] : memref<3x1x128xf32, #tpu.memory_space<vmem>>, vector<1x1x128xf32>
    %159 = vector.shape_cast %158 : vector<1x1x128xf32> to vector<1x128xf32>
    %160 = arith.addf %157, %159 : vector<1x128xf32>
    %c2 = arith.constant 2 : index
    %c0_90 = arith.constant 0 : index
    %c0_91 = arith.constant 0 : index
    %161 = vector.load %arg2[%c2, %c0_90, %c0_91] : memref<3x128x32xf32, #tpu.memory_space<vmem>>, vector<1x128x32xf32>
    %162 = vector.shape_cast %161 : vector<1x128x32xf32> to vector<128x32xf32>
    %cst_92 = arith.constant dense<0.000000e+00> : vector<1x32xf32>
    %163 = tpu.matmul %160, %162, %cst_92 {dimension_numbers = #tpu.dot_dimension_numbers<[1], [0], [0], [1], [0, 0, 1, 1], [], []>, precision = #tpu.contract_precision<fp32>} : vector<1x128xf32>, vector<128x32xf32>, vector<1x32xf32> -> vector<1x32xf32>
    %c2_93 = arith.constant 2 : index
    %c0_94 = arith.constant 0 : index
    %c0_95 = arith.constant 0 : index
    %164 = vector.load %arg3[%c2_93, %c0_94, %c0_95] : memref<3x1x32xf32, #tpu.memory_space<vmem>>, vector<1x1x32xf32>
    %165 = vector.shape_cast %164 : vector<1x1x32xf32> to vector<1x32xf32>
    %166 = arith.addf %163, %165 : vector<1x32xf32>
    %cst_96 = arith.constant 5.000000e-01 : f32
    %167 = vector.broadcast %cst_96 : f32 to vector<1x32xf32>
    %168 = arith.mulf %167, %166 : vector<1x32xf32>
    %cst_97 = arith.constant 0.707106769 : f32
    %169 = vector.broadcast %cst_97 : f32 to vector<1x32xf32>
    %170 = arith.mulf %166, %169 : vector<1x32xf32>
    %171 = math.absf %170 : vector<1x32xf32>
    %cst_98 = arith.constant 0.327591091 : f32
    %172 = vector.broadcast %cst_98 : f32 to vector<1x32xf32>
    %173 = arith.mulf %172, %171 : vector<1x32xf32>
    %cst_99 = arith.constant 1.000000e+00 : f32
    %174 = vector.broadcast %cst_99 : f32 to vector<1x32xf32>
    %175 = arith.addf %174, %173 : vector<1x32xf32>
    %cst_100 = arith.constant 1.000000e+00 : f32
    %176 = vector.broadcast %cst_100 : f32 to vector<1x32xf32>
    %177 = arith.divf %176, %175 : vector<1x32xf32>
    %cst_101 = arith.constant 1.06140542 : f32
    %178 = vector.broadcast %cst_101 : f32 to vector<1x32xf32>
    %179 = arith.mulf %178, %177 : vector<1x32xf32>
    %cst_102 = arith.constant -1.45315206 : f32
    %180 = vector.broadcast %cst_102 : f32 to vector<1x32xf32>
    %181 = arith.addf %179, %180 : vector<1x32xf32>
    %182 = arith.mulf %181, %177 : vector<1x32xf32>
    %cst_103 = arith.constant 1.42141378 : f32
    %183 = vector.broadcast %cst_103 : f32 to vector<1x32xf32>
    %184 = arith.addf %182, %183 : vector<1x32xf32>
    %185 = arith.mulf %184, %177 : vector<1x32xf32>
    %cst_104 = arith.constant -0.284496725 : f32
    %186 = vector.broadcast %cst_104 : f32 to vector<1x32xf32>
    %187 = arith.addf %185, %186 : vector<1x32xf32>
    %188 = arith.mulf %187, %177 : vector<1x32xf32>
    %cst_105 = arith.constant 0.254829586 : f32
    %189 = vector.broadcast %cst_105 : f32 to vector<1x32xf32>
    %190 = arith.addf %188, %189 : vector<1x32xf32>
    %191 = arith.mulf %190, %177 : vector<1x32xf32>
    %192 = arith.mulf %171, %171 : vector<1x32xf32>
    %cst_106 = arith.constant 0.000000e+00 : f32
    %193 = vector.broadcast %cst_106 : f32 to vector<1x32xf32>
    %194 = arith.subf %193, %192 : vector<1x32xf32>
    %195 = math.exp %194 : vector<1x32xf32>
    %196 = arith.mulf %191, %195 : vector<1x32xf32>
    %cst_107 = arith.constant 1.000000e+00 : f32
    %197 = vector.broadcast %cst_107 : f32 to vector<1x32xf32>
    %198 = arith.subf %197, %196 : vector<1x32xf32>
    %cst_108 = arith.constant 0.000000e+00 : f32
    %199 = vector.broadcast %cst_108 : f32 to vector<1x32xf32>
    %200 = arith.cmpf oge, %170, %199 : vector<1x32xf32>
    %cst_109 = arith.constant 0.000000e+00 : f32
    %201 = vector.broadcast %cst_109 : f32 to vector<1x32xf32>
    %202 = arith.subf %201, %198 : vector<1x32xf32>
    %203 = arith.select %200, %198, %202 : vector<1x32xi1>, vector<1x32xf32>
    %cst_110 = arith.constant 1.000000e+00 : f32
    %204 = vector.broadcast %cst_110 : f32 to vector<1x32xf32>
    %205 = arith.addf %204, %203 : vector<1x32xf32>
    %206 = arith.mulf %168, %205 : vector<1x32xf32>
    %c2_111 = arith.constant 2 : index
    %c0_112 = arith.constant 0 : index
    %c0_113 = arith.constant 0 : index
    %207 = vector.load %arg4[%c2_111, %c0_112, %c0_113] : memref<3x1x32xf32, #tpu.memory_space<vmem>>, vector<1x1x32xf32>
    %208 = vector.shape_cast %207 : vector<1x1x32xf32> to vector<1x32xf32>
    %209 = arith.mulf %206, %208 : vector<1x32xf32>
    %cst_114 = arith.constant dense<0.000000e+00> : vector<1xf32>
    %210 = vector.multi_reduction <add>, %209, %cst_114 [1] : vector<1x32xf32> to vector<1xf32>
    %211 = vector.shape_cast %210 : vector<1xf32> to vector<1x1xf32>
    %c2_115 = arith.constant 2 : index
    %c0_116 = arith.constant 0 : index
    %c0_117 = arith.constant 0 : index
    %212 = vector.load %arg5[%c2_115, %c0_116, %c0_117] : memref<3x1x1xf32, #tpu.memory_space<vmem>>, vector<1x1x1xf32>
    %213 = vector.shape_cast %212 : vector<1x1x1xf32> to vector<1x1xf32>
    %214 = arith.addf %211, %213 : vector<1x1xf32>
    %215 = math.absf %214 : vector<1x1xf32>
    %cst_118 = arith.constant 0.000000e+00 : f32
    %216 = vector.broadcast %cst_118 : f32 to vector<1x1xf32>
    %217 = arith.subf %216, %215 : vector<1x1xf32>
    %218 = math.exp %217 : vector<1x1xf32>
    %cst_119 = arith.constant 1.000000e+00 : f32
    %219 = vector.broadcast %cst_119 : f32 to vector<1x1xf32>
    %220 = arith.addf %219, %218 : vector<1x1xf32>
    %cst_120 = arith.constant 1.000000e+00 : f32
    %221 = vector.broadcast %cst_120 : f32 to vector<1x1xf32>
    %222 = arith.divf %221, %220 : vector<1x1xf32>
    %cst_121 = arith.constant 0.000000e+00 : f32
    %223 = vector.broadcast %cst_121 : f32 to vector<1x1xf32>
    %224 = arith.cmpf oge, %214, %223 : vector<1x1xf32>
    %cst_122 = arith.constant 1.000000e+00 : f32
    %225 = vector.broadcast %cst_122 : f32 to vector<1x1xf32>
    %226 = arith.subf %225, %222 : vector<1x1xf32>
    %227 = arith.select %224, %222, %226 : vector<1x1xi1>, vector<1x1xf32>
    %c2_123 = arith.constant 2 : index
    %c0_124 = arith.constant 0 : index
    %c0_125 = arith.constant 0 : index
    %228 = vector.load %arg6[%c2_123, %c0_124, %c0_125] : memref<3x128x128xf32, #tpu.memory_space<vmem>>, vector<1x128x128xf32>
    %229 = vector.shape_cast %228 : vector<1x128x128xf32> to vector<128x128xf32>
    %c2_126 = arith.constant 2 : index
    %c0_127 = arith.constant 0 : index
    %c0_128 = arith.constant 0 : index
    %230 = vector.load %arg7[%c2_126, %c0_127, %c0_128] : memref<3x128x128xf32, #tpu.memory_space<vmem>>, vector<1x128x128xf32>
    %231 = vector.shape_cast %230 : vector<1x128x128xf32> to vector<128x128xf32>
    %232 = vector.broadcast %227 : vector<1x1xf32> to vector<128x128xf32>
    %233 = arith.mulf %232, %231 : vector<128x128xf32>
    %234 = arith.addf %229, %233 : vector<128x128xf32>
    %cst_129 = arith.constant dense<0.000000e+00> : vector<1x128xf32>
    %235 = tpu.matmul %160, %234, %cst_129 {dimension_numbers = #tpu.dot_dimension_numbers<[1], [0], [0], [1], [0, 0, 1, 1], [], []>, precision = #tpu.contract_precision<fp32>} : vector<1x128xf32>, vector<128x128xf32>, vector<1x128xf32> -> vector<1x128xf32>
    %c2_130 = arith.constant 2 : index
    %c0_131 = arith.constant 0 : index
    %c0_132 = arith.constant 0 : index
    %236 = vector.load %arg8[%c2_130, %c0_131, %c0_132] : memref<3x1x128xf32, #tpu.memory_space<vmem>>, vector<1x1x128xf32>
    %237 = vector.shape_cast %236 : vector<1x1x128xf32> to vector<1x128xf32>
    %238 = arith.addf %235, %237 : vector<1x128xf32>
    %239 = vector.shape_cast %238 : vector<1x128xf32> to vector<1x1x128xf32>
    %c0_133 = arith.constant 0 : index
    %c0_134 = arith.constant 0 : index
    %c0_135 = arith.constant 0 : index
    %240 = vector.load %arg9[%c0_133, %c0_134, %c0_135] : memref<1x1x128xf32, #tpu.memory_space<vmem>>, vector<1x1x128xf32>
    tpu.vector_store %arg9[%c0_133, %c0_134, %c0_135], %239 {strides = array<i32>} : memref<1x1x128xf32, #tpu.memory_space<vmem>>, vector<1x1x128xf32>,
    return
  }
  func.func @transform_0(%arg0: i32) -> (i32, i32, i32) {
    %c0_i32 = arith.constant 0 : i32
    %c0_i32_0 = arith.constant 0 : i32
    %c0_i32_1 = arith.constant 0 : i32
    return %arg0, %c0_i32, %c0_i32_0 : i32, i32, i32
  }
  func.func @transform_1(%arg0: i32) -> (i32, i32, i32) {
    %c0_i32 = arith.constant 0 : i32
    %c0_i32_0 = arith.constant 0 : i32
    %c0_i32_1 = arith.constant 0 : i32
    %c0_i32_2 = arith.constant 0 : i32
    return %c0_i32, %c0_i32_0, %c0_i32_1 : i32, i32, i32
  }
  func.func @transform_2(%arg0: i32) -> (i32, i32, i32) {
    %c0_i32 = arith.constant 0 : i32
    %c0_i32_0 = arith.constant 0 : i32
    %c0_i32_1 = arith.constant 0 : i32
    %c0_i32_2 = arith.constant 0 : i32
    return %c0_i32, %c0_i32_0, %c0_i32_1 : i32, i32, i32
  }
  func.func @transform_3(%arg0: i32) -> (i32, i32, i32) {
    %c0_i32 = arith.constant 0 : i32
    %c0_i32_0 = arith.constant 0 : i32
    %c0_i32_1 = arith.constant 0 : i32
    %c0_i32_2 = arith.constant 0 : i32
    return %c0_i32, %c0_i32_0, %c0_i32_1 : i32, i32, i32
  }
  func.func @transform_4(%arg0: i32) -> (i32, i32, i32) {
    %c0_i32 = arith.constant 0 : i32
    %c0_i32_0 = arith.constant 0 : i32
    %c0_i32_1 = arith.constant 0 : i32
    %c0_i32_2 = arith.constant 0 : i32
    return %c0_i32, %c0_i32_0, %c0_i32_1 : i32, i32, i32
  }
  func.func @transform_5(%arg0: i32) -> (i32, i32, i32) {
    %c0_i32 = arith.constant 0 : i32
    %c0_i32_0 = arith.constant 0 : i32
    %c0_i32_1 = arith.constant 0 : i32
    %c0_i32_2 = arith.constant 0 : i32
    return %c0_i32, %c0_i32_0, %c0_i32_1 : i32, i32, i32
  }
  func.func @transform_6(%arg0: i32) -> (i32, i32, i32) {
    %c0_i32 = arith.constant 0 : i32
    %c0_i32_0 = arith.constant 0 : i32
    %c0_i32_1 = arith.constant 0 : i32
    %c0_i32_2 = arith.constant 0 : i32
    return %c0_i32, %c0_i32_0, %c0_i32_1 : i32, i32, i32
  }
  func.func @transform_7(%arg0: i32) -> (i32, i32, i32) {
    %c0_i32 = arith.constant 0 : i32
    %c0_i32_0 = arith.constant 0 : i32
    %c0_i32_1 = arith.constant 0 : i32
    %c0_i32_2 = arith.constant 0 : i32
    return %c0_i32, %c0_i32_0, %c0_i32_1 : i32, i32, i32
  }
  func.func @transform_8(%arg0: i32) -> (i32, i32, i32) {
    %c0_i32 = arith.constant 0 : i32
    %c0_i32_0 = arith.constant 0 : i32
    %c0_i32_1 = arith.constant 0 : i32
    return %arg0, %c0_i32, %c0_i32_0 : i32, i32, i32
  }
}

</mosaic_0001>

<bundles_post_ra>
// kernel: viewport_distortion_perception.1
= control target key start
LH: loop header
LB: loop body
LE: loop exit
PB: predicated region body
PF: predicated region fallthrough
CT: control target
= control target key end

     0   :  { %13 = vsyncpa [#allocation3], 0  ;;  %s11440_s0 = inlined_call_operand.vmem [shape: f32[2,128,256], index: 0, kind: input, shape index: {}]   ;;  %s11441_s1 = inlined_call_operand.vmem [shape: f32[3,128,32], index: 1, kind: input, shape index: {}]   ;;  %s11442_s2 = inlined_call_operand.vmem [shape: f32[3,1,32], index: 2, kind: input, shape index: {}]   ;;  %s11443_s3 = inlined_call_operand.vmem [shape: f32[3,1,32], index: 3, kind: input, shape index: {}]   ;;  %s11444_s4 = inlined_call_operand.vmem [shape: f32[3,1,1], index: 4, kind: input, shape index: {}]   ;;  %s11445_s5 = inlined_call_operand.vmem [shape: f32[3,128,128], index: 5, kind: input, shape index: {}]   ;;  %s11446_s6 = inlined_call_operand.vmem [shape: f32[3,128,128], index: 6, kind: input, shape index: {}]   ;;  %s11447_s7 = inlined_call_operand.vmem [shape: f32[3,1,128], index: 7, kind: input, shape index: {}]   ;;  %s11448_s8 = inlined_call_operand.hbm [shape: f32[2,1,128], index: 8, kind: output, shape index: {}]  }
   0x1   :  { %15 = vsyncpa [#allocation3 + $0x1], 0  ;;  %s8796_s27 = smov 0   ;;  %s8798_s28 = smov 0  }
   0x2   :  { %s8800_s29 = smov 0   ;;  %s8802_s30 = smov 0  }
   0x3 LB: > { %s8817_s9 = sadd.s32 4294967295, %s8744_s30   ;;  %s5491_s10 = sadd.s32 4294967294, %s8744_s30   ;;  %s8744_s30 = sphi %s8802_s30, %s11596_s30   ;;  %s8740_s29 = sphi %s8800_s29, %s11595_s29   ;;  %s8736_s28 = sphi %s8798_s28, %s11594_s28   ;;  %s8732_s27 = sphi %s8796_s27, %s11593_s27  }
   0x4   : > { %s8821_s11 = sadd.s32 1, %s8744_s30   ;;  %s201_s12 = sadd.s32 1, %s8740_s29 }
   0x5   : > { %s198_s13 = ssub.s32 %s8744_s30, %s8821_s11  ;;  %p211_p0 = scmp.ne.s32.totalorder %s8740_s29, %s8736_s28 }
   0x6   : > { %p199_p1 = scmp.eq.s32.totalorder %s198_s13, 0  ;;  %p212_p2 = scmp.eq.s32.totalorder %s8817_s9, 1 }
   0x7   : > { %p217_p3 = scmp.ne.s32.totalorder %s8736_s28, %s8732_s27  ;;  %p218_p4 = scmp.eq.s32.totalorder %s5491_s10, 1 }
   0x8   : > { %s8832_s14 = scalar_select %p199_p1, %s8740_s29, %s201_s12  }
   0x9   : > { %p8834_p5 = por %p212_p2, %p211_p0  ;;  %p8838_p6 = por %p218_p4, %p217_p3 }
   0xa   : > { %p5494_p7 = scmp.ge.s32.totalorder %s8744_s30, 1  ;;  %p265_p8 = scmp.lt.s32.totalorder %s8744_s30, 3 }
   0xc   : > { %p266_p9 = pnand %p5494_p7, %p265_p8 }
   0xe   : > { %269 = sbr.rel (%p266_p9) target bundleno = 3870 (0xf1e), region = 52 }
  0x15   : > { %p298_p10 = scmp.lt.s32.totalorder %s8817_s9, 1  ;;  %v11449_v0 = vmov 0.0   ;;  %vm8749_vm0 = vmmov 0   ;;  %vm1858_vm2 = vcmask 253952   ;;  %s296_s23 = sand.u32 1, %s8736_s28  }
  0x16   : > { %431 = vmatprep.mubr.f32.mxu0 %v11449_v0  ;;  %s5601_s26 = sshll.u32 %s8817_s9, 4  ;;  %s297_s10 = scalar_lea.vmem [#allocation2], %s296_s23 }
  0x17   : > { %s299_s17 = scalar_select %p298_p10, %s8817_s9, 1 }
  0x18   : > { %s5436_s12 = sshll.u32 %s297_s10, 4  ;;  %s5424_s19 = scalar_lea.sflag [#allocation3], %s296_s23  ;;  %s11400_s12 = int_to_ptr.vmem [resolvable:$true] %s5436_s12 }
  0x19   : > { %s5604_s18 = sshll.u32 %s299_s17, 8  ;;  %s8682_s20 = scalar_lea.vmem %s11400_s12, 16 }
  0x1a   : > { %s8850_s21 = scalar_lea.vmem %s11440_s0, %s5604_s18  ;;  %p8683_p11 = scmp.ne.s32.totalorder %s11400_s12, %s8682_s20 }
  0x1b   : > { %v8853_v1 = vld [vmem:[%s8850_s21 + $0x8] sm:$0xff]  ;;  %v8856_v2 = vld [vmem:[%s8850_s21 + $0x18] sm:$0xff]  ;;  %v8859_v3 = vld [vmem:[%s8850_s21] sm:$0xff]  ;;  %s8750_s9 = smov [#allocation2]  }
  0x1c   : > { %v335_v4 = vand.u32 4294901760, %v8853_v1  ;;  %v339_v5 = vand.u32 4294901760, %v8856_v2  ;;  %v8864_v6 = vld [vmem:[%s8850_s21 + $0x10] sm:$0xff]  ;;  %v337_v7 = vand.u32 4294901760, %v8859_v3  ;;  %v8868_v8 = vld [vmem:[%s8850_s21 + $0x28] sm:$0xff]  ;;  %v8871_v9 = vld [vmem:[%s8850_s21 + $0x38] sm:$0xff]  ;;  %p8684_p12 = pnand %p8683_p11, %p8834_p5 }
  0x1d   : > { %v341_v10 = vand.u32 4294901760, %v8864_v6  ;;  %v343_v11 = vand.u32 4294901760, %v8868_v8  ;;  %v347_v12 = vand.u32 4294901760, %v8871_v9  ;;  %v8883_v14 = vld [vmem:[%s8850_s21 + $0x20] sm:$0xff]  ;;  %v8886_v15 = vld [vmem:[%s8850_s21 + $0x30] sm:$0xff]  ;;  %v8899_v18 = vld [vmem:[%s8850_s21 + $0x48] sm:$0xff] }
  0x1e   : > { %v8880_v13 = vpack.c.bf16 %v339_v5, %v335_v4  ;;  %v8902_v19 = vld [vmem:[%s8850_s21 + $0x58] sm:$0xff]  ;;  %v345_v20 = vand.u32 4294901760, %v8883_v14  ;;  %v349_v21 = vand.u32 4294901760, %v8886_v15  ;;  %v351_v22 = vand.u32 4294901760, %v8899_v18  ;;  %v311_v26 = vld [vmem:[%s8850_s21 + $0x40] sm:$0xff]  ;;  %v313_v27 = vld [vmem:[%s8850_s21 + $0x50] sm:$0xff]  ;;  %p8685_p13 = pneg %p8684_p12 }
  0x1f   : > { %v8890_v16 = vpack.c.bf16 %v341_v10, %v337_v7  ;;  %v8896_v17 = vpack.c.bf16 %v347_v12, %v343_v11  ;;  %v355_v23 = vand.u32 4294901760, %v8902_v19  ;;  %v316_v28 = vld [vmem:[%s8850_s21 + $0x68] sm:$0xff]  ;;  %v318_v29 = vld [vmem:[%s8850_s21 + $0x78] sm:$0xff]  ;;  %v353_v30 = vand.u32 4294901760, %v311_v26  ;;  %v315_v36 = vld [vmem:[%s8850_s21 + $0x60] sm:$0xff] }
  0x20   : > { %7478 = vmatprep.subr.bf16.mxu0 %v8880_v13  ;;  %v8911_v24 = vpack.c.bf16 %v349_v21, %v345_v20  ;;  %v357_v31 = vand.u32 4294901760, %v313_v27  ;;  %v359_v32 = vand.u32 4294901760, %v316_v28  ;;  %v363_v33 = vand.u32 4294901760, %v318_v29  ;;  %v317_v37 = vld [vmem:[%s8850_s21 + $0x70] sm:$0xff]  ;;  %v320_v38 = vld [vmem:[%s8850_s21 + $0x88] sm:$0xff]  ;;  %v322_v39 = vld [vmem:[%s8850_s21 + $0x98] sm:$0xff] }
  0x21   : > { %7480 = vmatpush1.bf16.xpose.msra.mxu0 %v8890_v16  ;;  %v8913_v25 = vpack.c.bf16 %v355_v23, %v351_v22  ;;  %v361_v40 = vand.u32 4294901760, %v315_v36  ;;  %v365_v41 = vand.u32 4294901760, %v317_v37  ;;  %v367_v42 = vand.u32 4294901760, %v320_v38  ;;  %v319_v46 = vld [vmem:[%s8850_s21 + $0x80] sm:$0xff]  ;;  %v321_v47 = vld [vmem:[%s8850_s21 + $0x90] sm:$0xff]  ;;  %v324_v48 = vld [vmem:[%s8850_s21 + $0xa8] sm:$0xff] }
  0x22   : > { %7482 = vmatprep.subr.bf16.mxu0 %v8896_v17  ;;  %v8921_v34 = vpack.c.bf16 %v357_v31, %v353_v30  ;;  %v8923_v35 = vpack.c.bf16 %v363_v33, %v359_v32  ;;  %v371_v43 = vand.u32 4294901760, %v322_v39  ;;  %v326_v49 = vld [vmem:[%s8850_s21 + $0xb8] sm:$0xff]  ;;  %v369_v50 = vand.u32 4294901760, %v319_v46  ;;  %v323_v56 = vld [vmem:[%s8850_s21 + $0xa0] sm:$0xff]  ;;  %v325_v57 = vld [vmem:[%s8850_s21 + $0xb0] sm:$0xff] }
  0x23   : > { %v8931_v44 = vpack.c.bf16 %v365_v41, %v361_v40  ;;  %v373_v51 = vand.u32 4294901760, %v321_v47  ;;  %v375_v52 = vand.u32 4294901760, %v324_v48  ;;  %v379_v53 = vand.u32 4294901760, %v326_v49  ;;  %v328_v58 = vld [vmem:[%s8850_s21 + $0xc8] sm:$0xff]  ;;  %v330_v59 = vld [vmem:[%s8850_s21 + $0xd8] sm:$0xff] }
  0x24   : > { %v8933_v45 = vpack.c.bf16 %v371_v43, %v367_v42  ;;  %v8952_v60 = vsub.f32 %v8853_v1, %v335_v4  ;;  %v8957_v61 = vsub.f32 %v8856_v2, %v339_v5  ;;  %v8962_v62 = vsub.f32 %v8859_v3, %v337_v7 }
  0x25   : > { %v8941_v54 = vpack.c.bf16 %v373_v51, %v369_v50  ;;  %v8943_v55 = vpack.c.bf16 %v379_v53, %v375_v52  ;;  %v8965_v63 = vsub.f32 %v8864_v6, %v341_v10  ;;  %v377_v0 = vand.u32 4294901760, %v323_v56 }
  0x26   : > { %11512 = vst [vmem:[#allocation5_spill] sm:$0xff] %v8933_v45  ;;  %v381_v1 = vand.u32 4294901760, %v325_v57  ;;  %v8971_v4 = vsub.f32 %v8868_v8, %v343_v11  ;;  %v8976_v2 = vsub.f32 %v8871_v9, %v347_v12  ;;  %v383_v3 = vand.u32 4294901760, %v328_v58  ;;  %v327_v9 = vld [vmem:[%s8850_s21 + $0xc0] sm:$0xff]  ;;  %v329_v11 = vld [vmem:[%s8850_s21 + $0xd0] sm:$0xff] }
  0x27   : > { %11513 = vst [vmem:[#allocation6_spill] sm:$0xff] %v8941_v54  ;;  %11514 = vst [vmem:[#allocation7_spill] sm:$0xff] %v8943_v55  ;;  %v387_v5 = vand.u32 4294901760, %v330_v59  ;;  %v8980_v6 = vsub.f32 %v8883_v14, %v345_v20  ;;  %v8983_v7 = vsub.f32 %v8886_v15, %v349_v21  ;;  %v8986_v8 = vsub.f32 %v8899_v18, %v351_v22  ;;  %v334_v21 = vld [vmem:[%s8850_s21 + $0xf8] sm:$0xff] }
  0x28   : > { %v8989_v10 = vsub.f32 %v8902_v19, %v355_v23  ;;  %v8993_v12 = vsub.f32 %v311_v26, %v353_v30  ;;  %v9001_v14 = vsub.f32 %v315_v36, %v361_v40  ;;  %v9003_v15 = vsub.f32 %v317_v37, %v365_v41  ;;  %v332_v19 = vld [vmem:[%s8850_s21 + $0xe8] sm:$0xff] }
  0x29   : > { %7484 = vmatpush1.bf16.xpose.msra.mxu0 %v8911_v24  ;;  %v9005_v20 = vsub.f32 %v320_v38, %v367_v42  ;;  %v9007_v18 = vpack.c.bf16 %v381_v1, %v377_v0  ;;  %v9011_v22 = vsub.f32 %v322_v39, %v371_v43  ;;  %v9013_v23 = vpack.c.bf16 %v387_v5, %v383_v3  ;;  %v331_v38 = vld [vmem:[%s8850_s21 + $0xe0] sm:$0xff]  ;;  %v333_v39 = vld [vmem:[%s8850_s21 + $0xf0] sm:$0xff]  ;;  %s8686_s21 = sshll.u32 %s8750_s9, 4  ;;  %s8687_s21 = int_to_ptr.vmem [resolvable:$false] %s8686_s21 }
  0x2a   : > { %7486 = vmatprep.subr.bf16.mxu0 %v8913_v25  ;;  %v385_v26 = vand.u32 4294901760, %v327_v9  ;;  %v9019_v30 = vsub.f32 %v324_v48, %v375_v52  ;;  %v391_v36 = vand.u32 4294901760, %v332_v19  ;;  %v395_v37 = vand.u32 4294901760, %v334_v21  ;;  %s8688_s22 = scalar_lea.vmem %s8687_s21, 32  ;;  %p8689_p0 = scmp.lt.s32.totalorder %s11400_s12, %s8687_s21 }
  0x2b   : > { %11515 = vst [vmem:[#allocation8_spill] sm:$0xff] %v9013_v23  ;;  %v9030_v40 = vsub.f32 %v328_v58, %v383_v3  ;;  %v11458_v41 = vand.u32 4294901760, %v8952_v60  ;;  %v11457_v42 = vand.u32 4294901760, %v8957_v61  ;;  %v7541_v43 = vpack.c.bf16 %v8957_v61, %v8952_v60  ;;  %p8690_p1 = scmp.lt.s32.totalorder %s8688_s22, %s8682_s20 }
  0x2c   : > { %v11468_v52 = vmov 0.00390625  }
  0x2d   : > { %p8691_p2 = por %p8690_p1, %p8689_p0 }
  0x2f   : > { %p8692_p3 = pnand %p8691_p2, %p8685_p13 }
  0x31   : > { %7488 = vmatpush1.bf16.xpose.msra.mxu0 %v8921_v34 }
  0x32   : > { %7490 = vmatprep.subr.bf16.mxu0 %v8923_v35 }
  0x39   : > { %7492 = vmatpush1.bf16.xpose.msra.mxu0 %v8931_v44 }
  0x3a   : > { %7494 = vmatprep.subr.bf16.mxu0 %v8933_v45  ;;  %v8999_v45 = vsub.f32 %v318_v29, %v363_v33  ;;  %v9017_v29 = vsub.f32 %v321_v47, %v373_v51  ;;  %v9025_v33 = vsub.f32 %v325_v57, %v381_v1  ;;  %v9041_v47 = vsub.f32 %v327_v9, %v385_v26 }
  0x3b   : > { %v452_v1 = vsub.f32 %v8957_v61, %v11457_v42 }
  0x41   : > { %7496 = vmatpush1.bf16.xpose.msra.mxu0 %v8941_v54  ;;  %v8997_v54 = vsub.f32 %v316_v28, %v359_v32  ;;  %v9015_v28 = vsub.f32 %v319_v46, %v369_v50  ;;  %v9023_v32 = vsub.f32 %v323_v56, %v377_v0  ;;  %v9037_v0 = vsub.f32 %v330_v59, %v387_v5 }
  0x42   : > { %7498 = vmatprep.subr.bf16.mxu0 %v8943_v55  ;;  %v8995_v55 = vsub.f32 %v313_v27, %v357_v31  ;;  %v389_v27 = vand.u32 4294901760, %v329_v11  ;;  %v9021_v31 = vsub.f32 %v326_v49, %v379_v53  ;;  %v393_v49 = vand.u32 4294901760, %v331_v38 }
  0x43   : > { %v397_v50 = vand.u32 4294901760, %v333_v39  ;;  %v9049_v53 = vpack.c.bf16 %v395_v37, %v391_v36  ;;  %v9051_v56 = vsub.f32 %v332_v19, %v391_v36  ;;  %v440_v59 = vsub.f32 %v8952_v60, %v11458_v41 }
  0x44   : > { %v9039_v46 = vpack.c.bf16 %v389_v27, %v385_v26  ;;  %v9043_v48 = vsub.f32 %v329_v11, %v389_v27  ;;  %v9075_v27 = vsub.f32 %v334_v21, %v395_v37  ;;  %v9083_v9 = vsub.f32 %v331_v38, %v393_v49 }
  0x45   : > { %11517 = vst [vmem:[#allocation10_spill] sm:$0xff] %v9049_v53  ;;  %v9085_v11 = vsub.f32 %v333_v39, %v397_v50  ;;  %v11459_v19 = vand.u32 4294901760, %v8962_v62  ;;  %v11460_v21 = vand.u32 4294901760, %v8965_v63  ;;  %v11461_v37 = vand.u32 4294901760, %v8971_v4 }
  0x46   : > { %11516 = vst [vmem:[#allocation9_spill] sm:$0xff] %v9039_v46  ;;  %v441_v42 = vand.u32 4294901760, %v440_v59  ;;  %v453_v26 = vand.u32 4294901760, %v452_v1  ;;  %v11462_v38 = vand.u32 4294901760, %v8976_v2  ;;  %v9097_v41 = vpack.c.bf16 %v397_v50, %v393_v49 }
  0x47   : > { %v446_v5 = vsub.f32 %v8962_v62, %v11459_v19  ;;  %v458_v3 = vsub.f32 %v8965_v63, %v11460_v21  ;;  %v464_v59 = vsub.f32 %v8971_v4, %v11461_v37  ;;  %v11463_v39 = vand.u32 4294901760, %v8980_v6 }
  0x48   : > { %11518 = vst [vmem:[#allocation11_spill] sm:$0xff] %v9097_v41  ;;  %v7509_v36 = vpack.c.bf16 %v453_v26, %v441_v42  ;;  %v476_v1 = vsub.f32 %v8976_v2, %v11462_v38  ;;  %v11465_v19 = vand.u32 4294901760, %v8983_v7  ;;  %v11464_v42 = vand.u32 4294901760, %v8986_v8 }
  0x49   : > { %7500 = vmatpush1.bf16.xpose.msra.mxu0 %v9007_v18  ;;  %v447_v49 = vand.u32 4294901760, %v446_v5  ;;  %v459_v50 = vand.u32 4294901760, %v458_v3  ;;  %v465_v58 = vand.u32 4294901760, %v464_v59  ;;  %v11466_v26 = vand.u32 4294901760, %v8989_v10 }
  0x4a   : > { %7502 = vmatprep.subr.bf16.mxu0 %v9013_v23  ;;  %v477_v21 = vand.u32 4294901760, %v476_v1  ;;  %v470_v38 = vsub.f32 %v8980_v6, %v11463_v39  ;;  %v482_v3 = vsub.f32 %v8983_v7, %v11465_v19  ;;  %v11519_v1 = vmov 0.0  }
  0x4b   : > { %v7511_v37 = vpack.c.bf16 %v459_v50, %v447_v49  ;;  %v500_v59 = vsub.f32 %v8989_v10, %v11466_v26  ;;  %v11467_v39 = vand.u32 4294901760, %v8993_v12  ;;  %v11470_v57 = vand.u32 4294901760, %v8995_v55 }
  0x4c   : > { %v7513_v5 = vpack.c.bf16 %v477_v21, %v465_v58  ;;  %v471_v49 = vand.u32 4294901760, %v470_v38  ;;  %v483_v50 = vand.u32 4294901760, %v482_v3  ;;  %v11473_v19 = vand.u32 4294901760, %v8999_v45 }
  0x4d   : > { %v501_v21 = vand.u32 4294901760, %v500_v59  ;;  %v506_v38 = vsub.f32 %v8995_v55, %v11470_v57 }
  0x4e   : > { %v7515_v26 = vpack.c.bf16 %v483_v50, %v471_v49  ;;  %v11472_v50 = vand.u32 4294901760, %v9001_v14 }
  0x4f   : > { %v507_v49 = vand.u32 4294901760, %v506_v38 }
  0x51   : > { %7504 = vmatpush1.bf16.xpose.msra.mxu0 %v9039_v46 }
  0x52   : > { %7506 = vmatprep.subr.bf16.mxu0 %v9049_v53 }
  0x59   : > { %7508 = vmatpush1.bf16.xpose.msra.mxu0 %v9097_v41 }
  0x5a   : > { %7510 = vmatprep.subr.bf16.mxu0 %v7509_v36  ;;  %v488_v36 = vsub.f32 %v8986_v8, %v11464_v42  ;;  %v11471_v42 = vand.u32 4294901760, %v8997_v54 }
  0x5c   : > { %v489_v58 = vand.u32 4294901760, %v488_v36  ;;  %v524_v36 = vsub.f32 %v8999_v45, %v11473_v19 }
  0x5e   : > { %v7517_v3 = vpack.c.bf16 %v501_v21, %v489_v58  ;;  %v11475_v58 = vand.u32 4294901760, %v9005_v20  ;;  %v11477_v21 = vand.u32 4294901760, %v9011_v22 }
  0x60   : > { %432 = vmatmul.mubr.f32.vlgmr.msra.gmra.mrb[0].mxu0 %v11519_v1  ;;  %v536_v38 = vsub.f32 %v9005_v20, %v11475_v58 }
  0x61   : > { %7512 = vmatpush1.bf16.xpose.msra.mxu0 %v7511_v37  ;;  %661 = vmatprep.mubr.f32.mxu0 %v11468_v52  ;;  %v494_v37 = vsub.f32 %v8993_v12, %v11467_v39  ;;  %v11474_v39 = vand.u32 4294901760, %v9003_v15  ;;  %v525_v52 = vand.u32 4294901760, %v524_v36 }
  0x62   : > { %7514 = vmatprep.subr.bf16.mxu0 %v7513_v5  ;;  %v512_v5 = vsub.f32 %v8997_v54, %v11471_v42  ;;  %v518_v42 = vsub.f32 %v9001_v14, %v11472_v50  ;;  %v537_v50 = vand.u32 4294901760, %v536_v38 }
  0x63   : > { %v495_v59 = vand.u32 4294901760, %v494_v37 }
  0x64   : > { %v513_v51 = vand.u32 4294901760, %v512_v5  ;;  %v519_v5 = vand.u32 4294901760, %v518_v42 }
  0x65   : > { %v7519_v57 = vpack.c.bf16 %v507_v49, %v495_v59  ;;  %v11476_v59 = vand.u32 4294901760, %v9015_v28  ;;  %v11478_v49 = vand.u32 4294901760, %v9017_v29 }
  0x66   : > { %v7521_v37 = vpack.c.bf16 %v525_v52, %v513_v51  ;;  %v11479_v51 = vand.u32 4294901760, %v9019_v30  ;;  %v11481_v52 = vand.u32 4294901760, %v9021_v31 }
  0x67   : > { %v542_v58 = vsub.f32 %v9015_v28, %v11476_v59 }
  0x69   : > { %7516 = vmatpush1.bf16.xpose.msra.mxu0 %v7515_v26  ;;  %v530_v26 = vsub.f32 %v9003_v15, %v11474_v39  ;;  %v543_v38 = vand.u32 4294901760, %v542_v58 }
  0x6a   : > { %7518 = vmatprep.subr.bf16.mxu0 %v7517_v3  ;;  %v548_v3 = vsub.f32 %v9011_v22, %v11477_v21 }
  0x6b   : > { %v531_v36 = vand.u32 4294901760, %v530_v26  ;;  %v560_v26 = vsub.f32 %v9019_v30, %v11479_v51 }
  0x6c   : > { %v549_v19 = vand.u32 4294901760, %v548_v3 }
  0x6d   : > { %v7523_v39 = vpack.c.bf16 %v531_v36, %v519_v5  ;;  %v11480_v5 = vand.u32 4294901760, %v9023_v32  ;;  %v11482_v36 = vand.u32 4294901760, %v9025_v33  ;;  %v561_v59 = vand.u32 4294901760, %v560_v26 }
  0x6e   : > { %v7525_v42 = vpack.c.bf16 %v549_v19, %v537_v50  ;;  %v11483_v19 = vand.u32 4294901760, %v9030_v40  ;;  %v11485_v50 = vand.u32 4294901760, %v9037_v0 }
  0x6f   : > { %v566_v51 = vsub.f32 %v9023_v32, %v11480_v5 }
  0x71   : > { %7520 = vmatpush1.bf16.xpose.msra.mxu0 %v7519_v57  ;;  %v554_v57 = vsub.f32 %v9017_v29, %v11478_v49  ;;  %v567_v26 = vand.u32 4294901760, %v566_v51 }
  0x72   : > { %7522 = vmatprep.subr.bf16.mxu0 %v7521_v37  ;;  %v572_v37 = vsub.f32 %v9021_v31, %v11481_v52 }
  0x73   : > { %v555_v3 = vand.u32 4294901760, %v554_v57  ;;  %v584_v57 = vsub.f32 %v9030_v40, %v11483_v19 }
  0x74   : > { %v573_v21 = vand.u32 4294901760, %v572_v37 }
  0x75   : > { %v7527_v49 = vpack.c.bf16 %v555_v3, %v543_v38  ;;  %v11484_v38 = vand.u32 4294901760, %v9041_v47  ;;  %v11486_v3 = vand.u32 4294901760, %v9043_v48  ;;  %v585_v5 = vand.u32 4294901760, %v584_v57 }
  0x76   : > { %v7529_v58 = vpack.c.bf16 %v573_v21, %v561_v59  ;;  %v11490_v21 = vand.u32 4294901760, %v9051_v56  ;;  %v11487_v59 = vand.u32 4294901760, %v9075_v27 }
  0x77   : > { %v590_v19 = vsub.f32 %v9041_v47, %v11484_v38 }
  0x79   : > { %7524 = vmatpush1.bf16.xpose.msra.mxu0 %v7523_v39  ;;  %v578_v39 = vsub.f32 %v9025_v33, %v11482_v36  ;;  %v591_v57 = vand.u32 4294901760, %v590_v19 }
  0x7a   : > { %7526 = vmatprep.subr.bf16.mxu0 %v7525_v42  ;;  %v596_v42 = vsub.f32 %v9037_v0, %v11485_v50 }
  0x7b   : > { %v579_v37 = vand.u32 4294901760, %v578_v39  ;;  %v608_v39 = vsub.f32 %v9051_v56, %v11490_v21 }
  0x7c   : > { %v597_v52 = vand.u32 4294901760, %v596_v42 }
  0x7d   : > { %v7531_v36 = vpack.c.bf16 %v579_v37, %v567_v26  ;;  %v11489_v26 = vand.u32 4294901760, %v9083_v9  ;;  %v11488_v37 = vand.u32 4294901760, %v9085_v11  ;;  %v609_v38 = vand.u32 4294901760, %v608_v39 }
  0x7e   : > { %v7533_v51 = vpack.c.bf16 %v597_v52, %v585_v5  ;;  %v11521_v39 = vpack.c.bf16 %v8965_v63, %v8962_v62 }
  0x7f   : > { %v614_v52 = vsub.f32 %v9083_v9, %v11489_v26  ;;  %v626_v5 = vsub.f32 %v9085_v11, %v11488_v37 }
  0x81   : > { %7528 = vmatpush1.bf16.xpose.msra.mxu0 %v7527_v49  ;;  %v602_v49 = vsub.f32 %v9043_v48, %v11486_v3  ;;  %v627_v19 = vand.u32 4294901760, %v626_v5  ;;  %v11531_v5 = vpack.c.bf16 %v9025_v33, %v9023_v32 }
  0x82   : > { %7530 = vmatprep.subr.bf16.mxu0 %v7529_v58  ;;  %v620_v58 = vsub.f32 %v9075_v27, %v11487_v59 }
  0x83   : > { %v603_v42 = vand.u32 4294901760, %v602_v49 }
  0x84   : > { %v621_v50 = vand.u32 4294901760, %v620_v58  ;;  %v11527_v58 = vpack.c.bf16 %v9003_v15, %v9001_v14 }
  0x85   : > { %v7535_v3 = vpack.c.bf16 %v603_v42, %v591_v57  ;;  %v11528_v57 = vpack.c.bf16 %v9011_v22, %v9005_v20  ;;  %v11529_v42 = vpack.c.bf16 %v9017_v29, %v9015_v28 }
  0x86   : > { %v7537_v59 = vpack.c.bf16 %v621_v50, %v609_v38  ;;  %v11522_v50 = vpack.c.bf16 %v8976_v2, %v8971_v4  ;;  %v11523_v38 = vpack.c.bf16 %v8983_v7, %v8980_v6 }
  0x89   : > { %7532 = vmatpush1.bf16.xpose.msra.mxu0 %v7531_v36  ;;  %v615_v36 = vand.u32 4294901760, %v614_v52  ;;  %v11530_v52 = vpack.c.bf16 %v9021_v31, %v9019_v30 }
  0x8a   : > { %7534 = vmatprep.subr.bf16.mxu0 %v7533_v51  ;;  %v11520_v51 = vmov 0.00390625  }
  0x8b   : > { %v7539_v49 = vpack.c.bf16 %v627_v19, %v615_v36  ;;  %v11532_v36 = vpack.c.bf16 %v9037_v0, %v9030_v40  ;;  %v11533_v19 = vpack.c.bf16 %v9043_v48, %v9041_v47 }
  0x91   : > { %7536 = vmatpush1.bf16.xpose.msra.mxu0 %v7535_v3  ;;  %v11524_v3 = vpack.c.bf16 %v8989_v10, %v8986_v8 }
  0x92   : > { %7538 = vmatprep.subr.bf16.mxu0 %v7537_v59  ;;  %v11526_v59 = vpack.c.bf16 %v8999_v45, %v8997_v54 }
  0x99   : > { %7540 = vmatpush1.bf16.xpose.msra.mxu0 %v7539_v49  ;;  %v11534_v49 = vpack.c.bf16 %v9075_v27, %v9051_v56 }
  0x9a   : > { %7542 = vmatprep.subr.bf16.mxu0 %v7541_v43  ;;  %v11525_v43 = vpack.c.bf16 %v8995_v55, %v8993_v12 }
  0xa0   : > { %662 = vmatmul.mubr.f32.vlgmr.msra.gmra.mrb[0].mxu0 %v11520_v51 }
  0xa1   : > { %7544 = vmatpush1.bf16.xpose.msra.mxu0 %v11521_v39  ;;  %795 = vmatprep.mubr.f32.mxu0 %v11519_v1  ;;  %v11535_v39 = vpack.c.bf16 %v9085_v11, %v9083_v9 }
  0xa2   : > { %7546 = vmatprep.subr.bf16.mxu0 %v11522_v50  ;;  %v11536_v50 = vld [vmem:[#allocation5_spill] sm:$0xff] }
  0xa9   : > { %7548 = vmatpush1.bf16.xpose.msra.mxu0 %v11523_v38  ;;  %v11537_v38 = vld [vmem:[#allocation6_spill] sm:$0xff] }
  0xaa   : > { %7550 = vmatprep.subr.bf16.mxu0 %v11524_v3  ;;  %v11538_v3 = vld [vmem:[#allocation7_spill] sm:$0xff] }
  0xb1   : > { %7552 = vmatpush1.bf16.xpose.msra.mxu0 %v11525_v43  ;;  %v11539_v43 = vand.u32 4294901760, %v8952_v60  ;;  %v1171_v60 = vld [vmem:[%s11441_s1] sm:$0xff] }
  0xb2   : > { %7554 = vmatprep.subr.bf16.mxu0 %v11526_v59  ;;  %v11540_v59 = vand.u32 4294901760, %v8957_v61  ;;  %v1172_v61 = vld [vmem:[%s11441_s1 + $0x8] sm:$0xff] }
  0xb9   : > { %7556 = vmatpush1.bf16.xpose.msra.mxu0 %v11527_v58  ;;  %v7605_v58 = vpack.c.bf16 %v11540_v59, %v11539_v43  ;;  %v1176_v43 = vld [vmem:[%s11441_s1 + $0x28] sm:$0xff]  ;;  %v11491_v59 = vmov 0.0|0.0  }
  0xba   : > { %7558 = vmatprep.subr.bf16.mxu0 %v11528_v57  ;;  %v11541_v57 = vand.u32 4294901760, %v8962_v62  ;;  %v1173_v62 = vld [vmem:[%s11441_s1 + $0x10] sm:$0xff]  ;;  %7669 = vmatprep.subr.bf16.mxu1 %v11491_v59  ;;  %v1180_v59 = vld [vmem:[%s11441_s1 + $0x48] sm:$0xff] }
  0xc1   : > { %7560 = vmatpush1.bf16.xpose.msra.mxu0 %v11529_v42  ;;  %v11542_v42 = vand.u32 4294901760, %v8965_v63  ;;  %v1189_v63 = vand.u32 4294901760, %v1171_v60 }
  0xc2   : > { %7562 = vmatprep.subr.bf16.mxu0 %v11530_v52 }
  0xc3   : > { %v7607_v52 = vpack.c.bf16 %v11542_v42, %v11541_v57  ;;  %v1204_v42 = vand.u32 4294901760, %v1176_v43 }
  0xc9   : > { %7564 = vmatpush1.bf16.xpose.msra.mxu0 %v11531_v5  ;;  %v11543_v5 = vand.u32 4294901760, %v8971_v4  ;;  %v1192_v4 = vand.u32 4294901760, %v1172_v61 }
  0xca   : > { %7566 = vmatprep.subr.bf16.mxu0 %v11532_v36  ;;  %v11544_v36 = vand.u32 4294901760, %v8976_v2  ;;  %v1174_v2 = vld [vmem:[%s11441_s1 + $0x18] sm:$0xff] }
  0xcb   : > { %v9328_v37 = vpack.c.bf16 %v1192_v4, %v1189_v63  ;;  %v9332_v26 = vsub.f32 %v1172_v61, %v1192_v4 }
  0xcd   : > { %11545 = vst [vmem:[#allocation5_spill] sm:$0xff] %v9328_v37  ;;  %7671 = vmatpush3.bf16.msra.mxu1 %v9328_v37 }
  0xd1   : > { %7568 = vmatpush1.bf16.xpose.msra.mxu0 %v11533_v19  ;;  %v7609_v19 = vpack.c.bf16 %v11544_v36, %v11543_v5  ;;  %v1178_v5 = vld [vmem:[%s11441_s1 + $0x38] sm:$0xff]  ;;  %v1179_v36 = vld [vmem:[%s11441_s1 + $0x40] sm:$0xff] }
  0xd2   : > { %7570 = vmatprep.subr.bf16.mxu0 %v11534_v49  ;;  %v1195_v49 = vand.u32 4294901760, %v1173_v62 }
  0xd4   : > { %v9334_v21 = vsub.f32 %v1173_v62, %v1195_v49  ;;  %v1182_v62 = vld [vmem:[%s11441_s1 + $0x58] sm:$0xff] }
  0xd6   : > { %11546 = vst [vmem:[#allocation6_spill] sm:$0xff] %v9334_v21  ;;  %v1210_v21 = vand.u32 4294901760, %v1178_v5 }
  0xd9   : > { %7572 = vmatpush1.bf16.xpose.msra.mxu0 %v11535_v39  ;;  %v1175_v39 = vld [vmem:[%s11441_s1 + $0x20] sm:$0xff] }
  0xda   : > { %7574 = vmatprep.subr.bf16.mxu0 %v8880_v13  ;;  %v1201_v57 = vand.u32 4294901760, %v1175_v39 }
  0xdc   : > { %v9350_v61 = vsub.f32 %v1175_v39, %v1201_v57 }
  0xde   : > { %11550 = vst [vmem:[#allocation12_spill] sm:$0xff] %v9350_v61  ;;  %v9365_v61 = vsub.f32 %v1178_v5, %v1210_v21  ;;  %v11556_v5 = vand.u32 4294901760, %v8995_v55  ;;  %v11559_v55 = vand.u32 4294901760, %v9001_v14  ;;  %v11563_v14 = vand.u32 4294901760, %v9015_v28 }
  0xe0   : > { %796 = vmatmul.mubr.f32.vlgmr.msra.gmra.mrb[0].mxu0 %v11519_v1 }
  0xe1   : > { %7576 = vmatpush1.bf16.xpose.msra.mxu0 %v8890_v16  ;;  %897 = vmatprep.mubr.f32.mxu0 %v11519_v1 }
  0xe2   : > { %7578 = vmatprep.subr.bf16.mxu0 %v8896_v17 }
  0xe9   : > { %7580 = vmatpush1.bf16.xpose.msra.mxu0 %v8911_v24 }
  0xea   : > { %7582 = vmatprep.subr.bf16.mxu0 %v8913_v25 }
  0xf1   : > { %7584 = vmatpush1.bf16.xpose.msra.mxu0 %v8921_v34 }
  0xf2   : > { %7586 = vmatprep.subr.bf16.mxu0 %v8923_v35 }
  0xf9   : > { %7588 = vmatpush1.bf16.xpose.msra.mxu0 %v8931_v44 }
  0xfa   : > { %7590 = vmatprep.subr.bf16.mxu0 %v11536_v50 }
 0x101   : > { %7592 = vmatpush1.bf16.xpose.msra.mxu0 %v11537_v38 }
 0x102   : > { %7594 = vmatprep.subr.bf16.mxu0 %v11538_v3 }
 0x109   : > { %7596 = vmatpush1.bf16.xpose.msra.mxu0 %v9007_v18 }
 0x10a   : > { %7598 = vmatprep.subr.bf16.mxu0 %v9013_v23 }
 0x111   : > { %7600 = vmatpush1.bf16.xpose.msra.mxu0 %v9039_v46 }
 0x112   : > { %7602 = vmatprep.subr.bf16.mxu0 %v9049_v53  ;;  %v11548_v53 = vand.u32 4294901760, %v8983_v7  ;;  %v11552_v7 = vand.u32 4294901760, %v8986_v8  ;;  %v9374_v8 = vpack.c.bf16 %v1204_v42, %v1201_v57 }
 0x119   : > { %7604 = vmatpush1.bf16.xpose.msra.mxu0 %v9097_v41  ;;  %v11547_v41 = vand.u32 4294901760, %v8980_v6  ;;  %v1213_v6 = vand.u32 4294901760, %v1179_v36 }
 0x11a   : > { %7606 = vmatprep.subr.bf16.mxu0 %v7605_v58  ;;  %v1198_v58 = vand.u32 4294901760, %v1174_v2 }
 0x11b   : > { %v7611_v46 = vpack.c.bf16 %v11548_v53, %v11547_v41  ;;  %v11553_v41 = vand.u32 4294901760, %v8989_v10 }
 0x11c   : > { %v9346_v23 = vpack.c.bf16 %v1198_v58, %v1195_v49  ;;  %v1216_v49 = vand.u32 4294901760, %v1180_v59 }
 0x11d   : > { %v7613_v53 = vpack.c.bf16 %v11553_v41, %v11552_v7  ;;  %v11565_v7 = vand.u32 4294901760, %v9019_v30  ;;  %v11572_v30 = vand.u32 4294901760, %v9043_v48  ;;  %v1186_v48 = vld [vmem:[%s11441_s1 + $0x78] sm:$0xff] }
 0x11e   : > { %v9369_v37 = vsub.f32 %v1180_v59, %v1216_v49 }
 0x120   : > { %898 = vmatmul.mubr.f32.vlgmr.msra.gmra.mrb[0].mxu0 %v11519_v1  ;;  %v1181_v1 = vld [vmem:[%s11441_s1 + $0x50] sm:$0xff] }
 0x121   : > { %7608 = vmatpush1.bf16.xpose.msra.mxu0 %v7607_v52  ;;  %1063 = vmatprep.mubr.f32.mxu0 %v11520_v51  ;;  %v1177_v52 = vld [vmem:[%s11441_s1 + $0x30] sm:$0xff]  ;;  %v1219_v39 = vand.u32 4294901760, %v1181_v1 }
 0x122   : > { %7610 = vmatprep.subr.bf16.mxu0 %v7609_v19  ;;  %v9330_v19 = vsub.f32 %v1171_v60, %v1189_v63  ;;  %v9348_v60 = vsub.f32 %v1174_v2, %v1198_v58  ;;  %v9356_v63 = vsub.f32 %v1176_v43, %v1204_v42  ;;  %v1207_v4 = vand.u32 4294901760, %v1177_v52 }
 0x123   : > { %v11554_v2 = vmov 0.0|0.0   ;;  %v1222_v43 = vand.u32 4294901760, %v1182_v62  ;;  %v9392_v42 = vpack.c.bf16 %v1216_v49, %v1213_v6 }
 0x124   : > { %11549 = vst [vmem:[#allocation7_spill] sm:$0xff] %v9348_v60  ;;  %11551 = vst [vmem:[#allocation13_spill] sm:$0xff] %v9356_v63  ;;  %7672 = vmatprep.subr.bf16.mxu1 %v11554_v2  ;;  %v9363_v58 = vsub.f32 %v1177_v52, %v1207_v4  ;;  %v9367_v60 = vsub.f32 %v1179_v36, %v1213_v6  ;;  %v9371_v63 = vsub.f32 %v1181_v1, %v1219_v39 }
 0x125   : > { %7674 = vmatpush3.bf16.msra.mxu1 %v9346_v23  ;;  %v9376_v10 = vsub.f32 %v1182_v62, %v1222_v43  ;;  %v11555_v52 = vand.u32 4294901760, %v8993_v12  ;;  %v9384_v59 = vpack.c.bf16 %v1210_v21, %v1207_v4  ;;  %v11558_v1 = vand.u32 4294901760, %v8999_v45 }
 0x126   : > { %7675 = vmatprep.subr.bf16.mxu1 %v11554_v2  ;;  %v11560_v12 = vand.u32 4294901760, %v9003_v15  ;;  %v11561_v45 = vand.u32 4294901760, %v9005_v20  ;;  %v11562_v62 = vand.u32 4294901760, %v9011_v22  ;;  %v11564_v15 = vand.u32 4294901760, %v9017_v29 }
 0x127   : > { %v7615_v36 = vpack.c.bf16 %v11556_v5, %v11555_v52  ;;  %v11566_v20 = vand.u32 4294901760, %v9021_v31  ;;  %v11567_v22 = vand.u32 4294901760, %v9023_v32  ;;  %v11571_v29 = vand.u32 4294901760, %v9041_v47  ;;  %v1185_v47 = vld [vmem:[%s11441_s1 + $0x70] sm:$0xff] }
 0x128   : > { %v7619_v21 = vpack.c.bf16 %v11560_v12, %v11559_v55  ;;  %v7621_v4 = vpack.c.bf16 %v11562_v62, %v11561_v45  ;;  %v7623_v6 = vpack.c.bf16 %v11564_v15, %v11563_v14  ;;  %v11573_v52 = vand.u32 4294901760, %v9051_v56 }
 0x129   : > { %7612 = vmatpush1.bf16.xpose.msra.mxu0 %v7611_v46  ;;  %7677 = vmatpush3.bf16.msra.mxu1 %v9374_v8  ;;  %v11557_v46 = vand.u32 4294901760, %v8997_v54  ;;  %v9400_v54 = vpack.c.bf16 %v1222_v43, %v1219_v39  ;;  %v7625_v41 = vpack.c.bf16 %v11566_v20, %v11565_v7  ;;  %v11569_v39 = vand.u32 4294901760, %v9030_v40 }
 0x12a   : > { %7614 = vmatprep.subr.bf16.mxu0 %v7613_v53  ;;  %7678 = vmatprep.subr.bf16.mxu1 %v11554_v2  ;;  %v11568_v53 = vand.u32 4294901760, %v9025_v33  ;;  %v11570_v43 = vand.u32 4294901760, %v9037_v0  ;;  %v7631_v31 = vpack.c.bf16 %v11572_v30, %v11571_v29  ;;  %v11574_v5 = vand.u32 4294901760, %v9075_v27 }
 0x12b   : > { %v7617_v57 = vpack.c.bf16 %v11558_v1, %v11557_v46  ;;  %v11575_v33 = vand.u32 4294901760, %v9083_v9  ;;  %v11576_v40 = vand.u32 4294901760, %v9085_v11  ;;  %v1231_v11 = vand.u32 4294901760, %v1185_v47  ;;  %v11583_v62 = vld [vmem:[#allocation7_spill] sm:$0xff] }
 0x12c   : > { %v7627_v49 = vpack.c.bf16 %v11568_v53, %v11567_v22  ;;  %v7629_v28 = vpack.c.bf16 %v11570_v43, %v11569_v39  ;;  %v7633_v32 = vpack.c.bf16 %v11574_v5, %v11573_v52  ;;  %v1234_v27 = vand.u32 4294901760, %v1186_v48  ;;  %v11585_v53 = vld [vmem:[#allocation13_spill] sm:$0xff] }
 0x12d   : > { %7680 = vmatpush3.bf16.msra.mxu1 %v9384_v59  ;;  %v7635_v0 = vpack.c.bf16 %v11576_v40, %v11575_v33  ;;  %v11581_v46 = vmov 0.0   ;;  %v1331_v52 = vand.u32 4294901760, %v9365_v61 }
 0x12e   : > { %7681 = vmatprep.subr.bf16.mxu1 %v11554_v2  ;;  %6249 = vmatprep.mubr.msk.f32.mxu1 %vm8749_vm0, %v11581_v46 }
 0x12f   : > { %v1332_v33 = vsub.f32 %v9365_v61, %v1331_v52 }
 0x131   : > { %7616 = vmatpush1.bf16.xpose.msra.mxu0 %v7615_v36  ;;  %7683 = vmatpush3.bf16.msra.mxu1 %v9392_v42  ;;  %v9483_v36 = vsub.f32 %v1186_v48, %v1234_v27 }
 0x132   : > { %7618 = vmatprep.subr.bf16.mxu0 %v7617_v57  ;;  %7684 = vmatprep.subr.bf16.mxu1 %v11554_v2 }
 0x135   : > { %7686 = vmatpush3.bf16.msra.mxu1 %v9400_v54 }
 0x136   : > { %7687 = vmatprep.subr.bf16.mxu1 %v11554_v2 }
 0x139   : > { %7620 = vmatpush1.bf16.xpose.msra.mxu0 %v7619_v21  ;;  %v11582_v21 = vld [vmem:[#allocation6_spill] sm:$0xff] }
 0x13a   : > { %7622 = vmatprep.subr.bf16.mxu0 %v7621_v4  ;;  %v1296_v45 = vand.u32 4294901760, %v11582_v21  ;;  %v1303_v4 = vand.u32 4294901760, %v11583_v62 }
 0x13c   : > { %v1297_v15 = vsub.f32 %v11582_v21, %v1296_v45 }
 0x13e   : > { %v1298_v7 = vand.u32 4294901760, %v1297_v15 }
 0x141   : > { %7624 = vmatpush1.bf16.xpose.msra.mxu0 %v7623_v6  ;;  %v1304_v6 = vsub.f32 %v11583_v62, %v1303_v4 }
 0x142   : > { %7626 = vmatprep.subr.bf16.mxu0 %v7625_v41  ;;  %v11584_v41 = vld [vmem:[#allocation12_spill] sm:$0xff] }
 0x143   : > { %v1305_v20 = vand.u32 4294901760, %v1304_v6  ;;  %v1310_v22 = vand.u32 4294901760, %v11584_v41 }
 0x145   : > { %v7697_v39 = vpack.c.bf16 %v1305_v20, %v1298_v7  ;;  %v1311_v43 = vsub.f32 %v11584_v41, %v1310_v22 }
 0x147   : > { %v1312_v29 = vand.u32 4294901760, %v1311_v43 }
 0x149   : > { %7628 = vmatpush1.bf16.xpose.msra.mxu0 %v7627_v49  ;;  %v1317_v49 = vand.u32 4294901760, %v11585_v53 }
 0x14a   : > { %7630 = vmatprep.subr.bf16.mxu0 %v7629_v28 }
 0x14b   : > { %v1318_v28 = vsub.f32 %v11585_v53, %v1317_v49 }
 0x14d   : > { %v1319_v30 = vand.u32 4294901760, %v1318_v28 }
 0x14f   : > { %v7700_v5 = vpack.c.bf16 %v1319_v30, %v1312_v29  ;;  %v1387_v29 = vand.u32 4294901760, %v9483_v36 }
 0x151   : > { %7632 = vmatpush1.bf16.xpose.msra.mxu0 %v7631_v31  ;;  %v1324_v31 = vand.u32 4294901760, %v9363_v58 }
 0x152   : > { %7634 = vmatprep.subr.bf16.mxu0 %v7633_v32 }
 0x153   : > { %v1325_v32 = vsub.f32 %v9363_v58, %v1324_v31 }
 0x155   : > { %v1326_v40 = vand.u32 4294901760, %v1325_v32 }
 0x159   : > { %7636 = vmatpush1.bf16.xpose.msra.mxu0 %v7635_v0  ;;  %v1333_v0 = vand.u32 4294901760, %v1332_v33  ;;  %v1388_v33 = vsub.f32 %v9483_v36, %v1387_v29 }
 0x15a   : > { %7638 = vmatprep.subr.bf16.mxu0 %v8880_v13  ;;  %v11577_v13 = vld [vmem:[#allocation8_spill] sm:$0xff] }
 0x160   : > { %1064 = vmatmul.mubr.f32.vlgmr.msra.gmra.mrb[0].mxu0 %v11520_v51 }
 0x161   : > { %7640 = vmatpush1.bf16.xpose.msra.mxu0 %v8890_v16  ;;  %1165 = vmatprep.mubr.f32.mxu0 %v11520_v51  ;;  %v11578_v16 = vld [vmem:[#allocation9_spill] sm:$0xff] }
 0x162   : > { %7642 = vmatprep.subr.bf16.mxu0 %v8896_v17  ;;  %v11579_v17 = vld [vmem:[#allocation10_spill] sm:$0xff] }
 0x169   : > { %7644 = vmatpush1.bf16.xpose.msra.mxu0 %v8911_v24  ;;  %v11580_v24 = vld [vmem:[#allocation11_spill] sm:$0xff] }
 0x16a   : > { %7646 = vmatprep.subr.bf16.mxu0 %v8913_v25  ;;  %v1183_v25 = vld [vmem:[%s11441_s1 + $0x60] sm:$0xff] }
 0x171   : > { %7648 = vmatpush1.bf16.xpose.msra.mxu0 %v8921_v34  ;;  %v1184_v34 = vld [vmem:[%s11441_s1 + $0x68] sm:$0xff] }
 0x172   : > { %7650 = vmatprep.subr.bf16.mxu0 %v8923_v35  ;;  %v1225_v35 = vand.u32 4294901760, %v1183_v25 }
 0x174   : > { %v9472_v56 = vsub.f32 %v1183_v25, %v1225_v35 }
 0x179   : > { %7652 = vmatpush1.bf16.xpose.msra.mxu0 %v8931_v44  ;;  %v1228_v44 = vand.u32 4294901760, %v1184_v34 }
 0x17a   : > { %7654 = vmatprep.subr.bf16.mxu0 %v11536_v50  ;;  %v1289_v50 = vand.u32 4294901760, %v9332_v26 }
 0x17b   : > { %v9474_v9 = vsub.f32 %v1184_v34, %v1228_v44 }
 0x17c   : > { %v1290_v57 = vsub.f32 %v9332_v26, %v1289_v50 }
 0x17e   : > { %v1291_v12 = vand.u32 4294901760, %v1290_v57 }
 0x181   : > { %7656 = vmatpush1.bf16.xpose.msra.mxu0 %v11537_v38  ;;  %v9479_v38 = vpack.c.bf16 %v1234_v27, %v1231_v11 }
 0x182   : > { %7658 = vmatprep.subr.bf16.mxu0 %v11538_v3  ;;  %v9481_v3 = vsub.f32 %v1185_v47, %v1231_v11  ;;  %v1359_v47 = vand.u32 4294901760, %v9376_v10 }
 0x184   : > { %v1360_v27 = vsub.f32 %v9376_v10, %v1359_v47  ;;  %v1380_v28 = vand.u32 4294901760, %v9481_v3 }
 0x186   : > { %v1361_v57 = vand.u32 4294901760, %v1360_v27  ;;  %v1381_v32 = vsub.f32 %v9481_v3, %v1380_v28  ;;  %v7730_v27 = vpack.c.bf16 %v9369_v37, %v9367_v60 }
 0x189   : > { %7660 = vmatpush1.bf16.xpose.msra.mxu0 %v9007_v18  ;;  %v9463_v18 = vpack.c.bf16 %v1228_v44, %v1225_v35  ;;  %v1352_v44 = vand.u32 4294901760, %v9371_v63 }
 0x18a   : > { %7662 = vmatprep.subr.bf16.mxu0 %v11577_v13  ;;  %v1338_v13 = vand.u32 4294901760, %v9367_v60 }
 0x18b   : > { %7689 = vmatpush3.bf16.msra.mxu1 %v9463_v18  ;;  %v1353_v11 = vsub.f32 %v9371_v63, %v1352_v44 }
 0x18c   : > { %7690 = vmatprep.subr.bf16.mxu1 %v11554_v2 }
 0x18f   : > { %7692 = vmatpush3.bf16.msra.mxu1 %v9479_v38 }
 0x190   : > { %7693 = vmatprep.subr.bf16.mxu1 %v11554_v2 }
 0x191   : > { %7664 = vmatpush1.bf16.xpose.msra.mxu0 %v11578_v16  ;;  %v1345_v16 = vand.u32 4294901760, %v9369_v37 }
 0x192   : > { %7666 = vmatprep.subr.bf16.mxu0 %v11579_v17  ;;  %v7703_v17 = vpack.c.bf16 %v1333_v0, %v1326_v40  ;;  %v1382_v40 = vand.u32 4294901760, %v1381_v32  ;;  %v1389_v0 = vand.u32 4294901760, %v1388_v33 }
 0x193   : > { %v1346_v25 = vsub.f32 %v9369_v37, %v1345_v16  ;;  %v7787_v37 = vpack.c.bf16 %v1387_v29, %v1380_v28 }
 0x195   : > { %v1347_v35 = vand.u32 4294901760, %v1346_v25  ;;  %v7718_v25 = vpack.c.bf16 %v9332_v26, %v9330_v19  ;;  %v7772_v26 = vpack.c.bf16 %v1317_v49, %v1310_v22 }
 0x199   : > { %7668 = vmatpush1.bf16.xpose.msra.mxu0 %v11580_v24  ;;  %v1339_v24 = vsub.f32 %v9367_v60, %v1338_v13 }
 0x19a   : > { %7957 = vmatprep.subr.bf16.mxu0 %v11554_v2 }
 0x19b   : > { %v1340_v34 = vand.u32 4294901760, %v1339_v24  ;;  %v7715_v24 = vpack.c.bf16 %v1389_v0, %v1382_v40 }
 0x19d   : > { %v7706_v48 = vpack.c.bf16 %v1347_v35, %v1340_v34  ;;  %v7721_v34 = vpack.c.bf16 %v11583_v62, %v11582_v21  ;;  %v7724_v35 = vpack.c.bf16 %v11585_v53, %v11584_v41 }
 0x1a0   : > { %1166 = vmatmul.mubr.f32.vlgmr.msra.gmra.mrb[0].mxu0 %v11520_v51  ;;  %v1282_v51 = vand.u32 4294901760, %v9330_v19 }
 0x1a1   : > { %6669 = vmatprep.mubr.msk.f32.mxu0 %vm8749_vm0, %v11581_v46 }
 0x1a2   : > { %v1283_v1 = vsub.f32 %v9330_v19, %v1282_v51  ;;  %v7775_v19 = vpack.c.bf16 %v1331_v52, %v1324_v31 }
 0x1a4   : > { %v1284_v55 = vand.u32 4294901760, %v1283_v1  ;;  %v1354_v1 = vand.u32 4294901760, %v1353_v11  ;;  %v7727_v11 = vpack.c.bf16 %v9365_v61, %v9363_v58 }
 0x1a6   : > { %v9499_v14 = vpack.c.bf16 %v1291_v12, %v1284_v55  ;;  %v1366_v55 = vand.u32 4294901760, %v9472_v56  ;;  %v1373_v12 = vand.u32 4294901760, %v9474_v9  ;;  %v7709_v15 = vpack.c.bf16 %v1361_v57, %v1354_v1 }
 0x1a7   : > { %v7733_v1 = vpack.c.bf16 %v9376_v10, %v9371_v63  ;;  %v7736_v57 = vpack.c.bf16 %v9474_v9, %v9472_v56 }
 0x1a8   : > { %v1367_v6 = vsub.f32 %v9472_v56, %v1366_v55  ;;  %v1374_v7 = vsub.f32 %v9474_v9, %v1373_v12  ;;  %v7784_v61 = vpack.c.bf16 %v1373_v12, %v1366_v55  ;;  %v1862_v12 = vld [vmem:[%s11444_s4] sm:$0x1] }
 0x1aa   : > { %v1368_v20 = vand.u32 4294901760, %v1367_v6  ;;  %v1375_v43 = vand.u32 4294901760, %v1374_v7  ;;  %v7739_v6 = vpack.c.bf16 %v9483_v36, %v9481_v3 }
 0x1ac   : > { %v7712_v30 = vpack.c.bf16 %v1375_v43, %v1368_v20 }
 0x273   : > { %v1167_v7 = vpop.f32.mrb[0].mxu0 }
 0x274   : > { %v9571_v20 = vand.u32 4294901760, %v1167_v7  ;;  %v1169_v43 = vpop.f32.mrb[1].mxu0 }
 0x275   : > { %v1874_v43 = vld [vmem:[%s11445_s5] sm:$0xff] }
 0x276   : > { %v9574_v32 = vsub.f32 %v1167_v7, %v9571_v20  ;;  %v1893_v7 = vld [vmem:[%s11446_s6 + $0x18] sm:$0xff] }
 0x278   : > { %v9577_v33 = vand.u32 4294901760, %v9574_v32 }
 0x27a   : > { %v1272_v40 = vsub.f32 %v9574_v32, %v9577_v33 }
 0x27c   : > { %v9581_v0 = vand.u32 4294901760, %v1272_v40  ;;  %v1894_v40 = vld [vmem:[%s11446_s6 + $0x20] sm:$0xff] }
 0x27e   : > { %6250 = vmatmul.mubr.f32.vlgmr.msra.gmra.mrb[0].mxu1 %v9581_v0 }
 0x27f   : > { %7695 = vmatpush3.bf16.msra.mxu1 %v9499_v14  ;;  %6284 = vmatprep.mubr.msk.f32.mxu1 %vm8749_vm0, %v11581_v46  ;;  %v11586_v14 = vld [vmem:[#allocation5_spill] sm:$0xff] }
 0x280   : > { %7696 = vmatprep.subr.bf16.mxu1 %v11554_v2 }
 0x283   : > { %7698 = vmatpush3.bf16.msra.mxu1 %v7697_v39  ;;  %v7766_v39 = vpack.c.bf16 %v1289_v50, %v1282_v51  ;;  %v7778_v51 = vpack.c.bf16 %v1345_v16, %v1338_v13  ;;  %v7781_v50 = vpack.c.bf16 %v1359_v47, %v1352_v44  ;;  %v1856_v44 = vld [vmem:[%s11443_s3] sm:$0x1] }
 0x284   : > { %7699 = vmatprep.subr.bf16.mxu1 %v11554_v2 }
 0x287   : > { %7701 = vmatpush3.bf16.msra.mxu1 %v7700_v5  ;;  %v7769_v5 = vpack.c.bf16 %v1303_v4, %v1296_v45 }
 0x288   : > { %7702 = vmatprep.subr.bf16.mxu1 %v11554_v2 }
 0x28b   : > { %7704 = vmatpush3.bf16.msra.mxu1 %v7703_v17 }
 0x28c   : > { %7705 = vmatprep.subr.bf16.mxu1 %v11554_v2 }
 0x28f   : > { %7707 = vmatpush3.bf16.msra.mxu1 %v7706_v48 }
 0x290   : > { %7708 = vmatprep.subr.bf16.mxu1 %v11554_v2 }
 0x293   : > { %7710 = vmatpush3.bf16.msra.mxu1 %v7709_v15 }
 0x294   : > { %7711 = vmatprep.subr.bf16.mxu1 %v11554_v2 }
 0x297   : > { %7713 = vmatpush3.bf16.msra.mxu1 %v7712_v30 }
 0x298   : > { %7714 = vmatprep.subr.bf16.mxu1 %v11554_v2 }
 0x29b   : > { %7716 = vmatpush3.bf16.msra.mxu1 %v7715_v24 }
 0x29c   : > { %7717 = vmatprep.subr.bf16.mxu1 %v11554_v2 }
 0x29e   : > { %6285 = vmatmul.mubr.f32.vlgmr.msra.gmra.mrb[0].mxu1 %v9571_v20 }
 0x29f   : > { %7719 = vmatpush3.bf16.msra.mxu1 %v7718_v25  ;;  %6319 = vmatprep.mubr.msk.f32.mxu1 %vm8749_vm0, %v11581_v46 }
 0x2a0   : > { %7720 = vmatprep.subr.bf16.mxu1 %v11554_v2 }
 0x2a3   : > { %7722 = vmatpush3.bf16.msra.mxu1 %v7721_v34 }
 0x2a4   : > { %7723 = vmatprep.subr.bf16.mxu1 %v11554_v2 }
 0x2a7   : > { %7725 = vmatpush3.bf16.msra.mxu1 %v7724_v35 }
 0x2a8   : > { %7726 = vmatprep.subr.bf16.mxu1 %v11554_v2 }
 0x2ab   : > { %7728 = vmatpush3.bf16.msra.mxu1 %v7727_v11 }
 0x2ac   : > { %7729 = vmatprep.subr.bf16.mxu1 %v11554_v2 }
 0x2af   : > { %7731 = vmatpush3.bf16.msra.mxu1 %v7730_v27 }
 0x2b0   : > { %7732 = vmatprep.subr.bf16.mxu1 %v11554_v2 }
 0x2b3   : > { %7734 = vmatpush3.bf16.msra.mxu1 %v7733_v1  ;;  %v1890_v1 = vld [vmem:[%s11446_s6] sm:$0xff] }
 0x2b4   : > { %7735 = vmatprep.subr.bf16.mxu1 %v11554_v2 }
 0x2b7   : > { %7737 = vmatpush3.bf16.msra.mxu1 %v7736_v57  ;;  %v1891_v57 = vld [vmem:[%s11446_s6 + $0x8] sm:$0xff] }
 0x2b8   : > { %7738 = vmatprep.subr.bf16.mxu1 %v11554_v2 }
 0x2bb   : > { %7740 = vmatpush3.bf16.msra.mxu1 %v7739_v6  ;;  %v1892_v6 = vld [vmem:[%s11446_s6 + $0x10] sm:$0xff] }
 0x2bc   : > { %7741 = vmatprep.subr.bf16.mxu1 %v11554_v2 }
 0x2be   : > { %6320 = vmatmul.mubr.f32.vlgmr.msra.gmra.mrb[0].mxu1 %v9574_v32 }
 0x2bf   : > { %7743 = vmatpush3.bf16.msra.mxu1 %v11586_v14  ;;  %6354 = vmatprep.mubr.msk.f32.mxu1 %vm8749_vm0, %v11581_v46 }
 0x2c0   : > { %7744 = vmatprep.subr.bf16.mxu1 %v11554_v2 }
 0x2c3   : > { %7746 = vmatpush3.bf16.msra.mxu1 %v9346_v23 }
 0x2c4   : > { %7747 = vmatprep.subr.bf16.mxu1 %v11554_v2 }
 0x2c7   : > { %7749 = vmatpush3.bf16.msra.mxu1 %v9374_v8 }
 0x2c8   : > { %7750 = vmatprep.subr.bf16.mxu1 %v11554_v2 }
 0x2cb   : > { %7752 = vmatpush3.bf16.msra.mxu1 %v9384_v59 }
 0x2cc   : > { %7753 = vmatprep.subr.bf16.mxu1 %v11554_v2 }
 0x2cf   : > { %7755 = vmatpush3.bf16.msra.mxu1 %v9392_v42 }
 0x2d0   : > { %7756 = vmatprep.subr.bf16.mxu1 %v11554_v2 }
 0x2d3   : > { %7758 = vmatpush3.bf16.msra.mxu1 %v9400_v54 }
 0x2d4   : > { %7759 = vmatprep.subr.bf16.mxu1 %v11554_v2 }
 0x2d7   : > { %7761 = vmatpush3.bf16.msra.mxu1 %v9463_v18 }
 0x2d8   : > { %7762 = vmatprep.subr.bf16.mxu1 %v11554_v2 }
 0x2db   : > { %7764 = vmatpush3.bf16.msra.mxu1 %v9479_v38 }
 0x2dc   : > { %7765 = vmatprep.subr.bf16.mxu1 %v11554_v2 }
 0x2de   : > { %6355 = vmatmul.mubr.f32.vlgmr.msra.gmra.mrb[0].mxu1 %v9577_v33 }
 0x2df   : > { %7767 = vmatpush3.bf16.msra.mxu1 %v7766_v39  ;;  %6389 = vmatprep.mubr.msk.f32.mxu1 %vm8749_vm0, %v11581_v46 }
 0x2e0   : > { %7768 = vmatprep.subr.bf16.mxu1 %v11554_v2 }
 0x2e3   : > { %7770 = vmatpush3.bf16.msra.mxu1 %v7769_v5  ;;  %v1875_v5 = vld [vmem:[%s11445_s5 + $0x8] sm:$0xff] }
 0x2e4   : > { %7771 = vmatprep.subr.bf16.mxu1 %v11554_v2 }
 0x2e7   : > { %7773 = vmatpush3.bf16.msra.mxu1 %v7772_v26  ;;  %v1876_v26 = vld [vmem:[%s11445_s5 + $0x10] sm:$0xff] }
 0x2e8   : > { %7774 = vmatprep.subr.bf16.mxu1 %v11554_v2 }
 0x2eb   : > { %7776 = vmatpush3.bf16.msra.mxu1 %v7775_v19  ;;  %v1877_v19 = vld [vmem:[%s11445_s5 + $0x18] sm:$0xff] }
 0x2ec   : > { %7777 = vmatprep.subr.bf16.mxu1 %v11554_v2 }
 0x2ef   : > { %7779 = vmatpush3.bf16.msra.mxu1 %v7778_v51 }
 0x2f0   : > { %7780 = vmatprep.subr.bf16.mxu1 %v11554_v2 }
 0x2f3   : > { %7782 = vmatpush3.bf16.msra.mxu1 %v7781_v50 }
 0x2f4   : > { %7783 = vmatprep.subr.bf16.mxu1 %v11554_v2 }
 0x2f7   : > { %7785 = vmatpush3.bf16.msra.mxu1 %v7784_v61 }
 0x2f8   : > { %7786 = vmatprep.subr.bf16.mxu1 %v11554_v2 }
 0x2fb   : > { %7788 = vmatpush3.bf16.msra.mxu1 %v7787_v37 }
 0x2fc   : > { %7789 = vmatprep.subr.bf16.mxu1 %v11554_v2 }
 0x2fe   : > { %6390 = vmatmul.mubr.f32.vlgmr.msra.gmra.mrb[0].mxu1 %v9571_v20 }
 0x2ff   : > { %7791 = vmatpush3.bf16.msra.mxu1 %v11586_v14  ;;  %6424 = vmatprep.mubr.msk.f32.mxu1 %vm8749_vm0, %v11581_v46  ;;  %v1895_v14 = vld [vmem:[%s11446_s6 + $0x28] sm:$0xff] }
 0x300   : > { %7792 = vmatprep.subr.bf16.mxu1 %v11554_v2 }
 0x303   : > { %7794 = vmatpush3.bf16.msra.mxu1 %v9346_v23  ;;  %v1187_v23 = vld [vmem:[%s11442_s2] sm:$0x1] }
 0x304   : > { %7795 = vmatprep.subr.bf16.mxu1 %v11554_v2 }
 0x307   : > { %7797 = vmatpush3.bf16.msra.mxu1 %v9374_v8 }
 0x308   : > { %7798 = vmatprep.subr.bf16.mxu1 %v11554_v2 }
 0x30b   : > { %7800 = vmatpush3.bf16.msra.mxu1 %v9384_v59 }
 0x30c   : > { %7801 = vmatprep.subr.bf16.mxu1 %v11554_v2 }
 0x30f   : > { %7803 = vmatpush3.bf16.msra.mxu1 %v9392_v42 }
 0x310   : > { %7804 = vmatprep.subr.bf16.mxu1 %v11554_v2 }
 0x313   : > { %7806 = vmatpush3.bf16.msra.mxu1 %v9400_v54 }
 0x314   : > { %7807 = vmatprep.subr.bf16.mxu1 %v11554_v2 }
 0x317   : > { %7809 = vmatpush3.bf16.msra.mxu1 %v9463_v18 }
 0x318   : > { %7810 = vmatprep.subr.bf16.mxu1 %v11554_v2 }
 0x31b   : > { %7812 = vmatpush3.bf16.msra.mxu1 %v9479_v38 }
 0x31c   : > { %7813 = vmatprep.subr.bf16.mxu1 %v11554_v2 }
 0x31e   : > { %6425 = vmatmul.mubr.f32.vlgmr.msra.gmra.mrb[0].mxu1 %v9571_v20 }
 0x31f   : > { %6459 = vmatprep.mubr.msk.f32.mxu1 %vm8749_vm0, %v11581_v46 }
 0x3f1   : > { %v1825_v60 = vpop.f32.mrb[0].mxu1 }
 0x3f2   : > { %v8533_v63 = vadd.f32 %v1825_v60, %v1187_v23  ;;  %v6426_v58 = vpop.f32.mrb[1].mxu1 }
 0x3f4   : > { %v1830_v8 = vmul.f32 0.70710677, %v8533_v63  ;;  %v1829_v16 = vmul.f32 0.5, %v8533_v63  ;;  %v1896_v63 = vld [vmem:[%s11446_s6 + $0x30] sm:$0xff] }
 0x3f6   : > { %v1831_v10 = vand.u32 2147483647, %v1830_v8  ;;  %vm1851_vm1 = vcmp.ge.f32.partialorder %v1830_v8, 0.0 }
 0x3f8   : > { %v1832_v59 = vmul.f32 0.3275911, %v1831_v10  ;;  %v1845_v54 = vmul.f32 %v1831_v10, %v1831_v10 }
 0x3fa   : > { %v1833_v42 = vadd.f32 1.0, %v1832_v59  ;;  %v1846_v56 = vsub.f32 0.0, %v1845_v54  ;;  %v1879_v54 = vld [vmem:[%s11445_s5 + $0x28] sm:$0xff] }
 0x3fc   : > { %8658 = vrcp.f32 %v1833_v42  ;;  %v1847_v3 = vmul.f32 1.442695, %v1846_v56  ;;  %v1878_v42 = vld [vmem:[%s11445_s5 + $0x20] sm:$0xff] }
 0x3fe   : > { %8660 = vpow2.f32 %v1847_v3 }
 0x406   : > { %v8659_v18 = vpop.eup %8658 }
 0x407   : > { %v1836_v9 = vmul.f32 1.0614054, %v8659_v18 }
 0x408   : > { %v8661_v53 = vpop.eup %8660 }
 0x409   : > { %v1837_v38 = vadd.f32 -1.4531521, %v1836_v9 }
 0x40b   : > { %v1838_v36 = vmul.f32 %v8659_v18, %v1837_v38 }
 0x40d   : > { %v1839_v21 = vadd.f32 1.4214138, %v1838_v36 }
 0x40f   : > { %v1840_v45 = vmul.f32 %v8659_v18, %v1839_v21  ;;  %v1880_v21 = vld [vmem:[%s11445_s5 + $0x30] sm:$0xff] }
 0x411   : > { %v1841_v62 = vadd.f32 -0.28449672, %v1840_v45 }
 0x413   : > { %v1842_v4 = vmul.f32 %v8659_v18, %v1841_v62 }
 0x415   : > { %v1843_v41 = vadd.f32 0.2548296, %v1842_v4 }
 0x417   : > { %v1844_v22 = vmul.f32 %v8659_v18, %v1843_v41  ;;  %v1897_v18 = vld [vmem:[%s11446_s6 + $0x38] sm:$0xff] }
 0x419   : > { %v1849_v49 = vmul.f32 %v8661_v53, %v1844_v22  ;;  %v1881_v22 = vld [vmem:[%s11445_s5 + $0x38] sm:$0xff]  ;;  %v1898_v53 = vld [vmem:[%s11446_s6 + $0x40] sm:$0xff] }
 0x41b   : > { %v1850_v31 = vsub.f32 1.0, %v1849_v49  ;;  %v1899_v49 = vld [vmem:[%s11446_s6 + $0x48] sm:$0xff] }
 0x41d   : > { %v1852_v52 = vsub.f32 0.0, %v1850_v31 }
 0x41f   : > { %v1853_v13 = vsel %vm1851_vm1, %v1850_v31, %v1852_v52 }
 0x420   : > { %v1854_v17 = vadd.f32 1.0, %v1853_v13 }
 0x422   : > { %v1855_v47 = vmul.f32 %v1854_v17, %v1829_v16 }
 0x424   : > { %v1857_v48 = vmul.f32 %v1856_v44, %v1855_v47  ;;  %v1882_v44 = vld [vmem:[%s11445_s5 + $0x40] sm:$0xff] }
 0x426   : > { %v1859_v55 = vsel %vm1858_vm2, %v1857_v48, 0.0 }
 0x427   : > { %1860 = vadd.xlane.f32.xlu0 %v1859_v55  ;;  %v1900_v55 = vld [vmem:[%s11446_s6 + $0x50] sm:$0xff] }
 0x4b4   : > { %v1861_v15 = vpop.xlane.xlu0 %1860 }
 0x4b5   : > { %v1863_v28 = vadd.f32 %v1862_v12, %v1861_v15  ;;  %v1901_v12 = vld [vmem:[%s11446_s6 + $0x58] sm:$0xff]  ;;  %v1883_v15 = vld [vmem:[%s11445_s5 + $0x48] sm:$0xff] }
 0x4b7   : > { %v1864_v29 = vand.u32 2147483647, %v1863_v28  ;;  %vm1871_vm3 = vcmp.ge.f32.partialorder %v1863_v28, 0.0  ;;  %v1902_v28 = vld [vmem:[%s11446_s6 + $0x60] sm:$0xff] }
 0x4b9   : > { %v1865_v30 = vsub.f32 0.0, %v1864_v29  ;;  %v1903_v29 = vld [vmem:[%s11446_s6 + $0x68] sm:$0xff] }
 0x4bb   : > { %v1866_v24 = vmul.f32 1.442695, %v1865_v30 }
 0x4bd   : > { %8662 = vpow2.f32 %v1866_v24  ;;  %v1904_v24 = vld [vmem:[%s11446_s6 + $0x70] sm:$0xff] }
 0x4c7   : > { %v8663_v25 = vpop.eup %8662 }
 0x4c8   : > { %v1868_v34 = vadd.f32 1.0, %v8663_v25  ;;  %v1905_v25 = vld [vmem:[%s11446_s6 + $0x78] sm:$0xff] }
 0x4ca   : > { %8664 = vrcp.f32 %v1868_v34 }
 0x4d4   : > { %v8665_v35 = vpop.eup %8664 }
 0x4d5   : > { %v1872_v11 = vsub.f32 1.0, %v8665_v35 }
 0x4d7   : > { %v1873_v27 = vsel %vm1871_vm3, %v8665_v35, %v1872_v11 }
 0x4d8   : > { %8609 = vpush %v1873_v27 }
 0x509   : > { %s8610_s13 = spop %8609 }
 0x50a   : > { %v9721_v39 = vstv %s8610_s13 }
 0x50b   : > { %v1910_v51 = vmul.f32 %v9721_v39, %v1890_v1  ;;  %v1911_v50 = vmul.f32 %v9721_v39, %v1891_v57  ;;  %v1912_v61 = vmul.f32 %v9721_v39, %v1892_v6  ;;  %v1913_v37 = vmul.f32 %v9721_v39, %v1893_v7  ;;  %v1884_v6 = vld [vmem:[%s11445_s5 + $0x50] sm:$0xff]  ;;  %v1885_v7 = vld [vmem:[%s11445_s5 + $0x58] sm:$0xff] }
 0x50c   : > { %v1914_v23 = vmul.f32 %v9721_v39, %v1894_v40  ;;  %v1915_v60 = vmul.f32 %v9721_v39, %v1895_v14  ;;  %v1916_v38 = vmul.f32 %v9721_v39, %v1896_v63  ;;  %v1917_v45 = vmul.f32 %v9721_v39, %v1897_v18  ;;  %v1886_v14 = vld [vmem:[%s11445_s5 + $0x60] sm:$0xff] }
 0x50d   : > { %v9741_v58 = vadd.f32 %v1910_v51, %v1874_v43  ;;  %v9743_v8 = vadd.f32 %v1911_v50, %v1875_v5  ;;  %v9745_v10 = vadd.f32 %v1912_v61, %v1876_v26  ;;  %v9747_v59 = vadd.f32 %v1913_v37, %v1877_v19  ;;  %v1887_v5 = vld [vmem:[%s11445_s5 + $0x68] sm:$0xff]  ;;  %v1888_v51 = vld [vmem:[%s11445_s5 + $0x70] sm:$0xff]  ;;  %v1889_v50 = vld [vmem:[%s11445_s5 + $0x78] sm:$0xff] }
 0x50e   : > { %v9761_v3 = vadd.f32 %v1914_v23, %v1878_v42  ;;  %v9763_v36 = vadd.f32 %v1915_v60, %v1879_v54  ;;  %v1932_v31 = vadd.f32 %v1916_v38, %v1880_v21  ;;  %v1933_v16 = vadd.f32 %v1917_v45, %v1881_v22 }
 0x50f   : > { %v1944_v56 = vand.u32 4294901760, %v9741_v58  ;;  %v1947_v9 = vand.u32 4294901760, %v9743_v8  ;;  %v1950_v4 = vand.u32 4294901760, %v9745_v10  ;;  %v1953_v41 = vand.u32 4294901760, %v9747_v59 }
 0x510   : > { %v1956_v52 = vand.u32 4294901760, %v9761_v3  ;;  %v1959_v13 = vand.u32 4294901760, %v9763_v36  ;;  %v1918_v47 = vmul.f32 %v9721_v39, %v1898_v53  ;;  %v1919_v48 = vmul.f32 %v9721_v39, %v1899_v49 }
 0x511   : > { %v9769_v62 = vpack.c.bf16 %v1947_v9, %v1944_v56  ;;  %v9786_v17 = vpack.c.bf16 %v1953_v41, %v1950_v4  ;;  %v1962_v30 = vand.u32 4294901760, %v1932_v31  ;;  %v1965_v35 = vand.u32 4294901760, %v1933_v16 }
 0x512   : > { %v9816_v34 = vpack.c.bf16 %v1959_v13, %v1956_v52  ;;  %v1920_v11 = vmul.f32 %v9721_v39, %v1900_v55  ;;  %v1921_v27 = vmul.f32 %v9721_v39, %v1901_v12  ;;  %v1934_v1 = vadd.f32 %v1918_v47, %v1882_v44 }
 0x513   : > { %7815 = vmatpush3.bf16.msra.mxu1 %v9769_v62  ;;  %v1935_v57 = vadd.f32 %v1919_v48, %v1883_v15  ;;  %v1922_v43 = vmul.f32 %v9721_v39, %v1902_v28  ;;  %v1923_v40 = vmul.f32 %v9721_v39, %v1903_v29  ;;  %v1924_v26 = vmul.f32 %v9721_v39, %v1904_v24 }
 0x514   : > { %7816 = vmatprep.subr.bf16.mxu1 %v11554_v2  ;;  %v1925_v19 = vmul.f32 %v9721_v39, %v1905_v25  ;;  %v9844_v61 = vpack.c.bf16 %v1965_v35, %v1962_v30  ;;  %v1936_v37 = vadd.f32 %v1920_v11, %v1884_v6  ;;  %v1937_v23 = vadd.f32 %v1921_v27, %v1885_v7 }
 0x515   : > { %v1968_v60 = vand.u32 4294901760, %v1934_v1  ;;  %v1971_v63 = vand.u32 4294901760, %v1935_v57  ;;  %v1938_v42 = vadd.f32 %v1922_v43, %v1886_v14  ;;  %v1939_v39 = vadd.f32 %v1923_v40, %v1887_v5 }
 0x516   : > { %v1940_v54 = vadd.f32 %v1924_v26, %v1888_v51  ;;  %v1941_v18 = vadd.f32 %v1925_v19, %v1889_v50  ;;  %v9848_v38 = vsub.f32 %v9741_v58, %v1944_v56  ;;  %v9851_v21 = vsub.f32 %v9743_v8, %v1947_v9 }
 0x517   : > { %7818 = vmatpush3.bf16.msra.mxu1 %v9786_v17  ;;  %v1974_v45 = vand.u32 4294901760, %v1936_v37  ;;  %v9854_v22 = vpack.c.bf16 %v1971_v63, %v1968_v60  ;;  %v1977_v53 = vand.u32 4294901760, %v1937_v23  ;;  %v1980_v49 = vand.u32 4294901760, %v1938_v42 }
 0x518   : > { %7819 = vmatprep.subr.bf16.mxu1 %v11554_v2  ;;  %v1983_v44 = vand.u32 4294901760, %v1939_v39  ;;  %v9857_v47 = vsub.f32 %v9745_v10, %v1950_v4  ;;  %v9860_v48 = vsub.f32 %v9747_v59, %v1953_v41  ;;  %v1986_v55 = vand.u32 4294901760, %v1940_v54 }
 0x519   : > { %v1989_v58 = vand.u32 4294901760, %v1941_v18  ;;  %v9863_v56 = vsub.f32 %v9761_v3, %v1956_v52  ;;  %v9866_v8 = vsub.f32 %v9763_v36, %v1959_v13  ;;  %v9868_v9 = vsub.f32 %v1932_v31, %v1962_v30 }
 0x51a   : > { %v9870_v12 = vsub.f32 %v1933_v16, %v1965_v35  ;;  %v9873_v15 = vsub.f32 %v1934_v1, %v1968_v60  ;;  %v9875_v10 = vsub.f32 %v1935_v57, %v1971_v63  ;;  %v2037_v59 = vand.u32 4294901760, %v9848_v38 }
 0x51b   : > { %7821 = vmatpush3.bf16.msra.mxu1 %v9816_v34  ;;  %v2044_v3 = vand.u32 4294901760, %v9851_v21  ;;  %v9880_v4 = vpack.c.bf16 %v1977_v53, %v1974_v45  ;;  %v9882_v36 = vsub.f32 %v1936_v37, %v1974_v45  ;;  %v9884_v41 = vsub.f32 %v1937_v23, %v1977_v53 }
 0x51c   : > { %7822 = vmatprep.subr.bf16.mxu1 %v11554_v2  ;;  %v9886_v31 = vpack.c.bf16 %v1983_v44, %v1980_v49  ;;  %v9888_v52 = vsub.f32 %v1938_v42, %v1980_v49  ;;  %v9890_v13 = vsub.f32 %v1939_v39, %v1983_v44  ;;  %v9892_v16 = vsub.f32 %v1940_v54, %v1986_v55 }
 0x51d   : > { %v9894_v28 = vsub.f32 %v1941_v18, %v1989_v58  ;;  %v2051_v29 = vand.u32 4294901760, %v9857_v47  ;;  %v2058_v30 = vand.u32 4294901760, %v9860_v48  ;;  %v2065_v24 = vand.u32 4294901760, %v9863_v56 }
 0x51e   : > { %v2072_v25 = vand.u32 4294901760, %v9866_v8  ;;  %v2038_v35 = vsub.f32 %v9848_v38, %v2037_v59  ;;  %v2045_v11 = vsub.f32 %v9851_v21, %v2044_v3  ;;  %v2079_v27 = vand.u32 4294901760, %v9868_v9 }
 0x51f   : > { %7824 = vmatpush3.bf16.msra.mxu1 %v9844_v61  ;;  %v2086_v1 = vand.u32 4294901760, %v9870_v12  ;;  %v2093_v57 = vand.u32 4294901760, %v9873_v15  ;;  %v2100_v6 = vand.u32 4294901760, %v9875_v10  ;;  %v2107_v7 = vand.u32 4294901760, %v9882_v36 }
 0x520   : > { %7825 = vmatprep.subr.bf16.mxu1 %v11554_v2  ;;  %v2114_v43 = vand.u32 4294901760, %v9884_v41  ;;  %v2121_v40 = vand.u32 4294901760, %v9888_v52  ;;  %v2128_v14 = vand.u32 4294901760, %v9890_v13  ;;  %v2135_v5 = vand.u32 4294901760, %v9892_v16 }
 0x521   : > { %v2142_v26 = vand.u32 4294901760, %v9894_v28  ;;  %v9915_v19 = vpack.c.bf16 %v1989_v58, %v1986_v55  ;;  %v2039_v51 = vand.u32 4294901760, %v2038_v35  ;;  %v2046_v50 = vand.u32 4294901760, %v2045_v11 }
 0x522   : > { %v2052_v37 = vsub.f32 %v9857_v47, %v2051_v29  ;;  %v2059_v23 = vsub.f32 %v9860_v48, %v2058_v30  ;;  %v9920_v60 = vpack.c.bf16 %v2044_v3, %v2037_v59  ;;  %v9922_v63 = vpack.c.bf16 %v2058_v30, %v2051_v29 }
 0x523   : > { %7827 = vmatpush3.bf16.msra.mxu1 %v9854_v22  ;;  %v9924_v42 = vpack.c.bf16 %v2072_v25, %v2065_v24  ;;  %v9926_v39 = vpack.c.bf16 %v2086_v1, %v2079_v27  ;;  %v9928_v54 = vpack.c.bf16 %v2100_v6, %v2093_v57  ;;  %v9930_v18 = vpack.c.bf16 %v2114_v43, %v2107_v7 }
 0x524   : > { %7828 = vmatprep.subr.bf16.mxu1 %v11554_v2  ;;  %v9932_v45 = vpack.c.bf16 %v2128_v14, %v2121_v40  ;;  %v9934_v53 = vpack.c.bf16 %v2142_v26, %v2135_v5  ;;  %v2066_v49 = vsub.f32 %v9863_v56, %v2065_v24  ;;  %v7838_v44 = vpack.c.bf16 %v2046_v50, %v2039_v51 }
 0x525   : > { %v2053_v55 = vand.u32 4294901760, %v2052_v37  ;;  %v2060_v58 = vand.u32 4294901760, %v2059_v23  ;;  %v2073_v59 = vsub.f32 %v9866_v8, %v2072_v25  ;;  %v2080_v3 = vsub.f32 %v9868_v9, %v2079_v27 }
 0x526   : > { %v2087_v29 = vsub.f32 %v9870_v12, %v2086_v1  ;;  %v2067_v35 = vand.u32 4294901760, %v2066_v49  ;;  %v2101_v50 = vsub.f32 %v9875_v10, %v2100_v6  ;;  %v2108_v1 = vsub.f32 %v9882_v36, %v2107_v7 }
 0x527   : > { %7830 = vmatpush3.bf16.msra.mxu1 %v9880_v4  ;;  %v7841_v30 = vpack.c.bf16 %v2060_v58, %v2053_v55  ;;  %v2074_v24 = vand.u32 4294901760, %v2073_v59  ;;  %v2081_v11 = vand.u32 4294901760, %v2080_v3  ;;  %v2115_v49 = vsub.f32 %v9884_v41, %v2114_v43 }
 0x528   : > { %7831 = vmatprep.subr.bf16.mxu1 %v11554_v2  ;;  %v2088_v25 = vand.u32 4294901760, %v2087_v29  ;;  %v2102_v23 = vand.u32 4294901760, %v2101_v50  ;;  %v2109_v58 = vand.u32 4294901760, %v2108_v1  ;;  %v2129_v6 = vsub.f32 %v9890_v13, %v2128_v14  ;;  %v5502_v50 = vld [vmem:[%s11441_s1 + $0xa8] sm:$0xff] }
 0x529   : > { %v7844_v51 = vpack.c.bf16 %v2074_v24, %v2067_v35  ;;  %v2136_v59 = vsub.f32 %v9892_v16, %v2135_v5  ;;  %v2143_v43 = vsub.f32 %v9894_v28, %v2142_v26  ;;  %v7862_v5 = vpack.c.bf16 %v9851_v21, %v9848_v38  ;;  %v5497_v26 = vld [vmem:[%s11441_s1 + $0x80] sm:$0xff]  ;;  %v5498_v24 = vld [vmem:[%s11441_s1 + $0x88] sm:$0xff]  ;;  %v5500_v21 = vld [vmem:[%s11441_s1 + $0x98] sm:$0xff] }
 0x52a   : > { %v7847_v37 = vpack.c.bf16 %v2088_v25, %v2081_v11  ;;  %v2130_v7 = vand.u32 4294901760, %v2129_v6  ;;  %v5499_v11 = vld [vmem:[%s11441_s1 + $0x90] sm:$0xff]  ;;  %v2604_v25 = vand.u32 4294901760, %v5497_v26  ;;  %v2607_v38 = vand.u32 4294901760, %v5498_v24  ;;  %v5506_v6 = vld [vmem:[%s11441_s1 + $0xc8] sm:$0xff] }
 0x52b   : > { %7833 = vmatpush3.bf16.msra.mxu1 %v9886_v31  ;;  %v2144_v35 = vand.u32 4294901760, %v2143_v43  ;;  %v2619_v1 = vand.u32 4294901760, %v5502_v50 }
 0x52c   : > { %7834 = vmatprep.subr.bf16.mxu1 %v11554_v2 }
 0x52f   : > { %7836 = vmatpush3.bf16.msra.mxu1 %v9915_v19 }
 0x530   : > { %7837 = vmatprep.subr.bf16.mxu1 %v11554_v2 }
 0x532   : > { %6460 = vmatmul.mubr.f32.vlgmr.msra.gmra.mrb[2].mxu1 %v9581_v0  ;;  %v2094_v0 = vsub.f32 %v9873_v15, %v2093_v57  ;;  %v2116_v57 = vand.u32 4294901760, %v2115_v49  ;;  %v5503_v49 = vld [vmem:[%s11441_s1 + $0xb0] sm:$0xff] }
 0x533   : > { %7839 = vmatpush3.bf16.msra.mxu1 %v7838_v44  ;;  %6494 = vmatprep.mubr.msk.f32.mxu1 %vm8749_vm0, %v11581_v46  ;;  %v2122_v44 = vsub.f32 %v9888_v52, %v2121_v40  ;;  %v2137_v40 = vand.u32 4294901760, %v2136_v59  ;;  %v2622_v43 = vand.u32 4294901760, %v5503_v49 }
 0x534   : > { %7840 = vmatprep.subr.bf16.mxu1 %v11554_v2  ;;  %v2095_v27 = vand.u32 4294901760, %v2094_v0  ;;  %v7853_v3 = vpack.c.bf16 %v2116_v57, %v2109_v58  ;;  %v5501_v0 = vld [vmem:[%s11441_s1 + $0xa0] sm:$0xff]  ;;  %v9996_v58 = vpack.c.bf16 %v2607_v38, %v2604_v25  ;;  %v9998_v57 = vsub.f32 %v5497_v26, %v2604_v25 }
 0x535   : > { %v2123_v29 = vand.u32 4294901760, %v2122_v44  ;;  %v7859_v14 = vpack.c.bf16 %v2144_v35, %v2137_v40  ;;  %v5504_v44 = vld [vmem:[%s11441_s1 + $0xb8] sm:$0xff]  ;;  %v2631_v35 = vand.u32 4294901760, %v5506_v6 }
 0x536   : > { %v7850_v55 = vpack.c.bf16 %v2102_v23, %v2095_v27  ;;  %v2613_v27 = vand.u32 4294901760, %v5500_v21  ;;  %v2616_v23 = vand.u32 4294901760, %v5501_v0  ;;  %7959 = vmatpush3.bf16.msra.mxu0 %v9996_v58 }
 0x537   : > { %7842 = vmatpush3.bf16.msra.mxu1 %v7841_v30  ;;  %v7856_v30 = vpack.c.bf16 %v2130_v7, %v2123_v29  ;;  %v10014_v7 = vsub.f32 %v5502_v50, %v2619_v1  ;;  %7960 = vmatprep.subr.bf16.mxu0 %v11554_v2 }
 0x538   : > { %7843 = vmatprep.subr.bf16.mxu1 %v11554_v2  ;;  %v10011_v29 = vsub.f32 %v5501_v0, %v2616_v23  ;;  %v10029_v25 = vpack.c.bf16 %v2619_v1, %v2616_v23 }
 0x53b   : > { %7845 = vmatpush3.bf16.msra.mxu1 %v7844_v51  ;;  %v2610_v51 = vand.u32 4294901760, %v5499_v11 }
 0x53c   : > { %7846 = vmatprep.subr.bf16.mxu1 %v11554_v2 }
 0x53d   : > { %v10007_v59 = vpack.c.bf16 %v2613_v27, %v2610_v51 }
 0x53f   : > { %7848 = vmatpush3.bf16.msra.mxu1 %v7847_v37  ;;  %v7865_v37 = vpack.c.bf16 %v9860_v48, %v9857_v47  ;;  %v10000_v47 = vsub.f32 %v5498_v24, %v2607_v38  ;;  %v10002_v48 = vsub.f32 %v5499_v11, %v2610_v51  ;;  %v10026_v11 = vsub.f32 %v5506_v6, %v2631_v35 }
 0x540   : > { %7849 = vmatprep.subr.bf16.mxu1 %v11554_v2  ;;  %7962 = vmatpush3.bf16.msra.mxu0 %v10007_v59  ;;  %v7874_v38 = vpack.c.bf16 %v9875_v10, %v9873_v15  ;;  %v7883_v15 = vpack.c.bf16 %v9894_v28, %v9892_v16  ;;  %v5512_v10 = vld [vmem:[%s11441_s1 + $0xf8] sm:$0xff] }
 0x541   : > { %7963 = vmatprep.subr.bf16.mxu0 %v11554_v2 }
 0x543   : > { %7851 = vmatpush3.bf16.msra.mxu1 %v7850_v55  ;;  %v5505_v55 = vld [vmem:[%s11441_s1 + $0xc0] sm:$0xff] }
 0x544   : > { %7852 = vmatprep.subr.bf16.mxu1 %v11554_v2  ;;  %v2628_v40 = vand.u32 4294901760, %v5505_v55  ;;  %7965 = vmatpush3.bf16.msra.mxu0 %v10029_v25 }
 0x545   : > { %7966 = vmatprep.subr.bf16.mxu0 %v11554_v2 }
 0x546   : > { %v10024_v24 = vsub.f32 %v5505_v55, %v2628_v40  ;;  %v2732_v55 = vand.u32 4294901760, %v10014_v7 }
 0x547   : > { %7854 = vmatpush3.bf16.msra.mxu1 %v7853_v3  ;;  %v10009_v3 = vsub.f32 %v5500_v21, %v2613_v27  ;;  %v10043_v21 = vpack.c.bf16 %v2631_v35, %v2628_v40 }
 0x548   : > { %7855 = vmatprep.subr.bf16.mxu1 %v11554_v2 }
 0x54b   : > { %7857 = vmatpush3.bf16.msra.mxu1 %v7856_v30  ;;  %v2625_v30 = vand.u32 4294901760, %v5504_v44 }
 0x54c   : > { %7858 = vmatprep.subr.bf16.mxu1 %v11554_v2 }
 0x54d   : > { %v10022_v26 = vsub.f32 %v5504_v44, %v2625_v30  ;;  %v2725_v44 = vand.u32 4294901760, %v10011_v29 }
 0x54f   : > { %7860 = vmatpush3.bf16.msra.mxu1 %v7859_v14  ;;  %v7868_v14 = vpack.c.bf16 %v9866_v8, %v9863_v56  ;;  %v7871_v56 = vpack.c.bf16 %v9870_v12, %v9868_v9  ;;  %v10036_v8 = vpack.c.bf16 %v2625_v30, %v2622_v43  ;;  %v7877_v9 = vpack.c.bf16 %v9884_v41, %v9882_v36 }
 0x550   : > { %7861 = vmatprep.subr.bf16.mxu1 %v11554_v2  ;;  %v7880_v12 = vpack.c.bf16 %v9890_v13, %v9888_v52  ;;  %v2649_v41 = vand.u32 4294901760, %v5512_v10  ;;  %v2733_v30 = vsub.f32 %v10014_v7, %v2732_v55 }
 0x551   : > { %7968 = vmatpush3.bf16.msra.mxu0 %v10036_v8 }
 0x552   : > { %6495 = vmatmul.mubr.f32.vlgmr.msra.gmra.mrb[2].mxu1 %v9571_v20  ;;  %7969 = vmatprep.subr.bf16.mxu0 %v11554_v2 }
 0x553   : > { %7863 = vmatpush3.bf16.msra.mxu1 %v7862_v5  ;;  %6529 = vmatprep.mubr.msk.f32.mxu1 %vm8749_vm0, %v11581_v46  ;;  %v10020_v5 = vsub.f32 %v5503_v49, %v2622_v43  ;;  %v2726_v43 = vsub.f32 %v10011_v29, %v2725_v44 }
 0x554   : > { %7864 = vmatprep.subr.bf16.mxu1 %v11554_v2 }
 0x555   : > { %7971 = vmatpush3.bf16.msra.mxu0 %v10043_v21  ;;  %v2727_v40 = vand.u32 4294901760, %v2726_v43  ;;  %v2739_v35 = vand.u32 4294901760, %v10020_v5 }
 0x556   : > { %7972 = vmatprep.subr.bf16.mxu0 %v11554_v2 }
 0x557   : > { %7866 = vmatpush3.bf16.msra.mxu1 %v7865_v37 }
 0x558   : > { %7867 = vmatprep.subr.bf16.mxu1 %v11554_v2 }
 0x55b   : > { %7869 = vmatpush3.bf16.msra.mxu1 %v7868_v14  ;;  %v2746_v14 = vand.u32 4294901760, %v10022_v26 }
 0x55c   : > { %7870 = vmatprep.subr.bf16.mxu1 %v11554_v2 }
 0x55f   : > { %7872 = vmatpush3.bf16.msra.mxu1 %v7871_v56  ;;  %v2734_v56 = vand.u32 4294901760, %v2733_v30 }
 0x560   : > { %7873 = vmatprep.subr.bf16.mxu1 %v11554_v2 }
 0x563   : > { %7875 = vmatpush3.bf16.msra.mxu1 %v7874_v38  ;;  %v2740_v38 = vsub.f32 %v10020_v5, %v2739_v35 }
 0x564   : > { %7876 = vmatprep.subr.bf16.mxu1 %v11554_v2 }
 0x567   : > { %7878 = vmatpush3.bf16.msra.mxu1 %v7877_v9  ;;  %v2747_v9 = vsub.f32 %v10022_v26, %v2746_v14 }
 0x568   : > { %7879 = vmatprep.subr.bf16.mxu1 %v11554_v2 }
 0x56b   : > { %7881 = vmatpush3.bf16.msra.mxu1 %v7880_v12  ;;  %v7988_v12 = vpack.c.bf16 %v2734_v56, %v2727_v40 }
 0x56c   : > { %7882 = vmatprep.subr.bf16.mxu1 %v11554_v2 }
 0x56f   : > { %7884 = vmatpush3.bf16.msra.mxu1 %v7883_v15  ;;  %v2741_v15 = vand.u32 4294901760, %v2740_v38 }
 0x570   : > { %7885 = vmatprep.subr.bf16.mxu1 %v11554_v2 }
 0x572   : > { %6530 = vmatmul.mubr.f32.vlgmr.msra.gmra.mrb[2].mxu1 %v9574_v32  ;;  %v5507_v32 = vld [vmem:[%s11441_s1 + $0xd0] sm:$0xff] }
 0x573   : > { %7887 = vmatpush3.bf16.msra.mxu1 %v9769_v62  ;;  %6564 = vmatprep.mubr.msk.f32.mxu1 %vm8749_vm0, %v11581_v46 }
 0x574   : > { %7888 = vmatprep.subr.bf16.mxu1 %v11554_v2 }
 0x577   : > { %7890 = vmatpush3.bf16.msra.mxu1 %v9786_v17 }
 0x578   : > { %7891 = vmatprep.subr.bf16.mxu1 %v11554_v2 }
 0x57b   : > { %7893 = vmatpush3.bf16.msra.mxu1 %v9816_v34 }
 0x57c   : > { %7894 = vmatprep.subr.bf16.mxu1 %v11554_v2 }
 0x57f   : > { %7896 = vmatpush3.bf16.msra.mxu1 %v9844_v61 }
 0x580   : > { %7897 = vmatprep.subr.bf16.mxu1 %v11554_v2 }
 0x583   : > { %7899 = vmatpush3.bf16.msra.mxu1 %v9854_v22 }
 0x584   : > { %7900 = vmatprep.subr.bf16.mxu1 %v11554_v2 }
 0x587   : > { %7902 = vmatpush3.bf16.msra.mxu1 %v9880_v4 }
 0x588   : > { %7903 = vmatprep.subr.bf16.mxu1 %v11554_v2 }
 0x58b   : > { %7905 = vmatpush3.bf16.msra.mxu1 %v9886_v31 }
 0x58c   : > { %7906 = vmatprep.subr.bf16.mxu1 %v11554_v2 }
 0x58f   : > { %7908 = vmatpush3.bf16.msra.mxu1 %v9915_v19 }
 0x590   : > { %7909 = vmatprep.subr.bf16.mxu1 %v11554_v2 }
 0x592   : > { %6565 = vmatmul.mubr.f32.vlgmr.msra.gmra.mrb[2].mxu1 %v9577_v33  ;;  %v5508_v33 = vld [vmem:[%s11441_s1 + $0xd8] sm:$0xff] }
 0x593   : > { %7911 = vmatpush3.bf16.msra.mxu1 %v9920_v60  ;;  %6599 = vmatprep.mubr.msk.f32.mxu1 %vm8749_vm0, %v11581_v46 }
 0x594   : > { %7912 = vmatprep.subr.bf16.mxu1 %v11554_v2 }
 0x597   : > { %7914 = vmatpush3.bf16.msra.mxu1 %v9922_v63  ;;  %v10151_v63 = vsub.f32 %v5512_v10, %v2649_v41 }
 0x598   : > { %7915 = vmatprep.subr.bf16.mxu1 %v11554_v2 }
 0x599   : > { %v11504_v56 = vand.u32 4294901760, %v10151_v63 }
 0x59b   : > { %7917 = vmatpush3.bf16.msra.mxu1 %v9924_v42  ;;  %v2697_v42 = vand.u32 4294901760, %v9998_v57 }
 0x59c   : > { %7918 = vmatprep.subr.bf16.mxu1 %v11554_v2 }
 0x59f   : > { %7920 = vmatpush3.bf16.msra.mxu1 %v9926_v39  ;;  %v2704_v39 = vand.u32 4294901760, %v10000_v47 }
 0x5a0   : > { %7921 = vmatprep.subr.bf16.mxu1 %v11554_v2 }
 0x5a3   : > { %7923 = vmatpush3.bf16.msra.mxu1 %v9928_v54  ;;  %v2698_v54 = vsub.f32 %v9998_v57, %v2697_v42 }
 0x5a4   : > { %7924 = vmatprep.subr.bf16.mxu1 %v11554_v2 }
 0x5a5   : > { %v2699_v0 = vand.u32 4294901760, %v2698_v54 }
 0x5a7   : > { %7926 = vmatpush3.bf16.msra.mxu1 %v9930_v18  ;;  %v2705_v18 = vsub.f32 %v10000_v47, %v2704_v39 }
 0x5a8   : > { %7927 = vmatprep.subr.bf16.mxu1 %v11554_v2 }
 0x5a9   : > { %v2706_v50 = vand.u32 4294901760, %v2705_v18 }
 0x5ab   : > { %7929 = vmatpush3.bf16.msra.mxu1 %v9932_v45  ;;  %v2711_v45 = vand.u32 4294901760, %v10002_v48  ;;  %v10174_v23 = vpack.c.bf16 %v2706_v50, %v2699_v0 }
 0x5ac   : > { %7930 = vmatprep.subr.bf16.mxu1 %v11554_v2 }
 0x5ad   : > { %v2712_v37 = vsub.f32 %v10002_v48, %v2711_v45 }
 0x5af   : > { %7932 = vmatpush3.bf16.msra.mxu1 %v9934_v53  ;;  %v2718_v53 = vand.u32 4294901760, %v10009_v3  ;;  %v2713_v1 = vand.u32 4294901760, %v2712_v37 }
 0x5b0   : > { %7933 = vmatprep.subr.bf16.mxu1 %v11554_v2 }
 0x5b1   : > { %v2719_v27 = vsub.f32 %v10009_v3, %v2718_v53 }
 0x5b2   : > { %6600 = vmatmul.mubr.f32.vlgmr.msra.gmra.mrb[2].mxu1 %v9571_v20 }
 0x5b3   : > { %7935 = vmatpush3.bf16.msra.mxu1 %v9769_v62  ;;  %6634 = vmatprep.mubr.msk.f32.mxu1 %vm8749_vm0, %v11581_v46  ;;  %v5509_v62 = vld [vmem:[%s11441_s1 + $0xe0] sm:$0xff]  ;;  %v2720_v49 = vand.u32 4294901760, %v2719_v27 }
 0x5b4   : > { %7936 = vmatprep.subr.bf16.mxu1 %v11554_v2 }
 0x5b5   : > { %v7985_v6 = vpack.c.bf16 %v2720_v49, %v2713_v1 }
 0x5b7   : > { %7938 = vmatpush3.bf16.msra.mxu1 %v9786_v17  ;;  %v2634_v17 = vand.u32 4294901760, %v5507_v32 }
 0x5b8   : > { %7939 = vmatprep.subr.bf16.mxu1 %v11554_v2 }
 0x5b9   : > { %v10138_v52 = vsub.f32 %v5507_v32, %v2634_v17  ;;  %v2748_v32 = vand.u32 4294901760, %v2747_v9 }
 0x5bb   : > { %7941 = vmatpush3.bf16.msra.mxu1 %v9816_v34  ;;  %v2637_v34 = vand.u32 4294901760, %v5508_v33  ;;  %v2767_v10 = vand.u32 4294901760, %v10138_v52 }
 0x5bc   : > { %7942 = vmatprep.subr.bf16.mxu1 %v11554_v2 }
 0x5bd   : > { %v10140_v13 = vsub.f32 %v5508_v33, %v2637_v34  ;;  %v2753_v33 = vand.u32 4294901760, %v10024_v24 }
 0x5bf   : > { %7944 = vmatpush3.bf16.msra.mxu1 %v9844_v61  ;;  %v2640_v61 = vand.u32 4294901760, %v5509_v62 }
 0x5c0   : > { %7945 = vmatprep.subr.bf16.mxu1 %v11554_v2 }
 0x5c1   : > { %v10142_v16 = vsub.f32 %v5509_v62, %v2640_v61  ;;  %v2760_v62 = vand.u32 4294901760, %v10026_v11 }
 0x5c3   : > { %7947 = vmatpush3.bf16.msra.mxu1 %v9854_v22  ;;  %v5511_v22 = vld [vmem:[%s11441_s1 + $0xf0] sm:$0xff]  ;;  %v2781_v50 = vand.u32 4294901760, %v10142_v16 }
 0x5c4   : > { %7948 = vmatprep.subr.bf16.mxu1 %v11554_v2  ;;  %v2646_v36 = vand.u32 4294901760, %v5511_v22 }
 0x5c5   : > { %v2782_v1 = vsub.f32 %v10142_v16, %v2781_v50 }
 0x5c6   : > { %v10165_v51 = vpack.c.bf16 %v2649_v41, %v2646_v36  ;;  %v2768_v41 = vsub.f32 %v10138_v52, %v2767_v10 }
 0x5c7   : > { %7950 = vmatpush3.bf16.msra.mxu1 %v9880_v4  ;;  %v2783_v43 = vand.u32 4294901760, %v2782_v1 }
 0x5c8   : > { %7951 = vmatprep.subr.bf16.mxu1 %v11554_v2  ;;  %v2769_v18 = vand.u32 4294901760, %v2768_v41  ;;  %v8012_v41 = vpack.c.bf16 %v10014_v7, %v10011_v29 }
 0x5cb   : > { %7953 = vmatpush3.bf16.msra.mxu1 %v9886_v31  ;;  %v10136_v31 = vpack.c.bf16 %v2637_v34, %v2634_v17  ;;  %v7991_v17 = vpack.c.bf16 %v2748_v32, %v2741_v15  ;;  %v2754_v34 = vsub.f32 %v10024_v24, %v2753_v33  ;;  %v2803_v15 = vsub.f32 %v10151_v63, %v11504_v56 }
 0x5cc   : > { %7954 = vmatprep.subr.bf16.mxu1 %v11554_v2 }
 0x5cd   : > { %7974 = vmatpush3.bf16.msra.mxu0 %v10136_v31 }
 0x5ce   : > { %7975 = vmatprep.subr.bf16.mxu0 %v11554_v2 }
 0x5cf   : > { %7956 = vmatpush3.bf16.msra.mxu1 %v9915_v19  ;;  %v10146_v19 = vsub.f32 %v5511_v22, %v2646_v36 }
 0x5d0   : > { %8101 = vmatprep.subr.bf16.mxu1 %v11554_v2 }
 0x5d1   : > { %v11505_v40 = vand.u32 4294901760, %v10146_v19 }
 0x5d2   : > { %6635 = vmatmul.mubr.f32.vlgmr.msra.gmra.mrb[2].mxu1 %v9571_v20  ;;  %v5510_v20 = vld [vmem:[%s11441_s1 + $0xe8] sm:$0xff] }
 0x5d3   : > { %6879 = vmatprep.mubr.msk.f32.mxu1 %vm8749_vm0, %v11581_v46  ;;  %v2643_v4 = vand.u32 4294901760, %v5510_v20  ;;  %v2796_v9 = vsub.f32 %v10146_v19, %v11505_v40 }
 0x5d5   : > { %v10144_v28 = vsub.f32 %v5510_v20, %v2643_v4  ;;  %v10149_v60 = vpack.c.bf16 %v2643_v4, %v2640_v61  ;;  %v2761_v20 = vsub.f32 %v10026_v11, %v2760_v62  ;;  %v2755_v61 = vand.u32 4294901760, %v2754_v34 }
 0x5d6   : > { %v2774_v4 = vand.u32 4294901760, %v10140_v13  ;;  %v2797_v32 = vand.u32 4294901760, %v2796_v9  ;;  %v2804_v34 = vand.u32 4294901760, %v2803_v15 }
 0x5d7   : > { %7977 = vmatpush3.bf16.msra.mxu0 %v10149_v60  ;;  %v2762_v22 = vand.u32 4294901760, %v2761_v20  ;;  %v11506_v37 = vand.u32 4294901760, %v10144_v28  ;;  %v8024_v1 = vpack.c.bf16 %v10144_v28, %v10142_v16  ;;  %v11587_v29 = vand.u32 4294901760, %v10144_v28 }
 0x5d8   : > { %7978 = vmatprep.subr.bf16.mxu0 %v11554_v2  ;;  %v2775_v54 = vsub.f32 %v10140_v13, %v2774_v4  ;;  %v8003_v20 = vpack.c.bf16 %v2804_v34, %v2797_v32 }
 0x5d9   : > { %v7994_v36 = vpack.c.bf16 %v2762_v22, %v2755_v61  ;;  %v2789_v49 = vsub.f32 %v10144_v28, %v11506_v37  ;;  %v8006_v61 = vpack.c.bf16 %v10000_v47, %v9998_v57  ;;  %v8009_v22 = vpack.c.bf16 %v10009_v3, %v10002_v48 }
 0x5da   : > { %v2776_v0 = vand.u32 4294901760, %v2775_v54  ;;  %v8015_v54 = vpack.c.bf16 %v10022_v26, %v10020_v5  ;;  %v8060_v57 = vpack.c.bf16 %v2732_v55, %v2725_v44  ;;  %v8063_v47 = vpack.c.bf16 %v2746_v14, %v2739_v35 }
 0x5db   : > { %7980 = vmatpush3.bf16.msra.mxu0 %v10165_v51  ;;  %v2790_v30 = vand.u32 4294901760, %v2789_v49  ;;  %v8027_v49 = vpack.c.bf16 %v10151_v63, %v10146_v19  ;;  %v8066_v48 = vpack.c.bf16 %v2760_v62, %v2753_v33  ;;  %v8069_v3 = vpack.c.bf16 %v2774_v4, %v2767_v10  ;;  %v5514_v4 = vld [vmem:[%s11443_s3 + $0x1] sm:$0x1] }
 0x5dc   : > { %7981 = vmatprep.subr.bf16.mxu0 %v11554_v2  ;;  %v7997_v27 = vpack.c.bf16 %v2776_v0, %v2769_v18  ;;  %v8018_v18 = vpack.c.bf16 %v10026_v11, %v10024_v24  ;;  %v8021_v0 = vpack.c.bf16 %v10140_v13, %v10138_v52  ;;  %v8072_v7 = vpack.c.bf16 %v11587_v29, %v2781_v50  ;;  %v5519_v29 = vld [vmem:[%s11445_s5 + $0x98] sm:$0xff] }
 0x5dd   : > { %v8000_v38 = vpack.c.bf16 %v2790_v30, %v2783_v43  ;;  %v1942_v43 = vld [vmem:[%s11447_s7] sm:$0x1]  ;;  %v11588_v5 = vand.u32 4294901760, %v10146_v19  ;;  %v11589_v26 = vand.u32 4294901760, %v10151_v63 }
 0x5df   : > { %v8075_v24 = vpack.c.bf16 %v11589_v26, %v11588_v5 }
 0x6a5   : > { %v2580_v30 = vpop.f32.mrb[2].mxu1 }
 0x6a6   : > { %v8534_v9 = vadd.f32 %v2580_v30, %v1942_v43  ;;  %v6636_v15 = vpop.f32.mrb[3].mxu1  ;;  %v5532_v43 = vld [vmem:[%s11446_s6 + $0x80] sm:$0xff]  ;;  %v5533_v30 = vld [vmem:[%s11446_s6 + $0x88] sm:$0xff] }
 0x6a7   : > { %v5535_v15 = vld [vmem:[%s11446_s6 + $0x98] sm:$0xff] }
 0x6a8   : > { %v10245_v32 = vand.u32 4294901760, %v8534_v9 }
 0x6aa   : > { %v10248_v34 = vsub.f32 %v8534_v9, %v10245_v32  ;;  %v5534_v9 = vld [vmem:[%s11446_s6 + $0x90] sm:$0xff] }
 0x6ac   : > { %v10251_v56 = vand.u32 4294901760, %v10248_v34 }
 0x6ae   : > { %v2687_v40 = vsub.f32 %v10248_v34, %v10251_v56 }
 0x6b0   : > { %v10255_v37 = vand.u32 4294901760, %v2687_v40  ;;  %v5515_v40 = vld [vmem:[%s11444_s4 + $0x1] sm:$0x1] }
 0x6b2   : > { %6670 = vmatmul.mubr.f32.vlgmr.msra.gmra.mrb[2].mxu0 %v10255_v37 }
 0x6b3   : > { %7983 = vmatpush3.bf16.msra.mxu0 %v10174_v23  ;;  %6704 = vmatprep.mubr.msk.f32.mxu0 %vm8749_vm0, %v11581_v46  ;;  %v8054_v23 = vpack.c.bf16 %v2704_v39, %v2697_v42 }
 0x6b4   : > { %7984 = vmatprep.subr.bf16.mxu0 %v11554_v2 }
 0x6b7   : > { %7986 = vmatpush3.bf16.msra.mxu0 %v7985_v6  ;;  %v8057_v6 = vpack.c.bf16 %v2718_v53, %v2711_v45 }
 0x6b8   : > { %7987 = vmatprep.subr.bf16.mxu0 %v11554_v2 }
 0x6bb   : > { %7989 = vmatpush3.bf16.msra.mxu0 %v7988_v12 }
 0x6bc   : > { %7990 = vmatprep.subr.bf16.mxu0 %v11554_v2 }
 0x6bf   : > { %7992 = vmatpush3.bf16.msra.mxu0 %v7991_v17 }
 0x6c0   : > { %7993 = vmatprep.subr.bf16.mxu0 %v11554_v2 }
 0x6c3   : > { %7995 = vmatpush3.bf16.msra.mxu0 %v7994_v36 }
 0x6c4   : > { %7996 = vmatprep.subr.bf16.mxu0 %v11554_v2 }
 0x6c7   : > { %7998 = vmatpush3.bf16.msra.mxu0 %v7997_v27 }
 0x6c8   : > { %7999 = vmatprep.subr.bf16.mxu0 %v11554_v2 }
 0x6cb   : > { %8001 = vmatpush3.bf16.msra.mxu0 %v8000_v38 }
 0x6cc   : > { %8002 = vmatprep.subr.bf16.mxu0 %v11554_v2 }
 0x6cf   : > { %8004 = vmatpush3.bf16.msra.mxu0 %v8003_v20 }
 0x6d0   : > { %8005 = vmatprep.subr.bf16.mxu0 %v11554_v2 }
 0x6d2   : > { %6705 = vmatmul.mubr.f32.vlgmr.msra.gmra.mrb[2].mxu0 %v10245_v32 }
 0x6d3   : > { %8007 = vmatpush3.bf16.msra.mxu0 %v8006_v61  ;;  %6739 = vmatprep.mubr.msk.f32.mxu0 %vm8749_vm0, %v11581_v46 }
 0x6d4   : > { %8008 = vmatprep.subr.bf16.mxu0 %v11554_v2 }
 0x6d7   : > { %8010 = vmatpush3.bf16.msra.mxu0 %v8009_v22 }
 0x6d8   : > { %8011 = vmatprep.subr.bf16.mxu0 %v11554_v2 }
 0x6db   : > { %8013 = vmatpush3.bf16.msra.mxu0 %v8012_v41 }
 0x6dc   : > { %8014 = vmatprep.subr.bf16.mxu0 %v11554_v2 }
 0x6df   : > { %8016 = vmatpush3.bf16.msra.mxu0 %v8015_v54 }
 0x6e0   : > { %8017 = vmatprep.subr.bf16.mxu0 %v11554_v2 }
 0x6e3   : > { %8019 = vmatpush3.bf16.msra.mxu0 %v8018_v18 }
 0x6e4   : > { %8020 = vmatprep.subr.bf16.mxu0 %v11554_v2 }
 0x6e7   : > { %8022 = vmatpush3.bf16.msra.mxu0 %v8021_v0 }
 0x6e8   : > { %8023 = vmatprep.subr.bf16.mxu0 %v11554_v2 }
 0x6eb   : > { %8025 = vmatpush3.bf16.msra.mxu0 %v8024_v1 }
 0x6ec   : > { %8026 = vmatprep.subr.bf16.mxu0 %v11554_v2 }
 0x6ef   : > { %8028 = vmatpush3.bf16.msra.mxu0 %v8027_v49 }
 0x6f0   : > { %8029 = vmatprep.subr.bf16.mxu0 %v11554_v2 }
 0x6f2   : > { %6740 = vmatmul.mubr.f32.vlgmr.msra.gmra.mrb[2].mxu0 %v10248_v34 }
 0x6f3   : > { %8031 = vmatpush3.bf16.msra.mxu0 %v9996_v58  ;;  %6774 = vmatprep.mubr.msk.f32.mxu0 %vm8749_vm0, %v11581_v46 }
 0x6f4   : > { %8032 = vmatprep.subr.bf16.mxu0 %v11554_v2 }
 0x6f7   : > { %8034 = vmatpush3.bf16.msra.mxu0 %v10007_v59 }
 0x6f8   : > { %8035 = vmatprep.subr.bf16.mxu0 %v11554_v2 }
 0x6fb   : > { %8037 = vmatpush3.bf16.msra.mxu0 %v10029_v25 }
 0x6fc   : > { %8038 = vmatprep.subr.bf16.mxu0 %v11554_v2 }
 0x6ff   : > { %8040 = vmatpush3.bf16.msra.mxu0 %v10036_v8 }
 0x700   : > { %8041 = vmatprep.subr.bf16.mxu0 %v11554_v2 }
 0x703   : > { %8043 = vmatpush3.bf16.msra.mxu0 %v10043_v21 }
 0x704   : > { %8044 = vmatprep.subr.bf16.mxu0 %v11554_v2 }
 0x707   : > { %8046 = vmatpush3.bf16.msra.mxu0 %v10136_v31 }
 0x708   : > { %8047 = vmatprep.subr.bf16.mxu0 %v11554_v2 }
 0x70b   : > { %8049 = vmatpush3.bf16.msra.mxu0 %v10149_v60 }
 0x70c   : > { %8050 = vmatprep.subr.bf16.mxu0 %v11554_v2 }
 0x70f   : > { %8052 = vmatpush3.bf16.msra.mxu0 %v10165_v51 }
 0x710   : > { %8053 = vmatprep.subr.bf16.mxu0 %v11554_v2 }
 0x712   : > { %6775 = vmatmul.mubr.f32.vlgmr.msra.gmra.mrb[2].mxu0 %v10251_v56 }
 0x713   : > { %8055 = vmatpush3.bf16.msra.mxu0 %v8054_v23  ;;  %6809 = vmatprep.mubr.msk.f32.mxu0 %vm8749_vm0, %v11581_v46  ;;  %v5516_v23 = vld [vmem:[%s11445_s5 + $0x80] sm:$0xff] }
 0x714   : > { %8056 = vmatprep.subr.bf16.mxu0 %v11554_v2 }
 0x717   : > { %8058 = vmatpush3.bf16.msra.mxu0 %v8057_v6  ;;  %v5536_v6 = vld [vmem:[%s11446_s6 + $0xa0] sm:$0xff] }
 0x718   : > { %8059 = vmatprep.subr.bf16.mxu0 %v11554_v2 }
 0x71b   : > { %8061 = vmatpush3.bf16.msra.mxu0 %v8060_v57  ;;  %v5537_v57 = vld [vmem:[%s11446_s6 + $0xa8] sm:$0xff] }
 0x71c   : > { %8062 = vmatprep.subr.bf16.mxu0 %v11554_v2 }
 0x71f   : > { %8064 = vmatpush3.bf16.msra.mxu0 %v8063_v47 }
 0x720   : > { %8065 = vmatprep.subr.bf16.mxu0 %v11554_v2 }
 0x723   : > { %8067 = vmatpush3.bf16.msra.mxu0 %v8066_v48  ;;  %v5517_v48 = vld [vmem:[%s11445_s5 + $0x88] sm:$0xff] }
 0x724   : > { %8068 = vmatprep.subr.bf16.mxu0 %v11554_v2 }
 0x727   : > { %8070 = vmatpush3.bf16.msra.mxu0 %v8069_v3  ;;  %v5518_v3 = vld [vmem:[%s11445_s5 + $0x90] sm:$0xff] }
 0x728   : > { %8071 = vmatprep.subr.bf16.mxu0 %v11554_v2 }
 0x72b   : > { %8073 = vmatpush3.bf16.msra.mxu0 %v8072_v7 }
 0x72c   : > { %8074 = vmatprep.subr.bf16.mxu0 %v11554_v2 }
 0x72f   : > { %8076 = vmatpush3.bf16.msra.mxu0 %v8075_v24 }
 0x730   : > { %8077 = vmatprep.subr.bf16.mxu0 %v11554_v2 }
 0x732   : > { %6810 = vmatmul.mubr.f32.vlgmr.msra.gmra.mrb[2].mxu0 %v10245_v32 }
 0x733   : > { %8079 = vmatpush3.bf16.msra.mxu0 %v9996_v58  ;;  %6844 = vmatprep.mubr.msk.f32.mxu0 %vm8749_vm0, %v11581_v46  ;;  %v5513_v58 = vld [vmem:[%s11442_s2 + $0x1] sm:$0x1] }
 0x734   : > { %8080 = vmatprep.subr.bf16.mxu0 %v11554_v2 }
 0x737   : > { %8082 = vmatpush3.bf16.msra.mxu0 %v10007_v59 }
 0x738   : > { %8083 = vmatprep.subr.bf16.mxu0 %v11554_v2 }
 0x73b   : > { %8085 = vmatpush3.bf16.msra.mxu0 %v10029_v25 }
 0x73c   : > { %8086 = vmatprep.subr.bf16.mxu0 %v11554_v2 }
 0x73f   : > { %8088 = vmatpush3.bf16.msra.mxu0 %v10036_v8 }
 0x740   : > { %8089 = vmatprep.subr.bf16.mxu0 %v11554_v2 }
 0x743   : > { %8091 = vmatpush3.bf16.msra.mxu0 %v10043_v21 }
 0x744   : > { %8092 = vmatprep.subr.bf16.mxu0 %v11554_v2 }
 0x747   : > { %8094 = vmatpush3.bf16.msra.mxu0 %v10136_v31 }
 0x748   : > { %8095 = vmatprep.subr.bf16.mxu0 %v11554_v2 }
 0x74b   : > { %8097 = vmatpush3.bf16.msra.mxu0 %v10149_v60 }
 0x74c   : > { %8098 = vmatprep.subr.bf16.mxu0 %v11554_v2 }
 0x74f   : > { %8100 = vmatpush3.bf16.msra.mxu0 %v10165_v51 }
 0x750   : > { %8245 = vmatprep.subr.bf16.mxu0 %v11554_v2 }
 0x752   : > { %6845 = vmatmul.mubr.f32.vlgmr.msra.gmra.mrb[2].mxu0 %v10245_v32 }
 0x753   : > { %7089 = vmatprep.mubr.msk.f32.mxu0 %vm8749_vm0, %v11581_v46 }
 0x825   : > { %v3240_v59 = vpop.f32.mrb[2].mxu0 }
 0x826   : > { %v8535_v11 = vadd.f32 %v5513_v58, %v3240_v59  ;;  %v6846_v25 = vpop.f32.mrb[3].mxu0 }
 0x828   : > { %v3245_v8 = vmul.f32 0.70710677, %v8535_v11  ;;  %v3244_v17 = vmul.f32 0.5, %v8535_v11  ;;  %v5538_v11 = vld [vmem:[%s11446_s6 + $0xb0] sm:$0xff] }
 0x82a   : > { %v3246_v21 = vand.u32 2147483647, %v3245_v8  ;;  %vm3266_vm4 = vcmp.ge.f32.partialorder %v3245_v8, 0.0 }
 0x82c   : > { %v3247_v31 = vmul.f32 0.3275911, %v3246_v21  ;;  %v3260_v13 = vmul.f32 %v3246_v21, %v3246_v21 }
 0x82e   : > { %v3248_v52 = vadd.f32 1.0, %v3247_v31  ;;  %v3261_v28 = vsub.f32 0.0, %v3260_v13  ;;  %v5521_v13 = vld [vmem:[%s11445_s5 + $0xa8] sm:$0xff] }
 0x830   : > { %8666 = vrcp.f32 %v3248_v52  ;;  %v3262_v63 = vmul.f32 1.442695, %v3261_v28  ;;  %v5520_v52 = vld [vmem:[%s11445_s5 + $0xa0] sm:$0xff] }
 0x832   : > { %8668 = vpow2.f32 %v3262_v63 }
 0x83a   : > { %v8667_v16 = vpop.eup %8666 }
 0x83b   : > { %v3251_v19 = vmul.f32 1.0614054, %v8667_v16 }
 0x83c   : > { %v8669_v35 = vpop.eup %8668 }
 0x83d   : > { %v3252_v60 = vadd.f32 -1.4531521, %v3251_v19 }
 0x83f   : > { %v3253_v42 = vmul.f32 %v8667_v16, %v3252_v60 }
 0x841   : > { %v3254_v39 = vadd.f32 1.4214138, %v3253_v42 }
 0x843   : > { %v3255_v45 = vmul.f32 %v8667_v16, %v3254_v39  ;;  %v5522_v39 = vld [vmem:[%s11445_s5 + $0xb0] sm:$0xff] }
 0x845   : > { %v3256_v53 = vadd.f32 -0.28449672, %v3255_v45 }
 0x847   : > { %v3257_v51 = vmul.f32 %v8667_v16, %v3256_v53 }
 0x849   : > { %v3258_v44 = vadd.f32 0.2548296, %v3257_v51 }
 0x84b   : > { %v3259_v55 = vmul.f32 %v8667_v16, %v3258_v44  ;;  %v5539_v16 = vld [vmem:[%s11446_s6 + $0xb8] sm:$0xff] }
 0x84d   : > { %v3264_v14 = vmul.f32 %v8669_v35, %v3259_v55  ;;  %v5523_v55 = vld [vmem:[%s11445_s5 + $0xb8] sm:$0xff]  ;;  %v5540_v35 = vld [vmem:[%s11446_s6 + $0xc0] sm:$0xff] }
 0x84f   : > { %v3265_v12 = vsub.f32 1.0, %v3264_v14  ;;  %v5541_v14 = vld [vmem:[%s11446_s6 + $0xc8] sm:$0xff] }
 0x851   : > { %v3267_v33 = vsub.f32 0.0, %v3265_v12 }
 0x853   : > { %v3268_v62 = vsel %vm3266_vm4, %v3265_v12, %v3267_v33 }
 0x854   : > { %v3269_v10 = vadd.f32 1.0, %v3268_v62 }
 0x856   : > { %v3270_v36 = vmul.f32 %v3269_v10, %v3244_v17 }
 0x858   : > { %v3273_v50 = vmul.f32 %v5514_v4, %v3270_v36  ;;  %v5524_v4 = vld [vmem:[%s11445_s5 + $0xc0] sm:$0xff] }
 0x85a   : > { %v3274_v27 = vsel %vm1858_vm2, %v3273_v50, 0.0 }
 0x85b   : > { %3275 = vadd.xlane.f32.xlu0 %v3274_v27  ;;  %v5542_v27 = vld [vmem:[%s11446_s6 + $0xd0] sm:$0xff] }
 0x8e8   : > { %v3276_v38 = vpop.xlane.xlu0 %3275 }
 0x8e9   : > { %v3279_v20 = vadd.f32 %v5515_v40, %v3276_v38  ;;  %v5543_v40 = vld [vmem:[%s11446_s6 + $0xd8] sm:$0xff]  ;;  %v5525_v38 = vld [vmem:[%s11445_s5 + $0xc8] sm:$0xff] }
 0x8eb   : > { %v3280_v61 = vand.u32 2147483647, %v3279_v20  ;;  %vm3287_vm5 = vcmp.ge.f32.partialorder %v3279_v20, 0.0  ;;  %v5544_v20 = vld [vmem:[%s11446_s6 + $0xe0] sm:$0xff] }
 0x8ed   : > { %v3281_v22 = vsub.f32 0.0, %v3280_v61  ;;  %v5545_v61 = vld [vmem:[%s11446_s6 + $0xe8] sm:$0xff] }
 0x8ef   : > { %v3282_v41 = vmul.f32 1.442695, %v3281_v22 }
 0x8f1   : > { %8670 = vpow2.f32 %v3282_v41  ;;  %v5546_v41 = vld [vmem:[%s11446_s6 + $0xf0] sm:$0xff] }
 0x8fb   : > { %v8671_v54 = vpop.eup %8670 }
 0x8fc   : > { %v3284_v18 = vadd.f32 1.0, %v8671_v54  ;;  %v5547_v54 = vld [vmem:[%s11446_s6 + $0xf8] sm:$0xff] }
 0x8fe   : > { %8672 = vrcp.f32 %v3284_v18 }
 0x908   : > { %v8673_v0 = vpop.eup %8672 }
 0x909   : > { %v3288_v1 = vsub.f32 1.0, %v8673_v0 }
 0x90b   : > { %v3289_v49 = vsel %vm3287_vm5, %v8673_v0, %v3288_v1 }
 0x90c   : > { %8611 = vpush %v3289_v49 }
 0x93d   : > { %s8612_s17 = spop %8611 }
 0x93e   : > { %v10395_v47 = vstv %s8612_s17 }
 0x93f   : > { %v3328_v7 = vmul.f32 %v5532_v43, %v10395_v47  ;;  %v3329_v5 = vmul.f32 %v5533_v30, %v10395_v47  ;;  %v3330_v26 = vmul.f32 %v5534_v9, %v10395_v47  ;;  %v3331_v24 = vmul.f32 %v5535_v15, %v10395_v47  ;;  %v5526_v9 = vld [vmem:[%s11445_s5 + $0xd0] sm:$0xff]  ;;  %v5527_v15 = vld [vmem:[%s11445_s5 + $0xd8] sm:$0xff] }
 0x940   : > { %v3332_v58 = vmul.f32 %v5536_v6, %v10395_v47  ;;  %v3333_v59 = vmul.f32 %v5537_v57, %v10395_v47  ;;  %v3334_v60 = vmul.f32 %v5538_v11, %v10395_v47  ;;  %v3335_v45 = vmul.f32 %v5539_v16, %v10395_v47  ;;  %v5528_v57 = vld [vmem:[%s11445_s5 + $0xe0] sm:$0xff] }
 0x941   : > { %v10415_v25 = vadd.f32 %v5516_v23, %v3328_v7  ;;  %v10417_v8 = vadd.f32 %v5517_v48, %v3329_v5  ;;  %v10419_v21 = vadd.f32 %v5518_v3, %v3330_v26  ;;  %v10421_v31 = vadd.f32 %v5519_v29, %v3331_v24  ;;  %v5529_v48 = vld [vmem:[%s11445_s5 + $0xe8] sm:$0xff]  ;;  %v5530_v7 = vld [vmem:[%s11445_s5 + $0xf0] sm:$0xff]  ;;  %v5531_v5 = vld [vmem:[%s11445_s5 + $0xf8] sm:$0xff] }
 0x942   : > { %v10435_v63 = vadd.f32 %v5520_v52, %v3332_v58  ;;  %v10437_v42 = vadd.f32 %v5521_v13, %v3333_v59  ;;  %v3350_v12 = vadd.f32 %v5522_v39, %v3334_v60  ;;  %v3351_v17 = vadd.f32 %v5523_v55, %v3335_v45 }
 0x943   : > { %v3363_v28 = vand.u32 4294901760, %v10415_v25  ;;  %v3366_v19 = vand.u32 4294901760, %v10417_v8  ;;  %v3369_v51 = vand.u32 4294901760, %v10419_v21  ;;  %v3372_v44 = vand.u32 4294901760, %v10421_v31 }
 0x944   : > { %v3375_v33 = vand.u32 4294901760, %v10435_v63  ;;  %v3378_v62 = vand.u32 4294901760, %v10437_v42  ;;  %v3336_v36 = vmul.f32 %v5540_v35, %v10395_v47  ;;  %v3337_v50 = vmul.f32 %v5541_v14, %v10395_v47 }
 0x945   : > { %v10443_v53 = vpack.c.bf16 %v3366_v19, %v3363_v28  ;;  %v10460_v10 = vpack.c.bf16 %v3372_v44, %v3369_v51  ;;  %v3381_v22 = vand.u32 4294901760, %v3350_v12  ;;  %v3384_v0 = vand.u32 4294901760, %v3351_v17 }
 0x946   : > { %v10490_v18 = vpack.c.bf16 %v3378_v62, %v3375_v33  ;;  %v3338_v1 = vmul.f32 %v5542_v27, %v10395_v47  ;;  %v3339_v49 = vmul.f32 %v5543_v40, %v10395_v47  ;;  %v3352_v43 = vadd.f32 %v5524_v4, %v3336_v36 }
 0x947   : > { %8103 = vmatpush3.bf16.msra.mxu1 %v10443_v53  ;;  %v3353_v30 = vadd.f32 %v5525_v38, %v3337_v50  ;;  %v3340_v23 = vmul.f32 %v5544_v20, %v10395_v47  ;;  %v3341_v6 = vmul.f32 %v5545_v61, %v10395_v47  ;;  %v3342_v3 = vmul.f32 %v5546_v41, %v10395_v47 }
 0x948   : > { %8104 = vmatprep.subr.bf16.mxu1 %v11554_v2  ;;  %v3343_v29 = vmul.f32 %v5547_v54, %v10395_v47  ;;  %v10518_v26 = vpack.c.bf16 %v3384_v0, %v3381_v22  ;;  %v3354_v24 = vadd.f32 %v5526_v9, %v3338_v1  ;;  %v3355_v58 = vadd.f32 %v5527_v15, %v3339_v49 }
 0x949   : > { %v3387_v59 = vand.u32 4294901760, %v3352_v43  ;;  %v3390_v11 = vand.u32 4294901760, %v3353_v30  ;;  %v3356_v52 = vadd.f32 %v5528_v57, %v3340_v23  ;;  %v3357_v47 = vadd.f32 %v5529_v48, %v3341_v6 }
 0x94a   : > { %v3358_v13 = vadd.f32 %v5530_v7, %v3342_v3  ;;  %v3359_v16 = vadd.f32 %v5531_v5, %v3343_v29  ;;  %v10522_v60 = vsub.f32 %v10415_v25, %v3363_v28  ;;  %v10525_v39 = vsub.f32 %v10417_v8, %v3366_v19 }
 0x94b   : > { %8106 = vmatpush3.bf16.msra.mxu1 %v10460_v10  ;;  %v3393_v45 = vand.u32 4294901760, %v3354_v24  ;;  %v10528_v55 = vpack.c.bf16 %v3390_v11, %v3387_v59  ;;  %v3396_v35 = vand.u32 4294901760, %v3355_v58  ;;  %v3399_v14 = vand.u32 4294901760, %v3356_v52 }
 0x94c   : > { %8107 = vmatprep.subr.bf16.mxu1 %v11554_v2  ;;  %v3402_v4 = vand.u32 4294901760, %v3357_v47  ;;  %v10531_v36 = vsub.f32 %v10419_v21, %v3369_v51  ;;  %v10534_v50 = vsub.f32 %v10421_v31, %v3372_v44  ;;  %v3405_v27 = vand.u32 4294901760, %v3358_v13 }
 0x94d   : > { %v3408_v25 = vand.u32 4294901760, %v3359_v16  ;;  %v10537_v28 = vsub.f32 %v10435_v63, %v3375_v33  ;;  %v10540_v8 = vsub.f32 %v10437_v42, %v3378_v62  ;;  %v10542_v19 = vsub.f32 %v3350_v12, %v3381_v22 }
 0x94e   : > { %v10544_v40 = vsub.f32 %v3351_v17, %v3384_v0  ;;  %v10547_v38 = vsub.f32 %v3352_v43, %v3387_v59  ;;  %v10549_v21 = vsub.f32 %v3353_v30, %v3390_v11  ;;  %v3456_v31 = vand.u32 4294901760, %v10522_v60 }
 0x94f   : > { %8109 = vmatpush3.bf16.msra.mxu1 %v10490_v18  ;;  %v3463_v63 = vand.u32 4294901760, %v10525_v39  ;;  %v10554_v51 = vpack.c.bf16 %v3396_v35, %v3393_v45  ;;  %v10556_v42 = vsub.f32 %v3354_v24, %v3393_v45  ;;  %v10558_v44 = vsub.f32 %v3355_v58, %v3396_v35 }
 0x950   : > { %8110 = vmatprep.subr.bf16.mxu1 %v11554_v2  ;;  %v10560_v12 = vpack.c.bf16 %v3402_v4, %v3399_v14  ;;  %v10562_v33 = vsub.f32 %v3356_v52, %v3399_v14  ;;  %v10564_v62 = vsub.f32 %v3357_v47, %v3402_v4  ;;  %v10566_v17 = vsub.f32 %v3358_v13, %v3405_v27 }
 0x951   : > { %v10568_v20 = vsub.f32 %v3359_v16, %v3408_v25  ;;  %v3470_v61 = vand.u32 4294901760, %v10531_v36  ;;  %v3477_v22 = vand.u32 4294901760, %v10534_v50  ;;  %v3484_v41 = vand.u32 4294901760, %v10537_v28 }
 0x952   : > { %v3491_v54 = vand.u32 4294901760, %v10540_v8  ;;  %v3457_v0 = vsub.f32 %v10522_v60, %v3456_v31  ;;  %v3464_v1 = vsub.f32 %v10525_v39, %v3463_v63  ;;  %v3498_v49 = vand.u32 4294901760, %v10542_v19 }
 0x953   : > { %8112 = vmatpush3.bf16.msra.mxu1 %v10518_v26  ;;  %v3505_v43 = vand.u32 4294901760, %v10544_v40  ;;  %v3512_v30 = vand.u32 4294901760, %v10547_v38  ;;  %v3519_v9 = vand.u32 4294901760, %v10549_v21  ;;  %v3526_v15 = vand.u32 4294901760, %v10556_v42 }
 0x954   : > { %8113 = vmatprep.subr.bf16.mxu1 %v11554_v2  ;;  %v3533_v23 = vand.u32 4294901760, %v10558_v44  ;;  %v3540_v6 = vand.u32 4294901760, %v10562_v33  ;;  %v3547_v57 = vand.u32 4294901760, %v10564_v62  ;;  %v3554_v48 = vand.u32 4294901760, %v10566_v17 }
 0x955   : > { %v3561_v3 = vand.u32 4294901760, %v10568_v20  ;;  %v10589_v29 = vpack.c.bf16 %v3408_v25, %v3405_v27  ;;  %v3458_v7 = vand.u32 4294901760, %v3457_v0  ;;  %v3465_v5 = vand.u32 4294901760, %v3464_v1 }
 0x956   : > { %v3471_v24 = vsub.f32 %v10531_v36, %v3470_v61  ;;  %v3478_v58 = vsub.f32 %v10534_v50, %v3477_v22  ;;  %v10594_v59 = vpack.c.bf16 %v3463_v63, %v3456_v31  ;;  %v10596_v11 = vpack.c.bf16 %v3477_v22, %v3470_v61 }
 0x957   : > { %8115 = vmatpush3.bf16.msra.mxu1 %v10528_v55  ;;  %v10598_v52 = vpack.c.bf16 %v3491_v54, %v3484_v41  ;;  %v10600_v47 = vpack.c.bf16 %v3505_v43, %v3498_v49  ;;  %v10602_v13 = vpack.c.bf16 %v3519_v9, %v3512_v30  ;;  %v10604_v16 = vpack.c.bf16 %v3533_v23, %v3526_v15 }
 0x958   : > { %8116 = vmatprep.subr.bf16.mxu1 %v11554_v2  ;;  %v10606_v45 = vpack.c.bf16 %v3547_v57, %v3540_v6  ;;  %v10608_v35 = vpack.c.bf16 %v3561_v3, %v3554_v48  ;;  %v3485_v14 = vsub.f32 %v10537_v28, %v3484_v41  ;;  %v8126_v4 = vpack.c.bf16 %v3465_v5, %v3458_v7 }
 0x959   : > { %v3472_v27 = vand.u32 4294901760, %v3471_v24  ;;  %v3479_v25 = vand.u32 4294901760, %v3478_v58  ;;  %v3492_v31 = vsub.f32 %v10540_v8, %v3491_v54  ;;  %v3499_v63 = vsub.f32 %v10542_v19, %v3498_v49 }
 0x95a   : > { %v3506_v61 = vsub.f32 %v10544_v40, %v3505_v43  ;;  %v3486_v0 = vand.u32 4294901760, %v3485_v14  ;;  %v3520_v5 = vsub.f32 %v10549_v21, %v3519_v9  ;;  %v3527_v43 = vsub.f32 %v10556_v42, %v3526_v15 }
 0x95b   : > { %8118 = vmatpush3.bf16.msra.mxu1 %v10554_v51  ;;  %v8129_v22 = vpack.c.bf16 %v3479_v25, %v3472_v27  ;;  %v3493_v41 = vand.u32 4294901760, %v3492_v31  ;;  %v3500_v1 = vand.u32 4294901760, %v3499_v63  ;;  %v3534_v14 = vsub.f32 %v10558_v44, %v3533_v23 }
 0x95c   : > { %8119 = vmatprep.subr.bf16.mxu1 %v11554_v2  ;;  %v3507_v54 = vand.u32 4294901760, %v3506_v61  ;;  %v3521_v58 = vand.u32 4294901760, %v3520_v5  ;;  %v3528_v25 = vand.u32 4294901760, %v3527_v43  ;;  %v3548_v9 = vsub.f32 %v10564_v62, %v3547_v57  ;;  %v5554_v5 = vld [vmem:[%s11441_s1 + $0x128] sm:$0xff] }
 0x95d   : > { %v8132_v7 = vpack.c.bf16 %v3493_v41, %v3486_v0  ;;  %v3555_v31 = vsub.f32 %v10566_v17, %v3554_v48  ;;  %v3562_v23 = vsub.f32 %v10568_v20, %v3561_v3  ;;  %v8150_v48 = vpack.c.bf16 %v10525_v39, %v10522_v60  ;;  %v5549_v3 = vld [vmem:[%s11441_s1 + $0x100] sm:$0xff]  ;;  %v5550_v41 = vld [vmem:[%s11441_s1 + $0x108] sm:$0xff]  ;;  %v5552_v39 = vld [vmem:[%s11441_s1 + $0x118] sm:$0xff] }
 0x95e   : > { %v8135_v24 = vpack.c.bf16 %v3507_v54, %v3500_v1  ;;  %v3549_v15 = vand.u32 4294901760, %v3548_v9  ;;  %v5551_v1 = vld [vmem:[%s11441_s1 + $0x110] sm:$0xff]  ;;  %v4023_v54 = vand.u32 4294901760, %v5549_v3  ;;  %v4026_v60 = vand.u32 4294901760, %v5550_v41  ;;  %v5558_v9 = vld [vmem:[%s11441_s1 + $0x148] sm:$0xff] }
 0x95f   : > { %8121 = vmatpush3.bf16.msra.mxu1 %v10560_v12  ;;  %v3563_v0 = vand.u32 4294901760, %v3562_v23  ;;  %v4038_v43 = vand.u32 4294901760, %v5554_v5 }
 0x960   : > { %8122 = vmatprep.subr.bf16.mxu1 %v11554_v2 }
 0x963   : > { %8124 = vmatpush3.bf16.msra.mxu1 %v10589_v29 }
 0x964   : > { %8125 = vmatprep.subr.bf16.mxu1 %v11554_v2 }
 0x966   : > { %6880 = vmatmul.mubr.f32.vlgmr.msra.gmra.mrb[4].mxu1 %v10255_v37  ;;  %v3513_v37 = vsub.f32 %v10547_v38, %v3512_v30  ;;  %v3535_v30 = vand.u32 4294901760, %v3534_v14  ;;  %v5555_v14 = vld [vmem:[%s11441_s1 + $0x130] sm:$0xff] }
 0x967   : > { %8127 = vmatpush3.bf16.msra.mxu1 %v8126_v4  ;;  %6914 = vmatprep.mubr.msk.f32.mxu1 %vm8749_vm0, %v11581_v46  ;;  %v3541_v4 = vsub.f32 %v10562_v33, %v3540_v6  ;;  %v3556_v6 = vand.u32 4294901760, %v3555_v31  ;;  %v4041_v23 = vand.u32 4294901760, %v5555_v14 }
 0x968   : > { %8128 = vmatprep.subr.bf16.mxu1 %v11554_v2  ;;  %v3514_v49 = vand.u32 4294901760, %v3513_v37  ;;  %v8141_v63 = vpack.c.bf16 %v3535_v30, %v3528_v25  ;;  %v5553_v37 = vld [vmem:[%s11441_s1 + $0x120] sm:$0xff]  ;;  %v10670_v25 = vpack.c.bf16 %v4026_v60, %v4023_v54  ;;  %v10672_v30 = vsub.f32 %v5549_v3, %v4023_v54 }
 0x969   : > { %v3542_v61 = vand.u32 4294901760, %v3541_v4  ;;  %v8147_v57 = vpack.c.bf16 %v3563_v0, %v3556_v6  ;;  %v5556_v4 = vld [vmem:[%s11441_s1 + $0x138] sm:$0xff]  ;;  %v4050_v0 = vand.u32 4294901760, %v5558_v9 }
 0x96a   : > { %v8138_v27 = vpack.c.bf16 %v3521_v58, %v3514_v49  ;;  %v4032_v49 = vand.u32 4294901760, %v5552_v39  ;;  %v4035_v58 = vand.u32 4294901760, %v5553_v37  ;;  %8247 = vmatpush3.bf16.msra.mxu0 %v10670_v25 }
 0x96b   : > { %8130 = vmatpush3.bf16.msra.mxu1 %v8129_v22  ;;  %v8144_v22 = vpack.c.bf16 %v3549_v15, %v3542_v61  ;;  %v10688_v15 = vsub.f32 %v5554_v5, %v4038_v43  ;;  %8248 = vmatprep.subr.bf16.mxu0 %v11554_v2 }
 0x96c   : > { %8131 = vmatprep.subr.bf16.mxu1 %v11554_v2  ;;  %v10685_v61 = vsub.f32 %v5553_v37, %v4035_v58  ;;  %v10703_v54 = vpack.c.bf16 %v4038_v43, %v4035_v58 }
 0x96f   : > { %8133 = vmatpush3.bf16.msra.mxu1 %v8132_v7  ;;  %v4029_v7 = vand.u32 4294901760, %v5551_v1 }
 0x970   : > { %8134 = vmatprep.subr.bf16.mxu1 %v11554_v2 }
 0x971   : > { %v10681_v31 = vpack.c.bf16 %v4032_v49, %v4029_v7 }
 0x973   : > { %8136 = vmatpush3.bf16.msra.mxu1 %v8135_v24  ;;  %v8153_v24 = vpack.c.bf16 %v10534_v50, %v10531_v36  ;;  %v10674_v36 = vsub.f32 %v5550_v41, %v4026_v60  ;;  %v10676_v50 = vsub.f32 %v5551_v1, %v4029_v7  ;;  %v10700_v1 = vsub.f32 %v5558_v9, %v4050_v0 }
 0x974   : > { %8137 = vmatprep.subr.bf16.mxu1 %v11554_v2  ;;  %8250 = vmatpush3.bf16.msra.mxu0 %v10681_v31  ;;  %v8162_v60 = vpack.c.bf16 %v10549_v21, %v10547_v38  ;;  %v8171_v38 = vpack.c.bf16 %v10568_v20, %v10566_v17  ;;  %v5564_v21 = vld [vmem:[%s11441_s1 + $0x178] sm:$0xff] }
 0x975   : > { %8251 = vmatprep.subr.bf16.mxu0 %v11554_v2 }
 0x977   : > { %8139 = vmatpush3.bf16.msra.mxu1 %v8138_v27  ;;  %v5557_v27 = vld [vmem:[%s11441_s1 + $0x140] sm:$0xff] }
 0x978   : > { %8140 = vmatprep.subr.bf16.mxu1 %v11554_v2  ;;  %v4047_v6 = vand.u32 4294901760, %v5557_v27  ;;  %8253 = vmatpush3.bf16.msra.mxu0 %v10703_v54 }
 0x979   : > { %8254 = vmatprep.subr.bf16.mxu0 %v11554_v2 }
 0x97a   : > { %v10698_v41 = vsub.f32 %v5557_v27, %v4047_v6  ;;  %v4151_v27 = vand.u32 4294901760, %v10688_v15 }
 0x97b   : > { %8142 = vmatpush3.bf16.msra.mxu1 %v8141_v63  ;;  %v10683_v63 = vsub.f32 %v5552_v39, %v4032_v49  ;;  %v10717_v39 = vpack.c.bf16 %v4050_v0, %v4047_v6 }
 0x97c   : > { %8143 = vmatprep.subr.bf16.mxu1 %v11554_v2 }
 0x97f   : > { %8145 = vmatpush3.bf16.msra.mxu1 %v8144_v22  ;;  %v4044_v22 = vand.u32 4294901760, %v5556_v4 }
 0x980   : > { %8146 = vmatprep.subr.bf16.mxu1 %v11554_v2 }
 0x981   : > { %v10696_v3 = vsub.f32 %v5556_v4, %v4044_v22  ;;  %v4144_v4 = vand.u32 4294901760, %v10685_v61 }
 0x983   : > { %8148 = vmatpush3.bf16.msra.mxu1 %v8147_v57  ;;  %v8156_v57 = vpack.c.bf16 %v10540_v8, %v10537_v28  ;;  %v8159_v28 = vpack.c.bf16 %v10544_v40, %v10542_v19  ;;  %v10710_v8 = vpack.c.bf16 %v4044_v22, %v4041_v23  ;;  %v8165_v19 = vpack.c.bf16 %v10558_v44, %v10556_v42 }
 0x984   : > { %8149 = vmatprep.subr.bf16.mxu1 %v11554_v2  ;;  %v8168_v40 = vpack.c.bf16 %v10564_v62, %v10562_v33  ;;  %v4068_v44 = vand.u32 4294901760, %v5564_v21  ;;  %v4152_v22 = vsub.f32 %v10688_v15, %v4151_v27 }
 0x985   : > { %8256 = vmatpush3.bf16.msra.mxu0 %v10710_v8 }
 0x986   : > { %6915 = vmatmul.mubr.f32.vlgmr.msra.gmra.mrb[4].mxu1 %v10245_v32  ;;  %8257 = vmatprep.subr.bf16.mxu0 %v11554_v2 }
 0x987   : > { %8151 = vmatpush3.bf16.msra.mxu1 %v8150_v48  ;;  %6949 = vmatprep.mubr.msk.f32.mxu1 %vm8749_vm0, %v11581_v46  ;;  %v10694_v48 = vsub.f32 %v5555_v14, %v4041_v23  ;;  %v4145_v23 = vsub.f32 %v10685_v61, %v4144_v4 }
 0x988   : > { %8152 = vmatprep.subr.bf16.mxu1 %v11554_v2 }
 0x989   : > { %8259 = vmatpush3.bf16.msra.mxu0 %v10717_v39  ;;  %v4146_v6 = vand.u32 4294901760, %v4145_v23  ;;  %v4158_v0 = vand.u32 4294901760, %v10694_v48 }
 0x98a   : > { %8260 = vmatprep.subr.bf16.mxu0 %v11554_v2 }
 0x98b   : > { %8154 = vmatpush3.bf16.msra.mxu1 %v8153_v24 }
 0x98c   : > { %8155 = vmatprep.subr.bf16.mxu1 %v11554_v2 }
 0x98f   : > { %8157 = vmatpush3.bf16.msra.mxu1 %v8156_v57  ;;  %v4165_v57 = vand.u32 4294901760, %v10696_v3 }
 0x990   : > { %8158 = vmatprep.subr.bf16.mxu1 %v11554_v2 }
 0x993   : > { %8160 = vmatpush3.bf16.msra.mxu1 %v8159_v28  ;;  %v4153_v28 = vand.u32 4294901760, %v4152_v22 }
 0x994   : > { %8161 = vmatprep.subr.bf16.mxu1 %v11554_v2 }
 0x997   : > { %8163 = vmatpush3.bf16.msra.mxu1 %v8162_v60  ;;  %v4159_v60 = vsub.f32 %v10694_v48, %v4158_v0 }
 0x998   : > { %8164 = vmatprep.subr.bf16.mxu1 %v11554_v2 }
 0x99b   : > { %8166 = vmatpush3.bf16.msra.mxu1 %v8165_v19  ;;  %v4166_v19 = vsub.f32 %v10696_v3, %v4165_v57 }
 0x99c   : > { %8167 = vmatprep.subr.bf16.mxu1 %v11554_v2 }
 0x99f   : > { %8169 = vmatpush3.bf16.msra.mxu1 %v8168_v40  ;;  %v8276_v40 = vpack.c.bf16 %v4153_v28, %v4146_v6 }
 0x9a0   : > { %8170 = vmatprep.subr.bf16.mxu1 %v11554_v2 }
 0x9a3   : > { %8172 = vmatpush3.bf16.msra.mxu1 %v8171_v38  ;;  %v4160_v38 = vand.u32 4294901760, %v4159_v60 }
 0x9a4   : > { %8173 = vmatprep.subr.bf16.mxu1 %v11554_v2 }
 0x9a6   : > { %6950 = vmatmul.mubr.f32.vlgmr.msra.gmra.mrb[4].mxu1 %v10248_v34  ;;  %v5560_v34 = vld [vmem:[%s11441_s1 + $0x158] sm:$0xff] }
 0x9a7   : > { %8175 = vmatpush3.bf16.msra.mxu1 %v10443_v53  ;;  %6984 = vmatprep.mubr.msk.f32.mxu1 %vm8749_vm0, %v11581_v46 }
 0x9a8   : > { %8176 = vmatprep.subr.bf16.mxu1 %v11554_v2 }
 0x9ab   : > { %8178 = vmatpush3.bf16.msra.mxu1 %v10460_v10 }
 0x9ac   : > { %8179 = vmatprep.subr.bf16.mxu1 %v11554_v2 }
 0x9af   : > { %8181 = vmatpush3.bf16.msra.mxu1 %v10490_v18 }
 0x9b0   : > { %8182 = vmatprep.subr.bf16.mxu1 %v11554_v2 }
 0x9b3   : > { %8184 = vmatpush3.bf16.msra.mxu1 %v10518_v26 }
 0x9b4   : > { %8185 = vmatprep.subr.bf16.mxu1 %v11554_v2 }
 0x9b7   : > { %8187 = vmatpush3.bf16.msra.mxu1 %v10528_v55 }
 0x9b8   : > { %8188 = vmatprep.subr.bf16.mxu1 %v11554_v2 }
 0x9bb   : > { %8190 = vmatpush3.bf16.msra.mxu1 %v10554_v51 }
 0x9bc   : > { %8191 = vmatprep.subr.bf16.mxu1 %v11554_v2 }
 0x9bf   : > { %8193 = vmatpush3.bf16.msra.mxu1 %v10560_v12 }
 0x9c0   : > { %8194 = vmatprep.subr.bf16.mxu1 %v11554_v2 }
 0x9c3   : > { %8196 = vmatpush3.bf16.msra.mxu1 %v10589_v29 }
 0x9c4   : > { %8197 = vmatprep.subr.bf16.mxu1 %v11554_v2 }
 0x9c6   : > { %6985 = vmatmul.mubr.f32.vlgmr.msra.gmra.mrb[4].mxu1 %v10251_v56  ;;  %v5559_v56 = vld [vmem:[%s11441_s1 + $0x150] sm:$0xff] }
 0x9c7   : > { %8199 = vmatpush3.bf16.msra.mxu1 %v10594_v59  ;;  %7019 = vmatprep.mubr.msk.f32.mxu1 %vm8749_vm0, %v11581_v46 }
 0x9c8   : > { %8200 = vmatprep.subr.bf16.mxu1 %v11554_v2 }
 0x9cb   : > { %8202 = vmatpush3.bf16.msra.mxu1 %v10596_v11  ;;  %v10825_v11 = vsub.f32 %v5564_v21, %v4068_v44 }
 0x9cc   : > { %8203 = vmatprep.subr.bf16.mxu1 %v11554_v2 }
 0x9cd   : > { %v11507_v28 = vand.u32 4294901760, %v10825_v11 }
 0x9cf   : > { %8205 = vmatpush3.bf16.msra.mxu1 %v10598_v52  ;;  %v4116_v52 = vand.u32 4294901760, %v10672_v30 }
 0x9d0   : > { %8206 = vmatprep.subr.bf16.mxu1 %v11554_v2 }
 0x9d3   : > { %8208 = vmatpush3.bf16.msra.mxu1 %v10600_v47  ;;  %v4123_v47 = vand.u32 4294901760, %v10674_v36 }
 0x9d4   : > { %8209 = vmatprep.subr.bf16.mxu1 %v11554_v2 }
 0x9d7   : > { %8211 = vmatpush3.bf16.msra.mxu1 %v10602_v13  ;;  %v4117_v13 = vsub.f32 %v10672_v30, %v4116_v52 }
 0x9d8   : > { %8212 = vmatprep.subr.bf16.mxu1 %v11554_v2 }
 0x9d9   : > { %v4118_v37 = vand.u32 4294901760, %v4117_v13 }
 0x9db   : > { %8214 = vmatpush3.bf16.msra.mxu1 %v10604_v16  ;;  %v4124_v16 = vsub.f32 %v10674_v36, %v4123_v47 }
 0x9dc   : > { %8215 = vmatprep.subr.bf16.mxu1 %v11554_v2 }
 0x9dd   : > { %v4125_v5 = vand.u32 4294901760, %v4124_v16 }
 0x9df   : > { %8217 = vmatpush3.bf16.msra.mxu1 %v10606_v45  ;;  %v4130_v45 = vand.u32 4294901760, %v10676_v50  ;;  %v10848_v58 = vpack.c.bf16 %v4125_v5, %v4118_v37 }
 0x9e0   : > { %8218 = vmatprep.subr.bf16.mxu1 %v11554_v2 }
 0x9e1   : > { %v4131_v24 = vsub.f32 %v10676_v50, %v4130_v45 }
 0x9e3   : > { %8220 = vmatpush3.bf16.msra.mxu1 %v10608_v35  ;;  %v4137_v35 = vand.u32 4294901760, %v10683_v63  ;;  %v4132_v43 = vand.u32 4294901760, %v4131_v24 }
 0x9e4   : > { %8221 = vmatprep.subr.bf16.mxu1 %v11554_v2 }
 0x9e5   : > { %v4138_v49 = vsub.f32 %v10683_v63, %v4137_v35 }
 0x9e6   : > { %7020 = vmatmul.mubr.f32.vlgmr.msra.gmra.mrb[4].mxu1 %v10245_v32 }
 0x9e7   : > { %8223 = vmatpush3.bf16.msra.mxu1 %v10443_v53  ;;  %7054 = vmatprep.mubr.msk.f32.mxu1 %vm8749_vm0, %v11581_v46  ;;  %v5561_v53 = vld [vmem:[%s11441_s1 + $0x160] sm:$0xff]  ;;  %v4139_v14 = vand.u32 4294901760, %v4138_v49 }
 0x9e8   : > { %8224 = vmatprep.subr.bf16.mxu1 %v11554_v2 }
 0x9e9   : > { %v8273_v9 = vpack.c.bf16 %v4139_v14, %v4132_v43 }
 0x9eb   : > { %8226 = vmatpush3.bf16.msra.mxu1 %v10460_v10  ;;  %v4053_v10 = vand.u32 4294901760, %v5559_v56 }
 0x9ec   : > { %8227 = vmatprep.subr.bf16.mxu1 %v11554_v2 }
 0x9ed   : > { %v10812_v33 = vsub.f32 %v5559_v56, %v4053_v10  ;;  %v4167_v56 = vand.u32 4294901760, %v4166_v19 }
 0x9ef   : > { %8229 = vmatpush3.bf16.msra.mxu1 %v10490_v18  ;;  %v4056_v18 = vand.u32 4294901760, %v5560_v34  ;;  %v4186_v21 = vand.u32 4294901760, %v10812_v33 }
 0x9f0   : > { %8230 = vmatprep.subr.bf16.mxu1 %v11554_v2 }
 0x9f1   : > { %v10814_v62 = vsub.f32 %v5560_v34, %v4056_v18  ;;  %v4172_v34 = vand.u32 4294901760, %v10698_v41 }
 0x9f3   : > { %8232 = vmatpush3.bf16.msra.mxu1 %v10518_v26  ;;  %v4059_v26 = vand.u32 4294901760, %v5561_v53 }
 0x9f4   : > { %8233 = vmatprep.subr.bf16.mxu1 %v11554_v2 }
 0x9f5   : > { %v10816_v17 = vsub.f32 %v5561_v53, %v4059_v26  ;;  %v4179_v53 = vand.u32 4294901760, %v10700_v1 }
 0x9f7   : > { %8235 = vmatpush3.bf16.msra.mxu1 %v10528_v55  ;;  %v5563_v55 = vld [vmem:[%s11441_s1 + $0x170] sm:$0xff]  ;;  %v4200_v5 = vand.u32 4294901760, %v10816_v17 }
 0x9f8   : > { %8236 = vmatprep.subr.bf16.mxu1 %v11554_v2  ;;  %v4065_v42 = vand.u32 4294901760, %v5563_v55 }
 0x9f9   : > { %v4201_v43 = vsub.f32 %v10816_v17, %v4200_v5 }
 0x9fa   : > { %v10839_v7 = vpack.c.bf16 %v4068_v44, %v4065_v42  ;;  %v4187_v44 = vsub.f32 %v10812_v33, %v4186_v21 }
 0x9fb   : > { %8238 = vmatpush3.bf16.msra.mxu1 %v10554_v51  ;;  %v4202_v23 = vand.u32 4294901760, %v4201_v43 }
 0x9fc   : > { %8239 = vmatprep.subr.bf16.mxu1 %v11554_v2  ;;  %v4188_v16 = vand.u32 4294901760, %v4187_v44  ;;  %v8300_v44 = vpack.c.bf16 %v10688_v15, %v10685_v61 }
 0x9ff   : > { %8241 = vmatpush3.bf16.msra.mxu1 %v10560_v12  ;;  %v10810_v12 = vpack.c.bf16 %v4056_v18, %v4053_v10  ;;  %v8279_v10 = vpack.c.bf16 %v4167_v56, %v4160_v38  ;;  %v4173_v18 = vsub.f32 %v10698_v41, %v4172_v34  ;;  %v4222_v38 = vsub.f32 %v10825_v11, %v11507_v28 }
 0xa00   : > { %8242 = vmatprep.subr.bf16.mxu1 %v11554_v2 }
 0xa01   : > { %8262 = vmatpush3.bf16.msra.mxu0 %v10810_v12 }
 0xa02   : > { %8263 = vmatprep.subr.bf16.mxu0 %v11554_v2 }
 0xa03   : > { %8244 = vmatpush3.bf16.msra.mxu1 %v10589_v29  ;;  %v10820_v29 = vsub.f32 %v5563_v55, %v4065_v42 }
 0xa04   : > { %8389 = vmatprep.subr.bf16.mxu1 %v11554_v2 }
 0xa05   : > { %v11508_v6 = vand.u32 4294901760, %v10820_v29 }
 0xa06   : > { %7055 = vmatmul.mubr.f32.vlgmr.msra.gmra.mrb[4].mxu1 %v10245_v32  ;;  %v5562_v32 = vld [vmem:[%s11441_s1 + $0x168] sm:$0xff] }
 0xa07   : > { %7299 = vmatprep.mubr.msk.f32.mxu1 %vm8749_vm0, %v11581_v46  ;;  %v4062_v51 = vand.u32 4294901760, %v5562_v32  ;;  %v4215_v19 = vsub.f32 %v10820_v29, %v11508_v6 }
 0xa09   : > { %v10818_v20 = vsub.f32 %v5562_v32, %v4062_v51  ;;  %v10823_v59 = vpack.c.bf16 %v4062_v51, %v4059_v26  ;;  %v4180_v32 = vsub.f32 %v10700_v1, %v4179_v53  ;;  %v4174_v26 = vand.u32 4294901760, %v4173_v18 }
 0xa0a   : > { %v4193_v51 = vand.u32 4294901760, %v10814_v62  ;;  %v4216_v56 = vand.u32 4294901760, %v4215_v19  ;;  %v4223_v18 = vand.u32 4294901760, %v4222_v38 }
 0xa0b   : > { %8265 = vmatpush3.bf16.msra.mxu0 %v10823_v59  ;;  %v4181_v55 = vand.u32 4294901760, %v4180_v32  ;;  %v11509_v24 = vand.u32 4294901760, %v10818_v20  ;;  %v8312_v43 = vpack.c.bf16 %v10818_v20, %v10816_v17  ;;  %v11590_v61 = vand.u32 4294901760, %v10818_v20 }
 0xa0c   : > { %8266 = vmatprep.subr.bf16.mxu0 %v11554_v2  ;;  %v4194_v13 = vsub.f32 %v10814_v62, %v4193_v51  ;;  %v8291_v32 = vpack.c.bf16 %v4223_v18, %v4216_v56 }
 0xa0d   : > { %v8282_v42 = vpack.c.bf16 %v4181_v55, %v4174_v26  ;;  %v4208_v14 = vsub.f32 %v10818_v20, %v11509_v24  ;;  %v8294_v26 = vpack.c.bf16 %v10674_v36, %v10672_v30  ;;  %v8297_v55 = vpack.c.bf16 %v10683_v63, %v10676_v50 }
 0xa0e   : > { %v4195_v37 = vand.u32 4294901760, %v4194_v13  ;;  %v8303_v13 = vpack.c.bf16 %v10696_v3, %v10694_v48  ;;  %v8348_v30 = vpack.c.bf16 %v4151_v27, %v4144_v4  ;;  %v8351_v36 = vpack.c.bf16 %v4165_v57, %v4158_v0 }
 0xa0f   : > { %8268 = vmatpush3.bf16.msra.mxu0 %v10839_v7  ;;  %v4209_v22 = vand.u32 4294901760, %v4208_v14  ;;  %v8315_v14 = vpack.c.bf16 %v10825_v11, %v10820_v29  ;;  %v8354_v50 = vpack.c.bf16 %v4179_v53, %v4172_v34  ;;  %v8357_v63 = vpack.c.bf16 %v4193_v51, %v4186_v21  ;;  %v5566_v51 = vld [vmem:[%s11443_s3 + $0x2] sm:$0x1] }
 0xa10   : > { %8269 = vmatprep.subr.bf16.mxu0 %v11554_v2  ;;  %v8285_v49 = vpack.c.bf16 %v4195_v37, %v4188_v16  ;;  %v8306_v16 = vpack.c.bf16 %v10700_v1, %v10698_v41  ;;  %v8309_v37 = vpack.c.bf16 %v10814_v62, %v10812_v33  ;;  %v8360_v15 = vpack.c.bf16 %v11590_v61, %v4200_v5  ;;  %v5571_v61 = vld [vmem:[%s11445_s5 + $0x118] sm:$0xff] }
 0xa11   : > { %v8288_v60 = vpack.c.bf16 %v4209_v22, %v4202_v23  ;;  %v5548_v23 = vld [vmem:[%s11447_s7 + $0x1] sm:$0x1]  ;;  %v11591_v48 = vand.u32 4294901760, %v10820_v29  ;;  %v11592_v3 = vand.u32 4294901760, %v10825_v11 }
 0xa13   : > { %v8363_v41 = vpack.c.bf16 %v11592_v3, %v11591_v48 }
 0xad9   : > { %v3999_v22 = vpop.f32.mrb[4].mxu1 }
 0xada   : > { %v8536_v19 = vadd.f32 %v5548_v23, %v3999_v22  ;;  %v7056_v38 = vpop.f32.mrb[5].mxu1  ;;  %v5584_v23 = vld [vmem:[%s11446_s6 + $0x100] sm:$0xff]  ;;  %v5585_v22 = vld [vmem:[%s11446_s6 + $0x108] sm:$0xff] }
 0xadb   : > { %v5587_v38 = vld [vmem:[%s11446_s6 + $0x118] sm:$0xff] }
 0xadc   : > { %v10919_v56 = vand.u32 4294901760, %v8536_v19 }
 0xade   : > { %v10922_v18 = vsub.f32 %v8536_v19, %v10919_v56  ;;  %v5586_v19 = vld [vmem:[%s11446_s6 + $0x110] sm:$0xff] }
 0xae0   : > { %v10925_v28 = vand.u32 4294901760, %v10922_v18 }
 0xae2   : > { %v4106_v6 = vsub.f32 %v10922_v18, %v10925_v28 }
 0xae4   : > { %v10929_v24 = vand.u32 4294901760, %v4106_v6  ;;  %v5567_v6 = vld [vmem:[%s11444_s4 + $0x2] sm:$0x1] }
 0xae6   : > { %7090 = vmatmul.mubr.f32.vlgmr.msra.gmra.mrb[4].mxu0 %v10929_v24 }
 0xae7   : > { %8271 = vmatpush3.bf16.msra.mxu0 %v10848_v58  ;;  %7124 = vmatprep.mubr.msk.f32.mxu0 %vm8749_vm0, %v11581_v46  ;;  %v8342_v58 = vpack.c.bf16 %v4123_v47, %v4116_v52 }
 0xae8   : > { %8272 = vmatprep.subr.bf16.mxu0 %v11554_v2 }
 0xaeb   : > { %8274 = vmatpush3.bf16.msra.mxu0 %v8273_v9  ;;  %v8345_v9 = vpack.c.bf16 %v4137_v35, %v4130_v45 }
 0xaec   : > { %8275 = vmatprep.subr.bf16.mxu0 %v11554_v2 }
 0xaef   : > { %8277 = vmatpush3.bf16.msra.mxu0 %v8276_v40 }
 0xaf0   : > { %8278 = vmatprep.subr.bf16.mxu0 %v11554_v2 }
 0xaf3   : > { %8280 = vmatpush3.bf16.msra.mxu0 %v8279_v10 }
 0xaf4   : > { %8281 = vmatprep.subr.bf16.mxu0 %v11554_v2 }
 0xaf7   : > { %8283 = vmatpush3.bf16.msra.mxu0 %v8282_v42 }
 0xaf8   : > { %8284 = vmatprep.subr.bf16.mxu0 %v11554_v2 }
 0xafb   : > { %8286 = vmatpush3.bf16.msra.mxu0 %v8285_v49 }
 0xafc   : > { %8287 = vmatprep.subr.bf16.mxu0 %v11554_v2 }
 0xaff   : > { %8289 = vmatpush3.bf16.msra.mxu0 %v8288_v60 }
 0xb00   : > { %8290 = vmatprep.subr.bf16.mxu0 %v11554_v2 }
 0xb03   : > { %8292 = vmatpush3.bf16.msra.mxu0 %v8291_v32 }
 0xb04   : > { %8293 = vmatprep.subr.bf16.mxu0 %v11554_v2 }
 0xb06   : > { %7125 = vmatmul.mubr.f32.vlgmr.msra.gmra.mrb[4].mxu0 %v10919_v56 }
 0xb07   : > { %8295 = vmatpush3.bf16.msra.mxu0 %v8294_v26  ;;  %7159 = vmatprep.mubr.msk.f32.mxu0 %vm8749_vm0, %v11581_v46 }
 0xb08   : > { %8296 = vmatprep.subr.bf16.mxu0 %v11554_v2 }
 0xb0b   : > { %8298 = vmatpush3.bf16.msra.mxu0 %v8297_v55 }
 0xb0c   : > { %8299 = vmatprep.subr.bf16.mxu0 %v11554_v2 }
 0xb0f   : > { %8301 = vmatpush3.bf16.msra.mxu0 %v8300_v44 }
 0xb10   : > { %8302 = vmatprep.subr.bf16.mxu0 %v11554_v2 }
 0xb13   : > { %8304 = vmatpush3.bf16.msra.mxu0 %v8303_v13 }
 0xb14   : > { %8305 = vmatprep.subr.bf16.mxu0 %v11554_v2 }
 0xb17   : > { %8307 = vmatpush3.bf16.msra.mxu0 %v8306_v16 }
 0xb18   : > { %8308 = vmatprep.subr.bf16.mxu0 %v11554_v2 }
 0xb1b   : > { %8310 = vmatpush3.bf16.msra.mxu0 %v8309_v37 }
 0xb1c   : > { %8311 = vmatprep.subr.bf16.mxu0 %v11554_v2 }
 0xb1f   : > { %8313 = vmatpush3.bf16.msra.mxu0 %v8312_v43 }
 0xb20   : > { %8314 = vmatprep.subr.bf16.mxu0 %v11554_v2 }
 0xb23   : > { %8316 = vmatpush3.bf16.msra.mxu0 %v8315_v14 }
 0xb24   : > { %8317 = vmatprep.subr.bf16.mxu0 %v11554_v2 }
 0xb26   : > { %7160 = vmatmul.mubr.f32.vlgmr.msra.gmra.mrb[4].mxu0 %v10922_v18 }
 0xb27   : > { %8319 = vmatpush3.bf16.msra.mxu0 %v10670_v25  ;;  %7194 = vmatprep.mubr.msk.f32.mxu0 %vm8749_vm0, %v11581_v46 }
 0xb28   : > { %8320 = vmatprep.subr.bf16.mxu0 %v11554_v2 }
 0xb2b   : > { %8322 = vmatpush3.bf16.msra.mxu0 %v10681_v31 }
 0xb2c   : > { %8323 = vmatprep.subr.bf16.mxu0 %v11554_v2 }
 0xb2f   : > { %8325 = vmatpush3.bf16.msra.mxu0 %v10703_v54 }
 0xb30   : > { %8326 = vmatprep.subr.bf16.mxu0 %v11554_v2 }
 0xb33   : > { %8328 = vmatpush3.bf16.msra.mxu0 %v10710_v8 }
 0xb34   : > { %8329 = vmatprep.subr.bf16.mxu0 %v11554_v2 }
 0xb37   : > { %8331 = vmatpush3.bf16.msra.mxu0 %v10717_v39 }
 0xb38   : > { %8332 = vmatprep.subr.bf16.mxu0 %v11554_v2 }
 0xb3b   : > { %8334 = vmatpush3.bf16.msra.mxu0 %v10810_v12 }
 0xb3c   : > { %8335 = vmatprep.subr.bf16.mxu0 %v11554_v2 }
 0xb3f   : > { %8337 = vmatpush3.bf16.msra.mxu0 %v10823_v59 }
 0xb40   : > { %8338 = vmatprep.subr.bf16.mxu0 %v11554_v2 }
 0xb43   : > { %8340 = vmatpush3.bf16.msra.mxu0 %v10839_v7 }
 0xb44   : > { %8341 = vmatprep.subr.bf16.mxu0 %v11554_v2 }
 0xb46   : > { %7195 = vmatmul.mubr.f32.vlgmr.msra.gmra.mrb[4].mxu0 %v10925_v28 }
 0xb47   : > { %8343 = vmatpush3.bf16.msra.mxu0 %v8342_v58  ;;  %7229 = vmatprep.mubr.msk.f32.mxu0 %vm8749_vm0, %v11581_v46  ;;  %v5568_v58 = vld [vmem:[%s11445_s5 + $0x100] sm:$0xff] }
 0xb48   : > { %8344 = vmatprep.subr.bf16.mxu0 %v11554_v2 }
 0xb4b   : > { %8346 = vmatpush3.bf16.msra.mxu0 %v8345_v9  ;;  %v5588_v9 = vld [vmem:[%s11446_s6 + $0x120] sm:$0xff] }
 0xb4c   : > { %8347 = vmatprep.subr.bf16.mxu0 %v11554_v2 }
 0xb4f   : > { %8349 = vmatpush3.bf16.msra.mxu0 %v8348_v30  ;;  %v5589_v30 = vld [vmem:[%s11446_s6 + $0x128] sm:$0xff] }
 0xb50   : > { %8350 = vmatprep.subr.bf16.mxu0 %v11554_v2 }
 0xb53   : > { %8352 = vmatpush3.bf16.msra.mxu0 %v8351_v36 }
 0xb54   : > { %8353 = vmatprep.subr.bf16.mxu0 %v11554_v2 }
 0xb57   : > { %8355 = vmatpush3.bf16.msra.mxu0 %v8354_v50  ;;  %v5569_v50 = vld [vmem:[%s11445_s5 + $0x108] sm:$0xff] }
 0xb58   : > { %8356 = vmatprep.subr.bf16.mxu0 %v11554_v2 }
 0xb5b   : > { %8358 = vmatpush3.bf16.msra.mxu0 %v8357_v63  ;;  %v5570_v63 = vld [vmem:[%s11445_s5 + $0x110] sm:$0xff] }
 0xb5c   : > { %8359 = vmatprep.subr.bf16.mxu0 %v11554_v2 }
 0xb5f   : > { %8361 = vmatpush3.bf16.msra.mxu0 %v8360_v15 }
 0xb60   : > { %8362 = vmatprep.subr.bf16.mxu0 %v11554_v2 }
 0xb63   : > { %8364 = vmatpush3.bf16.msra.mxu0 %v8363_v41 }
 0xb64   : > { %8365 = vmatprep.subr.bf16.mxu0 %v11554_v2 }
 0xb66   : > { %7230 = vmatmul.mubr.f32.vlgmr.msra.gmra.mrb[4].mxu0 %v10919_v56 }
 0xb67   : > { %8367 = vmatpush3.bf16.msra.mxu0 %v10670_v25  ;;  %7264 = vmatprep.mubr.msk.f32.mxu0 %vm8749_vm0, %v11581_v46  ;;  %v5565_v25 = vld [vmem:[%s11442_s2 + $0x2] sm:$0x1] }
 0xb68   : > { %8368 = vmatprep.subr.bf16.mxu0 %v11554_v2 }
 0xb6b   : > { %8370 = vmatpush3.bf16.msra.mxu0 %v10681_v31 }
 0xb6c   : > { %8371 = vmatprep.subr.bf16.mxu0 %v11554_v2 }
 0xb6f   : > { %8373 = vmatpush3.bf16.msra.mxu0 %v10703_v54 }
 0xb70   : > { %8374 = vmatprep.subr.bf16.mxu0 %v11554_v2 }
 0xb73   : > { %8376 = vmatpush3.bf16.msra.mxu0 %v10710_v8 }
 0xb74   : > { %8377 = vmatprep.subr.bf16.mxu0 %v11554_v2 }
 0xb77   : > { %8379 = vmatpush3.bf16.msra.mxu0 %v10717_v39 }
 0xb78   : > { %8380 = vmatprep.subr.bf16.mxu0 %v11554_v2 }
 0xb7b   : > { %8382 = vmatpush3.bf16.msra.mxu0 %v10810_v12 }
 0xb7c   : > { %8383 = vmatprep.subr.bf16.mxu0 %v11554_v2 }
 0xb7f   : > { %8385 = vmatpush3.bf16.msra.mxu0 %v10823_v59 }
 0xb80   : > { %8386 = vmatprep.subr.bf16.mxu0 %v11554_v2 }
 0xb83   : > { %8388 = vmatpush3.bf16.msra.mxu0 %v10839_v7 }
 0xb86   : > { %7265 = vmatmul.mubr.f32.vlgmr.msra.gmra.mrb[4].mxu0 %v10919_v56 }
 0xc59   : > { %v4659_v31 = vpop.f32.mrb[4].mxu0 }
 0xc5a   : > { %v8537_v1 = vadd.f32 %v5565_v25, %v4659_v31  ;;  %v7266_v54 = vpop.f32.mrb[5].mxu0 }
 0xc5c   : > { %v4664_v8 = vmul.f32 0.70710677, %v8537_v1  ;;  %v4663_v10 = vmul.f32 0.5, %v8537_v1  ;;  %v5590_v1 = vld [vmem:[%s11446_s6 + $0x130] sm:$0xff] }
 0xc5e   : > { %v4665_v39 = vand.u32 2147483647, %v4664_v8  ;;  %vm4685_vm6 = vcmp.ge.f32.partialorder %v4664_v8, 0.0 }
 0xc60   : > { %v4666_v12 = vmul.f32 0.3275911, %v4665_v39  ;;  %v4679_v62 = vmul.f32 %v4665_v39, %v4665_v39 }
 0xc62   : > { %v4667_v33 = vadd.f32 1.0, %v4666_v12  ;;  %v4680_v20 = vsub.f32 0.0, %v4679_v62  ;;  %v5573_v62 = vld [vmem:[%s11445_s5 + $0x128] sm:$0xff] }
 0xc64   : > { %8674 = vrcp.f32 %v4667_v33  ;;  %v4681_v11 = vmul.f32 1.442695, %v4680_v20  ;;  %v5572_v33 = vld [vmem:[%s11445_s5 + $0x120] sm:$0xff] }
 0xc66   : > { %8676 = vpow2.f32 %v4681_v11 }
 0xc6e   : > { %v8675_v17 = vpop.eup %8674 }
 0xc6f   : > { %v4670_v29 = vmul.f32 1.0614054, %v8675_v17 }
 0xc70   : > { %v8677_v0 = vpop.eup %8676 }
 0xc71   : > { %v4671_v59 = vadd.f32 -1.4531521, %v4670_v29 }
 0xc73   : > { %v4672_v52 = vmul.f32 %v8675_v17, %v4671_v59 }
 0xc75   : > { %v4673_v47 = vadd.f32 1.4214138, %v4672_v52 }
 0xc77   : > { %v4674_v45 = vmul.f32 %v8675_v17, %v4673_v47  ;;  %v5574_v47 = vld [vmem:[%s11445_s5 + $0x130] sm:$0xff] }
 0xc79   : > { %v4675_v35 = vadd.f32 -0.28449672, %v4674_v45 }
 0xc7b   : > { %v4676_v7 = vmul.f32 %v8675_v17, %v4675_v35 }
 0xc7d   : > { %v4677_v4 = vadd.f32 0.2548296, %v4676_v7 }
 0xc7f   : > { %v4678_v27 = vmul.f32 %v8675_v17, %v4677_v4  ;;  %v5591_v17 = vld [vmem:[%s11446_s6 + $0x138] sm:$0xff] }
 0xc81   : > { %v4683_v57 = vmul.f32 %v8677_v0, %v4678_v27  ;;  %v5575_v27 = vld [vmem:[%s11445_s5 + $0x138] sm:$0xff]  ;;  %v5592_v0 = vld [vmem:[%s11446_s6 + $0x140] sm:$0xff] }
 0xc83   : > { %v4684_v40 = vsub.f32 1.0, %v4683_v57  ;;  %v5593_v57 = vld [vmem:[%s11446_s6 + $0x148] sm:$0xff] }
 0xc85   : > { %v4686_v34 = vsub.f32 0.0, %v4684_v40 }
 0xc87   : > { %v4687_v53 = vsel %vm4685_vm6, %v4684_v40, %v4686_v34 }
 0xc88   : > { %v4688_v21 = vadd.f32 1.0, %v4687_v53 }
 0xc8a   : > { %v4689_v42 = vmul.f32 %v4688_v21, %v4663_v10 }
 0xc8c   : > { %v4692_v5 = vmul.f32 %v5566_v51, %v4689_v42  ;;  %v5576_v51 = vld [vmem:[%s11445_s5 + $0x140] sm:$0xff] }
 0xc8e   : > { %v4693_v49 = vsel %vm1858_vm2, %v4692_v5, 0.0 }
 0xc8f   : > { %4694 = vadd.xlane.f32.xlu1 %v4693_v49  ;;  %v5594_v49 = vld [vmem:[%s11446_s6 + $0x150] sm:$0xff] }
 0xd1c   : > { %v4695_v60 = vpop.xlane.xlu1 %4694 }
 0xd1d   : > { %v4698_v32 = vadd.f32 %v5567_v6, %v4695_v60  ;;  %v5595_v6 = vld [vmem:[%s11446_s6 + $0x158] sm:$0xff]  ;;  %v5577_v60 = vld [vmem:[%s11445_s5 + $0x148] sm:$0xff] }
 0xd1f   : > { %v4699_v26 = vand.u32 2147483647, %v4698_v32  ;;  %vm4706_vm7 = vcmp.ge.f32.partialorder %v4698_v32, 0.0  ;;  %v5596_v32 = vld [vmem:[%s11446_s6 + $0x160] sm:$0xff] }
 0xd21   : > { %v4700_v55 = vsub.f32 0.0, %v4699_v26  ;;  %v5597_v26 = vld [vmem:[%s11446_s6 + $0x168] sm:$0xff] }
 0xd23   : > { %v4701_v44 = vmul.f32 1.442695, %v4700_v55 }
 0xd25   : > { %8678 = vpow2.f32 %v4701_v44  ;;  %v5598_v44 = vld [vmem:[%s11446_s6 + $0x170] sm:$0xff] }
 0xd2f   : > { %v8679_v13 = vpop.eup %8678 }
 0xd30   : > { %v4703_v16 = vadd.f32 1.0, %v8679_v13  ;;  %v5599_v13 = vld [vmem:[%s11446_s6 + $0x178] sm:$0xff] }
 0xd32   : > { %8680 = vrcp.f32 %v4703_v16 }
 0xd3c   : > { %v8681_v37 = vpop.eup %8680 }
 0xd3d   : > { %v4707_v43 = vsub.f32 1.0, %v8681_v37 }
 0xd3f   : > { %v4708_v14 = vsel %vm4706_vm7, %v8681_v37, %v4707_v43 }
 0xd40   : > { %8613 = vpush %v4708_v14 }
 0xd71   : > { %s8614_s18 = spop %8613 }
 0xd72   : > { %v11066_v36 = vstv %s8614_s18  ;;  %s11398_s18 = scalar_lea.hbm %s11448_s8, %s5601_s26 }
 0xd73   : > { %v4747_v15 = vmul.f32 %v5584_v23, %v11066_v36  ;;  %v4748_v48 = vmul.f32 %v5585_v22, %v11066_v36  ;;  %v4749_v3 = vmul.f32 %v5586_v19, %v11066_v36  ;;  %v4750_v41 = vmul.f32 %v5587_v38, %v11066_v36  ;;  %v5578_v19 = vld [vmem:[%s11445_s5 + $0x150] sm:$0xff]  ;;  %v5579_v38 = vld [vmem:[%s11445_s5 + $0x158] sm:$0xff] }
 0xd74   : > { %v4751_v25 = vmul.f32 %v5588_v9, %v11066_v36  ;;  %v4752_v31 = vmul.f32 %v5589_v30, %v11066_v36  ;;  %v4753_v59 = vmul.f32 %v5590_v1, %v11066_v36  ;;  %v4754_v45 = vmul.f32 %v5591_v17, %v11066_v36  ;;  %v5580_v30 = vld [vmem:[%s11445_s5 + $0x160] sm:$0xff] }
 0xd75   : > { %v11086_v54 = vadd.f32 %v5568_v58, %v4747_v15  ;;  %v11088_v8 = vadd.f32 %v5569_v50, %v4748_v48  ;;  %v11090_v39 = vadd.f32 %v5570_v63, %v4749_v3  ;;  %v11092_v12 = vadd.f32 %v5571_v61, %v4750_v41  ;;  %v5581_v50 = vld [vmem:[%s11445_s5 + $0x168] sm:$0xff]  ;;  %v5582_v15 = vld [vmem:[%s11445_s5 + $0x170] sm:$0xff]  ;;  %v5583_v48 = vld [vmem:[%s11445_s5 + $0x178] sm:$0xff] }
 0xd76   : > { %v11106_v11 = vadd.f32 %v5572_v33, %v4751_v25  ;;  %v11108_v52 = vadd.f32 %v5573_v62, %v4752_v31  ;;  %v4769_v40 = vadd.f32 %v5574_v47, %v4753_v59  ;;  %v4770_v10 = vadd.f32 %v5575_v27, %v4754_v45 }
 0xd77   : > { %v4782_v20 = vand.u32 4294901760, %v11086_v54  ;;  %v4785_v29 = vand.u32 4294901760, %v11088_v8  ;;  %v4788_v7 = vand.u32 4294901760, %v11090_v39  ;;  %v4791_v4 = vand.u32 4294901760, %v11092_v12 }
 0xd78   : > { %v4794_v34 = vand.u32 4294901760, %v11106_v11  ;;  %v4797_v53 = vand.u32 4294901760, %v11108_v52  ;;  %v4755_v42 = vmul.f32 %v5592_v0, %v11066_v36  ;;  %v4756_v5 = vmul.f32 %v5593_v57, %v11066_v36 }
 0xd79   : > { %v11114_v35 = vpack.c.bf16 %v4785_v29, %v4782_v20  ;;  %v11131_v21 = vpack.c.bf16 %v4791_v4, %v4788_v7  ;;  %v4800_v55 = vand.u32 4294901760, %v4769_v40  ;;  %v4803_v37 = vand.u32 4294901760, %v4770_v10 }
 0xd7a   : > { %v11161_v16 = vpack.c.bf16 %v4797_v53, %v4794_v34  ;;  %v4757_v43 = vmul.f32 %v5594_v49, %v11066_v36  ;;  %v4758_v14 = vmul.f32 %v5595_v6, %v11066_v36  ;;  %v4771_v23 = vadd.f32 %v5576_v51, %v4755_v42 }
 0xd7b   : > { %8391 = vmatpush3.bf16.msra.mxu1 %v11114_v35  ;;  %v4772_v22 = vadd.f32 %v5577_v60, %v4756_v5  ;;  %v4759_v58 = vmul.f32 %v5596_v32, %v11066_v36  ;;  %v4760_v9 = vmul.f32 %v5597_v26, %v11066_v36  ;;  %v4761_v63 = vmul.f32 %v5598_v44, %v11066_v36 }
 0xd7c   : > { %8392 = vmatprep.subr.bf16.mxu1 %v11554_v2  ;;  %v4762_v61 = vmul.f32 %v5599_v13, %v11066_v36  ;;  %v11189_v3 = vpack.c.bf16 %v4803_v37, %v4800_v55  ;;  %v4773_v41 = vadd.f32 %v5578_v19, %v4757_v43  ;;  %v4774_v25 = vadd.f32 %v5579_v38, %v4758_v14 }
 0xd7d   : > { %v4806_v31 = vand.u32 4294901760, %v4771_v23  ;;  %v4809_v1 = vand.u32 4294901760, %v4772_v22  ;;  %v4775_v33 = vadd.f32 %v5580_v30, %v4759_v58  ;;  %v4776_v36 = vadd.f32 %v5581_v50, %v4760_v9 }
 0xd7e   : > { %v4777_v62 = vadd.f32 %v5582_v15, %v4761_v63  ;;  %v4778_v17 = vadd.f32 %v5583_v48, %v4762_v61  ;;  %v11193_v59 = vsub.f32 %v11086_v54, %v4782_v20  ;;  %v11196_v47 = vsub.f32 %v11088_v8, %v4785_v29 }
 0xd7f   : > { %8394 = vmatpush3.bf16.msra.mxu1 %v11131_v21  ;;  %v4812_v45 = vand.u32 4294901760, %v4773_v41  ;;  %v11199_v27 = vpack.c.bf16 %v4809_v1, %v4806_v31  ;;  %v4815_v0 = vand.u32 4294901760, %v4774_v25  ;;  %v4818_v57 = vand.u32 4294901760, %v4775_v33 }
 0xd80   : > { %8395 = vmatprep.subr.bf16.mxu1 %v11554_v2  ;;  %v4821_v51 = vand.u32 4294901760, %v4776_v36  ;;  %v11202_v42 = vsub.f32 %v11090_v39, %v4788_v7  ;;  %v11205_v5 = vsub.f32 %v11092_v12, %v4791_v4  ;;  %v4824_v49 = vand.u32 4294901760, %v4777_v62 }
 0xd81   : > { %v4827_v54 = vand.u32 4294901760, %v4778_v17  ;;  %v11208_v20 = vsub.f32 %v11106_v11, %v4794_v34  ;;  %v11211_v8 = vsub.f32 %v11108_v52, %v4797_v53  ;;  %v11213_v29 = vsub.f32 %v4769_v40, %v4800_v55 }
 0xd82   : > { %v11215_v6 = vsub.f32 %v4770_v10, %v4803_v37  ;;  %v11218_v60 = vsub.f32 %v4771_v23, %v4806_v31  ;;  %v11220_v39 = vsub.f32 %v4772_v22, %v4809_v1  ;;  %v4875_v12 = vand.u32 4294901760, %v11193_v59 }
 0xd83   : > { %8397 = vmatpush3.bf16.msra.mxu1 %v11161_v16  ;;  %v4882_v11 = vand.u32 4294901760, %v11196_v47  ;;  %v11225_v7 = vpack.c.bf16 %v4815_v0, %v4812_v45  ;;  %v11227_v52 = vsub.f32 %v4773_v41, %v4812_v45  ;;  %v11229_v4 = vsub.f32 %v4774_v25, %v4815_v0 }
 0xd84   : > { %8398 = vmatprep.subr.bf16.mxu1 %v11554_v2  ;;  %v11231_v40 = vpack.c.bf16 %v4821_v51, %v4818_v57  ;;  %v11233_v34 = vsub.f32 %v4775_v33, %v4818_v57  ;;  %v11235_v53 = vsub.f32 %v4776_v36, %v4821_v51  ;;  %v11237_v10 = vsub.f32 %v4777_v62, %v4824_v49 }
 0xd85   : > { %v11239_v32 = vsub.f32 %v4778_v17, %v4827_v54  ;;  %v4889_v26 = vand.u32 4294901760, %v11202_v42  ;;  %v4896_v55 = vand.u32 4294901760, %v11205_v5  ;;  %v4903_v44 = vand.u32 4294901760, %v11208_v20 }
 0xd86   : > { %v4910_v13 = vand.u32 4294901760, %v11211_v8  ;;  %v4876_v37 = vsub.f32 %v11193_v59, %v4875_v12  ;;  %v4883_v43 = vsub.f32 %v11196_v47, %v4882_v11  ;;  %v4917_v14 = vand.u32 4294901760, %v11213_v29 }
 0xd87   : > { %8400 = vmatpush3.bf16.msra.mxu1 %v11189_v3  ;;  %v4924_v23 = vand.u32 4294901760, %v11215_v6  ;;  %v4931_v22 = vand.u32 4294901760, %v11218_v60  ;;  %v4938_v19 = vand.u32 4294901760, %v11220_v39  ;;  %v4945_v38 = vand.u32 4294901760, %v11227_v52 }
 0xd88   : > { %8401 = vmatprep.subr.bf16.mxu1 %v11554_v2  ;;  %v4952_v58 = vand.u32 4294901760, %v11229_v4  ;;  %v4959_v9 = vand.u32 4294901760, %v11233_v34  ;;  %v4966_v30 = vand.u32 4294901760, %v11235_v53  ;;  %v4973_v50 = vand.u32 4294901760, %v11237_v10 }
 0xd89   : > { %v4980_v63 = vand.u32 4294901760, %v11239_v32  ;;  %v11260_v61 = vpack.c.bf16 %v4827_v54, %v4824_v49  ;;  %v4877_v15 = vand.u32 4294901760, %v4876_v37  ;;  %v4884_v48 = vand.u32 4294901760, %v4883_v43 }
 0xd8a   : > { %v4890_v41 = vsub.f32 %v11202_v42, %v4889_v26  ;;  %v4897_v25 = vsub.f32 %v11205_v5, %v4896_v55  ;;  %v11265_v31 = vpack.c.bf16 %v4882_v11, %v4875_v12  ;;  %v11267_v1 = vpack.c.bf16 %v4896_v55, %v4889_v26 }
 0xd8b   : > { %8403 = vmatpush3.bf16.msra.mxu1 %v11199_v27  ;;  %v11269_v33 = vpack.c.bf16 %v4910_v13, %v4903_v44  ;;  %v11271_v36 = vpack.c.bf16 %v4924_v23, %v4917_v14  ;;  %v11273_v62 = vpack.c.bf16 %v4938_v19, %v4931_v22  ;;  %v11275_v17 = vpack.c.bf16 %v4952_v58, %v4945_v38 }
 0xd8c   : > { %8404 = vmatprep.subr.bf16.mxu1 %v11554_v2  ;;  %v11277_v45 = vpack.c.bf16 %v4966_v30, %v4959_v9  ;;  %v11279_v0 = vpack.c.bf16 %v4980_v63, %v4973_v50  ;;  %v4904_v57 = vsub.f32 %v11208_v20, %v4903_v44  ;;  %v8414_v51 = vpack.c.bf16 %v4884_v48, %v4877_v15 }
 0xd8d   : > { %v4891_v49 = vand.u32 4294901760, %v4890_v41  ;;  %v4898_v54 = vand.u32 4294901760, %v4897_v25  ;;  %v4911_v12 = vsub.f32 %v11211_v8, %v4910_v13  ;;  %v4918_v11 = vsub.f32 %v11213_v29, %v4917_v14 }
 0xd8e   : > { %v4925_v26 = vsub.f32 %v11215_v6, %v4924_v23  ;;  %v4905_v37 = vand.u32 4294901760, %v4904_v57  ;;  %v4939_v48 = vsub.f32 %v11220_v39, %v4938_v19  ;;  %v4946_v23 = vsub.f32 %v11227_v52, %v4945_v38 }
 0xd8f   : > { %8406 = vmatpush3.bf16.msra.mxu1 %v11225_v7  ;;  %v8417_v55 = vpack.c.bf16 %v4898_v54, %v4891_v49  ;;  %v4912_v44 = vand.u32 4294901760, %v4911_v12  ;;  %v4919_v43 = vand.u32 4294901760, %v4918_v11  ;;  %v4953_v57 = vsub.f32 %v11229_v4, %v4952_v58 }
 0xd90   : > { %8407 = vmatprep.subr.bf16.mxu1 %v11554_v2  ;;  %v4926_v13 = vand.u32 4294901760, %v4925_v26  ;;  %v4940_v25 = vand.u32 4294901760, %v4939_v48  ;;  %v4947_v54 = vand.u32 4294901760, %v4946_v23  ;;  %v4967_v19 = vsub.f32 %v11235_v53, %v4966_v30 }
 0xd91   : > { %v8420_v15 = vpack.c.bf16 %v4912_v44, %v4905_v37  ;;  %v4974_v12 = vsub.f32 %v11237_v10, %v4973_v50  ;;  %v4981_v58 = vsub.f32 %v11239_v32, %v4980_v63  ;;  %v8438_v50 = vpack.c.bf16 %v11196_v47, %v11193_v59 }
 0xd92   : > { %v8423_v41 = vpack.c.bf16 %v4926_v13, %v4919_v43  ;;  %v4968_v38 = vand.u32 4294901760, %v4967_v19  ;;  %v8441_v63 = vpack.c.bf16 %v11205_v5, %v11202_v42  ;;  %v8444_v44 = vpack.c.bf16 %v11211_v8, %v11208_v20 }
 0xd93   : > { %8409 = vmatpush3.bf16.msra.mxu1 %v11231_v40  ;;  %v4982_v37 = vand.u32 4294901760, %v4981_v58  ;;  %v8447_v59 = vpack.c.bf16 %v11215_v6, %v11213_v29  ;;  %v8450_v47 = vpack.c.bf16 %v11220_v39, %v11218_v60  ;;  %v8453_v42 = vpack.c.bf16 %v11229_v4, %v11227_v52 }
 0xd94   : > { %8410 = vmatprep.subr.bf16.mxu1 %v11554_v2  ;;  %v8456_v5 = vpack.c.bf16 %v11235_v53, %v11233_v34  ;;  %v8459_v20 = vpack.c.bf16 %v11239_v32, %v11237_v10 }
 0xd97   : > { %8412 = vmatpush3.bf16.msra.mxu1 %v11260_v61 }
 0xd98   : > { %8413 = vmatprep.subr.bf16.mxu1 %v11554_v2 }
 0xd9a   : > { %7300 = vmatmul.mubr.f32.vlgmr.msra.gmra.mrb[6].mxu1 %v10929_v24  ;;  %v4932_v24 = vsub.f32 %v11218_v60, %v4931_v22  ;;  %v4954_v22 = vand.u32 4294901760, %v4953_v57 }
 0xd9b   : > { %8415 = vmatpush3.bf16.msra.mxu1 %v8414_v51  ;;  %7334 = vmatprep.mubr.msk.f32.mxu1 %vm8749_vm0, %v11581_v46  ;;  %v4960_v51 = vsub.f32 %v11233_v34, %v4959_v9  ;;  %v4975_v9 = vand.u32 4294901760, %v4974_v12 }
 0xd9c   : > { %8416 = vmatprep.subr.bf16.mxu1 %v11554_v2  ;;  %v4933_v14 = vand.u32 4294901760, %v4932_v24  ;;  %v8429_v11 = vpack.c.bf16 %v4954_v22, %v4947_v54 }
 0xd9d   : > { %v4961_v26 = vand.u32 4294901760, %v4960_v51  ;;  %v8435_v30 = vpack.c.bf16 %v4982_v37, %v4975_v9 }
 0xd9e   : > { %v8426_v49 = vpack.c.bf16 %v4940_v25, %v4933_v14 }
 0xd9f   : > { %8418 = vmatpush3.bf16.msra.mxu1 %v8417_v55  ;;  %v8432_v55 = vpack.c.bf16 %v4968_v38, %v4961_v26 }
 0xda0   : > { %8419 = vmatprep.subr.bf16.mxu1 %v11554_v2 }
 0xda3   : > { %8421 = vmatpush3.bf16.msra.mxu1 %v8420_v15 }
 0xda4   : > { %8422 = vmatprep.subr.bf16.mxu1 %v11554_v2 }
 0xda7   : > { %8424 = vmatpush3.bf16.msra.mxu1 %v8423_v41 }
 0xda8   : > { %8425 = vmatprep.subr.bf16.mxu1 %v11554_v2 }
 0xdab   : > { %8427 = vmatpush3.bf16.msra.mxu1 %v8426_v49 }
 0xdac   : > { %8428 = vmatprep.subr.bf16.mxu1 %v11554_v2 }
 0xdaf   : > { %8430 = vmatpush3.bf16.msra.mxu1 %v8429_v11 }
 0xdb0   : > { %8431 = vmatprep.subr.bf16.mxu1 %v11554_v2 }
 0xdb3   : > { %8433 = vmatpush3.bf16.msra.mxu1 %v8432_v55 }
 0xdb4   : > { %8434 = vmatprep.subr.bf16.mxu1 %v11554_v2 }
 0xdb7   : > { %8436 = vmatpush3.bf16.msra.mxu1 %v8435_v30 }
 0xdb8   : > { %8437 = vmatprep.subr.bf16.mxu1 %v11554_v2 }
 0xdba   : > { %7335 = vmatmul.mubr.f32.vlgmr.msra.gmra.mrb[6].mxu1 %v10919_v56 }
 0xdbb   : > { %8439 = vmatpush3.bf16.msra.mxu1 %v8438_v50  ;;  %7369 = vmatprep.mubr.msk.f32.mxu1 %vm8749_vm0, %v11581_v46 }
 0xdbc   : > { %8440 = vmatprep.subr.bf16.mxu1 %v11554_v2 }
 0xdbf   : > { %8442 = vmatpush3.bf16.msra.mxu1 %v8441_v63 }
 0xdc0   : > { %8443 = vmatprep.subr.bf16.mxu1 %v11554_v2 }
 0xdc3   : > { %8445 = vmatpush3.bf16.msra.mxu1 %v8444_v44 }
 0xdc4   : > { %8446 = vmatprep.subr.bf16.mxu1 %v11554_v2 }
 0xdc7   : > { %8448 = vmatpush3.bf16.msra.mxu1 %v8447_v59 }
 0xdc8   : > { %8449 = vmatprep.subr.bf16.mxu1 %v11554_v2 }
 0xdcb   : > { %8451 = vmatpush3.bf16.msra.mxu1 %v8450_v47 }
 0xdcc   : > { %8452 = vmatprep.subr.bf16.mxu1 %v11554_v2 }
 0xdcf   : > { %8454 = vmatpush3.bf16.msra.mxu1 %v8453_v42 }
 0xdd0   : > { %8455 = vmatprep.subr.bf16.mxu1 %v11554_v2 }
 0xdd3   : > { %8457 = vmatpush3.bf16.msra.mxu1 %v8456_v5 }
 0xdd4   : > { %8458 = vmatprep.subr.bf16.mxu1 %v11554_v2 }
 0xdd7   : > { %8460 = vmatpush3.bf16.msra.mxu1 %v8459_v20 }
 0xdd8   : > { %8461 = vmatprep.subr.bf16.mxu1 %v11554_v2 }
 0xdda   : > { %7370 = vmatmul.mubr.f32.vlgmr.msra.gmra.mrb[6].mxu1 %v10922_v18 }
 0xddb   : > { %8463 = vmatpush3.bf16.msra.mxu1 %v11114_v35  ;;  %7404 = vmatprep.mubr.msk.f32.mxu1 %vm8749_vm0, %v11581_v46 }
 0xddc   : > { %8464 = vmatprep.subr.bf16.mxu1 %v11554_v2 }
 0xddf   : > { %8466 = vmatpush3.bf16.msra.mxu1 %v11131_v21 }
 0xde0   : > { %8467 = vmatprep.subr.bf16.mxu1 %v11554_v2 }
 0xde3   : > { %8469 = vmatpush3.bf16.msra.mxu1 %v11161_v16 }
 0xde4   : > { %8470 = vmatprep.subr.bf16.mxu1 %v11554_v2 }
 0xde7   : > { %8472 = vmatpush3.bf16.msra.mxu1 %v11189_v3 }
 0xde8   : > { %8473 = vmatprep.subr.bf16.mxu1 %v11554_v2 }
 0xdeb   : > { %8475 = vmatpush3.bf16.msra.mxu1 %v11199_v27 }
 0xdec   : > { %8476 = vmatprep.subr.bf16.mxu1 %v11554_v2 }
 0xdef   : > { %8478 = vmatpush3.bf16.msra.mxu1 %v11225_v7 }
 0xdf0   : > { %8479 = vmatprep.subr.bf16.mxu1 %v11554_v2 }
 0xdf3   : > { %8481 = vmatpush3.bf16.msra.mxu1 %v11231_v40 }
 0xdf4   : > { %8482 = vmatprep.subr.bf16.mxu1 %v11554_v2 }
 0xdf7   : > { %8484 = vmatpush3.bf16.msra.mxu1 %v11260_v61 }
 0xdf8   : > { %8485 = vmatprep.subr.bf16.mxu1 %v11554_v2 }
 0xdfa   : > { %7405 = vmatmul.mubr.f32.vlgmr.msra.gmra.mrb[6].mxu1 %v10925_v28 }
 0xdfb   : > { %8487 = vmatpush3.bf16.msra.mxu1 %v11265_v31  ;;  %7439 = vmatprep.mubr.msk.f32.mxu1 %vm8749_vm0, %v11581_v46 }
 0xdfc   : > { %8488 = vmatprep.subr.bf16.mxu1 %v11554_v2 }
 0xdff   : > { %8490 = vmatpush3.bf16.msra.mxu1 %v11267_v1 }
 0xe00   : > { %8491 = vmatprep.subr.bf16.mxu1 %v11554_v2 }
 0xe03   : > { %8493 = vmatpush3.bf16.msra.mxu1 %v11269_v33 }
 0xe04   : > { %8494 = vmatprep.subr.bf16.mxu1 %v11554_v2 }
 0xe07   : > { %8496 = vmatpush3.bf16.msra.mxu1 %v11271_v36 }
 0xe08   : > { %8497 = vmatprep.subr.bf16.mxu1 %v11554_v2 }
 0xe0b   : > { %8499 = vmatpush3.bf16.msra.mxu1 %v11273_v62 }
 0xe0c   : > { %8500 = vmatprep.subr.bf16.mxu1 %v11554_v2 }
 0xe0f   : > { %8502 = vmatpush3.bf16.msra.mxu1 %v11275_v17 }
 0xe10   : > { %8503 = vmatprep.subr.bf16.mxu1 %v11554_v2 }
 0xe13   : > { %8505 = vmatpush3.bf16.msra.mxu1 %v11277_v45 }
 0xe14   : > { %8506 = vmatprep.subr.bf16.mxu1 %v11554_v2 }
 0xe17   : > { %8508 = vmatpush3.bf16.msra.mxu1 %v11279_v0 }
 0xe18   : > { %8509 = vmatprep.subr.bf16.mxu1 %v11554_v2 }
 0xe1a   : > { %7440 = vmatmul.mubr.f32.vlgmr.msra.gmra.mrb[6].mxu1 %v10919_v56 }
 0xe1b   : > { %8511 = vmatpush3.bf16.msra.mxu1 %v11114_v35  ;;  %7474 = vmatprep.mubr.msk.f32.mxu1 %vm8749_vm0, %v11581_v46  ;;  %v5600_v46 = vld [vmem:[%s11447_s7 + $0x2] sm:$0x1] }
 0xe1c   : > { %8512 = vmatprep.subr.bf16.mxu1 %v11554_v2 }
 0xe1f   : > { %8514 = vmatpush3.bf16.msra.mxu1 %v11131_v21 }
 0xe20   : > { %8515 = vmatprep.subr.bf16.mxu1 %v11554_v2 }
 0xe23   : > { %8517 = vmatpush3.bf16.msra.mxu1 %v11161_v16 }
 0xe24   : > { %8518 = vmatprep.subr.bf16.mxu1 %v11554_v2 }
 0xe27   : > { %8520 = vmatpush3.bf16.msra.mxu1 %v11189_v3 }
 0xe28   : > { %8521 = vmatprep.subr.bf16.mxu1 %v11554_v2 }
 0xe2b   : > { %8523 = vmatpush3.bf16.msra.mxu1 %v11199_v27 }
 0xe2c   : > { %8524 = vmatprep.subr.bf16.mxu1 %v11554_v2 }
 0xe2f   : > { %8526 = vmatpush3.bf16.msra.mxu1 %v11225_v7 }
 0xe30   : > { %8527 = vmatprep.subr.bf16.mxu1 %v11554_v2 }
 0xe33   : > { %8529 = vmatpush3.bf16.msra.mxu1 %v11231_v40 }
 0xe34   : > { %8530 = vmatprep.subr.bf16.mxu1 %v11554_v2 }
 0xe37   : > { %8532 = vmatpush3.bf16.msra.mxu1 %v11260_v61 }
 0xe3a   : > { %7475 = vmatmul.mubr.f32.vlgmr.msra.gmra.mrb[6].mxu1 %v10919_v56 }
 0xf0d   : > { %v5418_v28 = vpop.f32.mrb[6].mxu1 }
 0xf0e   : > { %v8538_v18 = vadd.f32 %v5600_v46, %v5418_v28  ;;  %v7476_v35 = vpop.f32.mrb[7].mxu1 }
 0xf10   : > { %5422 = vst [vmem:[%s297_s10] sm:$0x1] %v8538_v18 }
 0xf11   : > { %8695 = shalt.err (!%p8692_p3)
}
 0xf12   : > { %s8696_s23 = scalar_lea.hbm %s11398_s18, 16  ;;  %s8700_s26 = scalar_lea.hbm %s11448_s8, 32 }
 0xf13   : > { %p8697_p4 = scmp.ne.s32.totalorder %s11398_s18, %s8696_s23  ;;  %p8701_p9 = scmp.lt.u32.totalorder %s11398_s18, %s11448_s8 }
 0xf14   : > { %p8702_p10 = scmp.lt.u32.totalorder %s8700_s26, %s8696_s23  ;;  %p8704_p12 = scmp.lt.u32.totalorder %s8696_s23, %s11398_s18 }
 0xf15   : > { %p8698_p7 = pnand %p8697_p4, %p8834_p5 }
 0xf16   : > { %p8703_p11 = por %p8702_p10, %p8701_p9 }
 0xf17   : > { %p8699_p8 = pneg %p8698_p7 }
 0xf18   : > { %p8705_p13 = por %p8704_p12, %p8703_p11 }
 0xf1a   : > { %p8706_p0 = pnand %p8705_p13, %p8699_p8 }
 0xf1c   : > { %8709 = shalt.err (!%p8706_p0)
}
 0xf1d   : > { %8615 = dma.vmem_to_hbm [thread:$0]  (%p8834_p5), %s11400_s12, 16, %s11398_s18, %s5424_s19  }
 0xf1e PF: > { %p8621_p1 = scmp.ge.s32.totalorder %s8744_s30, 2  ;;  %s5448_s17 = sand.u32 1, %s8732_s27  }
 0xf1f   : > { %s5449_s20 = scalar_lea.sflag [#allocation3], %s5448_s17 }
 0xf20   : > { %p8618_p2 = pnand %p8621_p1, %p8838_p6 }
 0xf22   : > { %8727 = dma.done.wait (!%p8618_p2), %s5449_s20, 16  }
 0xf23   : > { %8729 = vsyncadd (!%p8618_p2), %s5449_s20, 4294967280  ;;  %p18_p3 = scmp.ge.s32.totalorder %s8821_s11, 4   ;;  %s11593_s27 = smov %s8736_s28 }
 0xf24   : > { %s11594_s28 = smov %s8740_s29  ;;  %s11595_s29 = smov %s8832_s14 }
 0xf25   : > { %s11596_s30 = smov %s8821_s11  ;;  %20 = sbr.rel (!%p18_p3) target bundleno = 3 (0x3), region = 101 }
 0xf2c   :  { %5453 = vsyncpa [#allocation3], 1 }
 0xf2d   :  { %5455 = vsyncpa [#allocation3 + $0x1], 1 }

</bundles_post_ra>
